<compile_context>
chip_gen: v6e
topology: v6e:2x2x1
jax: 0.10.0
libtpu: 0.0.40
codegen_flags: <defaults>
</compile_context>

<pallas_src>
import functools

import jax
import jax.numpy as jnp
from jax.experimental import pallas as pl
from jax.experimental.pallas import tpu as pltpu


def _layer_norm(x, gamma, beta, eps=1e-5):
    mu = jnp.mean(x, axis=-1, keepdims=True)
    xc = x - mu
    var = jnp.mean(xc * xc, axis=-1, keepdims=True)
    return xc * jax.lax.rsqrt(var + eps) * gamma + beta


def _encoder_layer_kernel(n_batch, seq_len, n_heads,
                          x_ref,
                          wqkv_ref, bqkv_ref, wout_ref, bout_ref,
                          g0_ref, be0_ref,
                          wfc0_ref, bfc0_ref, wfc1_ref, bfc1_ref,
                          g1_ref, be1_ref,
                          out_ref, attn_ref):
    E = x_ref.shape[-1]
    Dh = E // n_heads
    scale = 1.0 / float(Dh) ** 0.5

    x = x_ref[...]                                            # (N*L, E), rows grouped per batch
    # Fused QKV projection for all timesteps / batches / gates in one matmul.
    qkv = jnp.dot(x, wqkv_ref[...],
                  preferred_element_type=jnp.float32) + bqkv_ref[...]   # (N*L, 3E)

    ctx_rows = []
    for n in range(n_batch):                                  # static, fully unrolled
        r0 = n * seq_len
        q_n = qkv[r0:r0 + seq_len, 0:E] * scale               # (L, E)
        k_n = qkv[r0:r0 + seq_len, E:2 * E]
        v_n = qkv[r0:r0 + seq_len, 2 * E:3 * E]

        attn_avg = jnp.zeros((seq_len, seq_len), jnp.float32)
        head_ctx = []
        for h in range(n_heads):                              # static, fully unrolled
            c0 = h * Dh
            qh = q_n[:, c0:c0 + Dh]                           # (L, Dh)
            kh = k_n[:, c0:c0 + Dh]
            vh = v_n[:, c0:c0 + Dh]
            # scores = qh @ kh.T without an explicit transpose.
            s = jax.lax.dot_general(qh, kh, (((1,), (1,)), ((), ())),
                                    preferred_element_type=jnp.float32)  # (L, L)
            p = jax.nn.softmax(s, axis=-1)
            attn_avg = attn_avg + p
            head_ctx.append(jnp.dot(p, vh,
                                    preferred_element_type=jnp.float32))  # (L, Dh)

        attn_ref[n] = (attn_avg * (1.0 / n_heads)).astype(attn_ref.dtype)
        ctx_rows.append(jnp.concatenate(head_ctx, axis=-1))   # (L, E)

    ctx = jnp.concatenate(ctx_rows, axis=0)                   # (N*L, E)

    attn_out = jnp.dot(ctx, wout_ref[...],
                       preferred_element_type=jnp.float32) + bout_ref[...]
    # residual + LayerNorm 0   (dropout_attn == identity in eval mode)
    y0 = _layer_norm(x + attn_out, g0_ref[...], be0_ref[...])

    # Feed-forward: fused over the whole (N*L, E) slab.
    hdn = jnp.dot(y0, wfc0_ref[...],
                  preferred_element_type=jnp.float32) + bfc0_ref[...]
    hdn = jax.nn.gelu(hdn, approximate=True)   # TODO(synk): exact erf GELU
    ffn = jnp.dot(hdn, wfc1_ref[...],
                  preferred_element_type=jnp.float32) + bfc1_ref[...]

    # residual + LayerNorm 1   (dropout_0 / dropout_1 == identity in eval mode)
    y1 = _layer_norm(y0 + ffn, g1_ref[...], be1_ref[...])
    out_ref[...] = y1.astype(out_ref.dtype)


def custom_transformer_encoder_layer(src, params, n_heads,
                                     src_mask=None, src_key_padding_mask=None):
    """src: (L, N, E) f32 (PyTorch batch_first=False). Returns (out (L,N,E), attn (N,L,L))."""
    assert src_mask is None and src_key_padding_mask is None  # TODO(synk): masks not implemented
    L, N, E = src.shape

    # Lane-dense 2D slab, rows grouped per batch element: row = n*L + l.
    x2d = jnp.transpose(src, (1, 0, 2)).reshape(N * L, E)

    kernel = functools.partial(_encoder_layer_kernel, N, L, n_heads)
    vmem = pl.BlockSpec(memory_space=pltpu.MemorySpace.VMEM)

    out2d, attn = pl.pallas_call(
        kernel,
        out_shape=(jax.ShapeDtypeStruct((N * L, E), jnp.float32),
                   jax.ShapeDtypeStruct((N, L, L), jnp.float32)),
        in_specs=[vmem] * 13,
        out_specs=(vmem, vmem),
    )(x2d,
      params["w_qkv"], params["b_qkv"], params["w_out"], params["b_out"],
      params["ln0_g"], params["ln0_b"],
      params["w_fc0"], params["b_fc0"], params["w_fc1"], params["b_fc1"],
      params["ln1_g"], params["ln1_b"])

    out = jnp.transpose(out2d.reshape(N, L, E), (1, 0, 2))    # back to (L, N, E)
    return out, attn


# ----------------------- pure-JAX reference (for checking) -----------------------
def reference_forward(src, params, n_heads):
    L, N, E = src.shape
    Dh = E // n_heads
    scale = 1.0 / float(Dh) ** 0.5

    qkv = src @ params["w_qkv"] + params["b_qkv"]             # (L, N, 3E)
    q, k, v = qkv[..., :E] * scale, qkv[..., E:2 * E], qkv[..., 2 * E:]

    def split(t):   # (L, N, E) -> (N, H, L, Dh)
        return jnp.transpose(t.reshape(L, N, n_heads, Dh), (1, 2, 0, 3))

    qh, kh, vh = split(q), split(k), split(v)
    s = jnp.einsum("nhld,nhmd->nhlm", qh, kh)
    p = jax.nn.softmax(s, axis=-1)
    ctx = jnp.einsum("nhlm,nhmd->nhld", p, vh)                # (N, H, L, Dh)
    ctx = jnp.transpose(ctx, (2, 0, 1, 3)).reshape(L, N, E)
    attn_out = ctx @ params["w_out"] + params["b_out"]
    attn_weights = jnp.mean(p, axis=1)                        # (N, L, L), avg over heads

    y0 = _layer_norm(src + attn_out, params["ln0_g"], params["ln0_b"])
    hdn = jax.nn.gelu(y0 @ params["w_fc0"] + params["b_fc0"], approximate=True)
    ffn = hdn @ params["w_fc1"] + params["b_fc1"]
    y1 = _layer_norm(y0 + ffn, params["ln1_g"], params["ln1_b"])
    return y1, attn_weights


# ---------------------------------- main ----------------------------------------
if __name__ == "__main__":
    jax.config.update("jax_default_matmul_precision", "highest")

    # Small but lane-aligned shapes: seq=8, batch=2, d_model=128 (4 heads of 32),
    # d_feedforward=256.
    L, N, E, H, F = 8, 2, 128, 4, 256

    key = jax.random.PRNGKey(0)
    ks = jax.random.split(key, 12)

    def uni(kk, shape, fan_in):
        b = 1.0 / jnp.sqrt(jnp.float32(fan_in))
        return jax.random.uniform(kk, shape, jnp.float32, -b, b)

    params = {
        # MultiheadAttention in_proj / out_proj (already transposed for x @ W)
        "w_qkv": uni(ks[0], (E, 3 * E), E),
        "b_qkv": uni(ks[1], (1, 3 * E), E),
        "w_out": uni(ks[2], (E, E), E),
        "b_out": uni(ks[3], (1, E), E),
        # LayerNorm 0
        "ln0_g": 1.0 + uni(ks[4], (1, E), E),
        "ln0_b": uni(ks[5], (1, E), E),
        # Feed-forward
        "w_fc0": uni(ks[6], (E, F), E),
        "b_fc0": uni(ks[7], (1, F), E),
        "w_fc1": uni(ks[8], (F, E), F),
        "b_fc1": uni(ks[9], (1, E), F),
        # LayerNorm 1
        "ln1_g": 1.0 + uni(ks[10], (1, E), E),
        "ln1_b": uni(ks[11], (1, E), E),
    }

    src = jax.random.normal(jax.random.PRNGKey(1), (L, N, E), jnp.float32)

    out, attn = custom_transformer_encoder_layer(src, params, n_heads=H)
    out, attn = jax.block_until_ready((out, attn))
    assert out.shape == (L, N, E), out.shape
    assert attn.shape == (N, L, L), attn.shape

    ref_out, ref_attn = reference_forward(src, params, n_heads=H)
    ref_out, ref_attn = jax.block_until_ready((ref_out, ref_attn))

    assert jnp.allclose(out, ref_out, atol=2e-3, rtol=2e-3), \
        float(jnp.max(jnp.abs(out - ref_out)))
    assert jnp.allclose(attn, ref_attn, atol=2e-3, rtol=2e-3), \
        float(jnp.max(jnp.abs(attn - ref_attn)))

    print("KERNEL_OK")
</pallas_src>

<mosaic_0001>
module attributes {stable_mosaic.version = 11 : i64} {
  func.func @_encoder_layer_kernel(%arg0: memref<16x128xf32, #tpu.memory_space<vmem>>, %arg1: memref<128x384xf32, #tpu.memory_space<vmem>>, %arg2: memref<1x384xf32, #tpu.memory_space<vmem>>, %arg3: memref<128x128xf32, #tpu.memory_space<vmem>>, %arg4: memref<1x128xf32, #tpu.memory_space<vmem>>, %arg5: memref<1x128xf32, #tpu.memory_space<vmem>>, %arg6: memref<1x128xf32, #tpu.memory_space<vmem>>, %arg7: memref<128x256xf32, #tpu.memory_space<vmem>>, %arg8: memref<1x256xf32, #tpu.memory_space<vmem>>, %arg9: memref<256x128xf32, #tpu.memory_space<vmem>>, %arg10: memref<1x128xf32, #tpu.memory_space<vmem>>, %arg11: memref<1x128xf32, #tpu.memory_space<vmem>>, %arg12: memref<1x128xf32, #tpu.memory_space<vmem>>, %arg13: memref<16x128xf32, #tpu.memory_space<vmem>>, %arg14: memref<2x8x8xf32, #tpu.memory_space<vmem>>) attributes {dimension_semantics = [], scalar_prefetch = 0 : i64, scratch_operands = 0 : i64, tpu.core_type = #tpu.core_type<tc>} {
    %c0 = arith.constant 0 : index
    %c0_0 = arith.constant 0 : index
    %0 = vector.load %arg0[%c0, %c0_0] : memref<16x128xf32, #tpu.memory_space<vmem>>, vector<16x128xf32>
    %c0_1 = arith.constant 0 : index
    %c0_2 = arith.constant 0 : index
    %1 = vector.load %arg1[%c0_1, %c0_2] : memref<128x384xf32, #tpu.memory_space<vmem>>, vector<128x384xf32>
    %cst = arith.constant dense<0.000000e+00> : vector<16x384xf32>
    %2 = tpu.matmul %0, %1, %cst {dimension_numbers = #tpu.dot_dimension_numbers<[1], [0], [0], [1], [0, 0, 1, 1], [], []>, precision = #tpu.contract_precision<fp32>} : vector<16x128xf32>, vector<128x384xf32>, vector<16x384xf32> -> vector<16x384xf32>
    %c0_3 = arith.constant 0 : index
    %c0_4 = arith.constant 0 : index
    %3 = vector.load %arg2[%c0_3, %c0_4] : memref<1x384xf32, #tpu.memory_space<vmem>>, vector<1x384xf32>
    %4 = vector.broadcast %3 : vector<1x384xf32> to vector<16x384xf32>
    %5 = arith.addf %2, %4 : vector<16x384xf32>
    %6 = vector.extract_strided_slice %5 {offsets = [0, 0], sizes = [8, 128], strides = [1, 1]} : vector<16x384xf32> to vector<8x128xf32>
    %cst_5 = arith.constant 0.176776692 : f32
    %7 = vector.broadcast %cst_5 : f32 to vector<8x128xf32>
    %8 = arith.mulf %6, %7 : vector<8x128xf32>
    %9 = vector.extract_strided_slice %5 {offsets = [0, 128], sizes = [8, 128], strides = [1, 1]} : vector<16x384xf32> to vector<8x128xf32>
    %10 = vector.extract_strided_slice %5 {offsets = [0, 256], sizes = [8, 128], strides = [1, 1]} : vector<16x384xf32> to vector<8x128xf32>
    %cst_6 = arith.constant 0.000000e+00 : f32
    %11 = vector.broadcast %cst_6 : f32 to vector<8x8xf32>
    %12 = vector.extract_strided_slice %8 {offsets = [0, 0], sizes = [8, 32], strides = [1, 1]} : vector<8x128xf32> to vector<8x32xf32>
    %13 = vector.extract_strided_slice %9 {offsets = [0, 0], sizes = [8, 32], strides = [1, 1]} : vector<8x128xf32> to vector<8x32xf32>
    %14 = vector.extract_strided_slice %10 {offsets = [0, 0], sizes = [8, 32], strides = [1, 1]} : vector<8x128xf32> to vector<8x32xf32>
    %cst_7 = arith.constant dense<0.000000e+00> : vector<8x8xf32>
    %15 = tpu.matmul %12, %13, %cst_7 {dimension_numbers = #tpu.dot_dimension_numbers<[1], [1], [0], [0], [0, 0, 1, 0], [], []>, precision = #tpu.contract_precision<fp32>} : vector<8x32xf32>, vector<8x32xf32>, vector<8x8xf32> -> vector<8x8xf32>
    %cst_8 = arith.constant dense<0xFF800000> : vector<8xf32>
    %16 = vector.multi_reduction <maximumf>, %15, %cst_8 [1] : vector<8x8xf32> to vector<8xf32>
    %cst_9 = arith.constant 0xFF800000 : f32
    %17 = vector.broadcast %cst_9 : f32 to vector<8xf32>
    %18 = arith.maximumf %17, %16 : vector<8xf32>
    %19 = vector.shape_cast %18 : vector<8xf32> to vector<8x1xf32>
    %20 = vector.broadcast %19 : vector<8x1xf32> to vector<8x8xf32>
    %21 = arith.subf %15, %20 : vector<8x8xf32>
    %22 = math.exp %21 : vector<8x8xf32>
    %cst_10 = arith.constant dense<0.000000e+00> : vector<8xf32>
    %23 = vector.multi_reduction <add>, %22, %cst_10 [1] : vector<8x8xf32> to vector<8xf32>
    %24 = vector.shape_cast %23 : vector<8xf32> to vector<8x1xf32>
    %25 = vector.broadcast %24 : vector<8x1xf32> to vector<8x8xf32>
    %26 = arith.divf %22, %25 : vector<8x8xf32>
    %27 = arith.addf %11, %26 : vector<8x8xf32>
    %cst_11 = arith.constant dense<0.000000e+00> : vector<8x32xf32>
    %28 = tpu.matmul %26, %14, %cst_11 {dimension_numbers = #tpu.dot_dimension_numbers<[1], [0], [0], [1], [0, 0, 1, 1], [], []>, precision = #tpu.contract_precision<fp32>} : vector<8x8xf32>, vector<8x32xf32>, vector<8x32xf32> -> vector<8x32xf32>
    %29 = vector.extract_strided_slice %8 {offsets = [0, 32], sizes = [8, 32], strides = [1, 1]} : vector<8x128xf32> to vector<8x32xf32>
    %30 = vector.extract_strided_slice %9 {offsets = [0, 32], sizes = [8, 32], strides = [1, 1]} : vector<8x128xf32> to vector<8x32xf32>
    %31 = vector.extract_strided_slice %10 {offsets = [0, 32], sizes = [8, 32], strides = [1, 1]} : vector<8x128xf32> to vector<8x32xf32>
    %cst_12 = arith.constant dense<0.000000e+00> : vector<8x8xf32>
    %32 = tpu.matmul %29, %30, %cst_12 {dimension_numbers = #tpu.dot_dimension_numbers<[1], [1], [0], [0], [0, 0, 1, 0], [], []>, precision = #tpu.contract_precision<fp32>} : vector<8x32xf32>, vector<8x32xf32>, vector<8x8xf32> -> vector<8x8xf32>
    %cst_13 = arith.constant dense<0xFF800000> : vector<8xf32>
    %33 = vector.multi_reduction <maximumf>, %32, %cst_13 [1] : vector<8x8xf32> to vector<8xf32>
    %cst_14 = arith.constant 0xFF800000 : f32
    %34 = vector.broadcast %cst_14 : f32 to vector<8xf32>
    %35 = arith.maximumf %34, %33 : vector<8xf32>
    %36 = vector.shape_cast %35 : vector<8xf32> to vector<8x1xf32>
    %37 = vector.broadcast %36 : vector<8x1xf32> to vector<8x8xf32>
    %38 = arith.subf %32, %37 : vector<8x8xf32>
    %39 = math.exp %38 : vector<8x8xf32>
    %cst_15 = arith.constant dense<0.000000e+00> : vector<8xf32>
    %40 = vector.multi_reduction <add>, %39, %cst_15 [1] : vector<8x8xf32> to vector<8xf32>
    %41 = vector.shape_cast %40 : vector<8xf32> to vector<8x1xf32>
    %42 = vector.broadcast %41 : vector<8x1xf32> to vector<8x8xf32>
    %43 = arith.divf %39, %42 : vector<8x8xf32>
    %44 = arith.addf %27, %43 : vector<8x8xf32>
    %cst_16 = arith.constant dense<0.000000e+00> : vector<8x32xf32>
    %45 = tpu.matmul %43, %31, %cst_16 {dimension_numbers = #tpu.dot_dimension_numbers<[1], [0], [0], [1], [0, 0, 1, 1], [], []>, precision = #tpu.contract_precision<fp32>} : vector<8x8xf32>, vector<8x32xf32>, vector<8x32xf32> -> vector<8x32xf32>
    %46 = vector.extract_strided_slice %8 {offsets = [0, 64], sizes = [8, 32], strides = [1, 1]} : vector<8x128xf32> to vector<8x32xf32>
    %47 = vector.extract_strided_slice %9 {offsets = [0, 64], sizes = [8, 32], strides = [1, 1]} : vector<8x128xf32> to vector<8x32xf32>
    %48 = vector.extract_strided_slice %10 {offsets = [0, 64], sizes = [8, 32], strides = [1, 1]} : vector<8x128xf32> to vector<8x32xf32>
    %cst_17 = arith.constant dense<0.000000e+00> : vector<8x8xf32>
    %49 = tpu.matmul %46, %47, %cst_17 {dimension_numbers = #tpu.dot_dimension_numbers<[1], [1], [0], [0], [0, 0, 1, 0], [], []>, precision = #tpu.contract_precision<fp32>} : vector<8x32xf32>, vector<8x32xf32>, vector<8x8xf32> -> vector<8x8xf32>
    %cst_18 = arith.constant dense<0xFF800000> : vector<8xf32>
    %50 = vector.multi_reduction <maximumf>, %49, %cst_18 [1] : vector<8x8xf32> to vector<8xf32>
    %cst_19 = arith.constant 0xFF800000 : f32
    %51 = vector.broadcast %cst_19 : f32 to vector<8xf32>
    %52 = arith.maximumf %51, %50 : vector<8xf32>
    %53 = vector.shape_cast %52 : vector<8xf32> to vector<8x1xf32>
    %54 = vector.broadcast %53 : vector<8x1xf32> to vector<8x8xf32>
    %55 = arith.subf %49, %54 : vector<8x8xf32>
    %56 = math.exp %55 : vector<8x8xf32>
    %cst_20 = arith.constant dense<0.000000e+00> : vector<8xf32>
    %57 = vector.multi_reduction <add>, %56, %cst_20 [1] : vector<8x8xf32> to vector<8xf32>
    %58 = vector.shape_cast %57 : vector<8xf32> to vector<8x1xf32>
    %59 = vector.broadcast %58 : vector<8x1xf32> to vector<8x8xf32>
    %60 = arith.divf %56, %59 : vector<8x8xf32>
    %61 = arith.addf %44, %60 : vector<8x8xf32>
    %cst_21 = arith.constant dense<0.000000e+00> : vector<8x32xf32>
    %62 = tpu.matmul %60, %48, %cst_21 {dimension_numbers = #tpu.dot_dimension_numbers<[1], [0], [0], [1], [0, 0, 1, 1], [], []>, precision = #tpu.contract_precision<fp32>} : vector<8x8xf32>, vector<8x32xf32>, vector<8x32xf32> -> vector<8x32xf32>
    %63 = vector.extract_strided_slice %8 {offsets = [0, 96], sizes = [8, 32], strides = [1, 1]} : vector<8x128xf32> to vector<8x32xf32>
    %64 = vector.extract_strided_slice %9 {offsets = [0, 96], sizes = [8, 32], strides = [1, 1]} : vector<8x128xf32> to vector<8x32xf32>
    %65 = vector.extract_strided_slice %10 {offsets = [0, 96], sizes = [8, 32], strides = [1, 1]} : vector<8x128xf32> to vector<8x32xf32>
    %cst_22 = arith.constant dense<0.000000e+00> : vector<8x8xf32>
    %66 = tpu.matmul %63, %64, %cst_22 {dimension_numbers = #tpu.dot_dimension_numbers<[1], [1], [0], [0], [0, 0, 1, 0], [], []>, precision = #tpu.contract_precision<fp32>} : vector<8x32xf32>, vector<8x32xf32>, vector<8x8xf32> -> vector<8x8xf32>
    %cst_23 = arith.constant dense<0xFF800000> : vector<8xf32>
    %67 = vector.multi_reduction <maximumf>, %66, %cst_23 [1] : vector<8x8xf32> to vector<8xf32>
    %cst_24 = arith.constant 0xFF800000 : f32
    %68 = vector.broadcast %cst_24 : f32 to vector<8xf32>
    %69 = arith.maximumf %68, %67 : vector<8xf32>
    %70 = vector.shape_cast %69 : vector<8xf32> to vector<8x1xf32>
    %71 = vector.broadcast %70 : vector<8x1xf32> to vector<8x8xf32>
    %72 = arith.subf %66, %71 : vector<8x8xf32>
    %73 = math.exp %72 : vector<8x8xf32>
    %cst_25 = arith.constant dense<0.000000e+00> : vector<8xf32>
    %74 = vector.multi_reduction <add>, %73, %cst_25 [1] : vector<8x8xf32> to vector<8xf32>
    %75 = vector.shape_cast %74 : vector<8xf32> to vector<8x1xf32>
    %76 = vector.broadcast %75 : vector<8x1xf32> to vector<8x8xf32>
    %77 = arith.divf %73, %76 : vector<8x8xf32>
    %78 = arith.addf %61, %77 : vector<8x8xf32>
    %cst_26 = arith.constant dense<0.000000e+00> : vector<8x32xf32>
    %79 = tpu.matmul %77, %65, %cst_26 {dimension_numbers = #tpu.dot_dimension_numbers<[1], [0], [0], [1], [0, 0, 1, 1], [], []>, precision = #tpu.contract_precision<fp32>} : vector<8x8xf32>, vector<8x32xf32>, vector<8x32xf32> -> vector<8x32xf32>
    %cst_27 = arith.constant 2.500000e-01 : f32
    %80 = vector.broadcast %cst_27 : f32 to vector<8x8xf32>
    %81 = arith.mulf %78, %80 : vector<8x8xf32>
    %c0_28 = arith.constant 0 : index
    %c0_29 = arith.constant 0 : index
    %c0_30 = arith.constant 0 : index
    %82 = vector.load %arg14[%c0_28, %c0_29, %c0_30] : memref<2x8x8xf32, #tpu.memory_space<vmem>>, vector<1x8x8xf32>
    %83 = vector.shape_cast %82 : vector<1x8x8xf32> to vector<8x8xf32>
    %84 = vector.shape_cast %81 : vector<8x8xf32> to vector<1x8x8xf32>
    tpu.vector_store %arg14[%c0_28, %c0_29, %c0_30], %84 {strides = array<i32>} : memref<2x8x8xf32, #tpu.memory_space<vmem>>, vector<1x8x8xf32>,
    %85 = tpu.concatenate %28, %45, %62, %79 in 1 : vector<8x32xf32>, vector<8x32xf32>, vector<8x32xf32>, vector<8x32xf32> -> vector<8x128xf32>
    %86 = vector.extract_strided_slice %5 {offsets = [8, 0], sizes = [8, 128], strides = [1, 1]} : vector<16x384xf32> to vector<8x128xf32>
    %cst_31 = arith.constant 0.176776692 : f32
    %87 = vector.broadcast %cst_31 : f32 to vector<8x128xf32>
    %88 = arith.mulf %86, %87 : vector<8x128xf32>
    %89 = vector.extract_strided_slice %5 {offsets = [8, 128], sizes = [8, 128], strides = [1, 1]} : vector<16x384xf32> to vector<8x128xf32>
    %90 = vector.extract_strided_slice %5 {offsets = [8, 256], sizes = [8, 128], strides = [1, 1]} : vector<16x384xf32> to vector<8x128xf32>
    %cst_32 = arith.constant 0.000000e+00 : f32
    %91 = vector.broadcast %cst_32 : f32 to vector<8x8xf32>
    %92 = vector.extract_strided_slice %88 {offsets = [0, 0], sizes = [8, 32], strides = [1, 1]} : vector<8x128xf32> to vector<8x32xf32>
    %93 = vector.extract_strided_slice %89 {offsets = [0, 0], sizes = [8, 32], strides = [1, 1]} : vector<8x128xf32> to vector<8x32xf32>
    %94 = vector.extract_strided_slice %90 {offsets = [0, 0], sizes = [8, 32], strides = [1, 1]} : vector<8x128xf32> to vector<8x32xf32>
    %cst_33 = arith.constant dense<0.000000e+00> : vector<8x8xf32>
    %95 = tpu.matmul %92, %93, %cst_33 {dimension_numbers = #tpu.dot_dimension_numbers<[1], [1], [0], [0], [0, 0, 1, 0], [], []>, precision = #tpu.contract_precision<fp32>} : vector<8x32xf32>, vector<8x32xf32>, vector<8x8xf32> -> vector<8x8xf32>
    %cst_34 = arith.constant dense<0xFF800000> : vector<8xf32>
    %96 = vector.multi_reduction <maximumf>, %95, %cst_34 [1] : vector<8x8xf32> to vector<8xf32>
    %cst_35 = arith.constant 0xFF800000 : f32
    %97 = vector.broadcast %cst_35 : f32 to vector<8xf32>
    %98 = arith.maximumf %97, %96 : vector<8xf32>
    %99 = vector.shape_cast %98 : vector<8xf32> to vector<8x1xf32>
    %100 = vector.broadcast %99 : vector<8x1xf32> to vector<8x8xf32>
    %101 = arith.subf %95, %100 : vector<8x8xf32>
    %102 = math.exp %101 : vector<8x8xf32>
    %cst_36 = arith.constant dense<0.000000e+00> : vector<8xf32>
    %103 = vector.multi_reduction <add>, %102, %cst_36 [1] : vector<8x8xf32> to vector<8xf32>
    %104 = vector.shape_cast %103 : vector<8xf32> to vector<8x1xf32>
    %105 = vector.broadcast %104 : vector<8x1xf32> to vector<8x8xf32>
    %106 = arith.divf %102, %105 : vector<8x8xf32>
    %107 = arith.addf %91, %106 : vector<8x8xf32>
    %cst_37 = arith.constant dense<0.000000e+00> : vector<8x32xf32>
    %108 = tpu.matmul %106, %94, %cst_37 {dimension_numbers = #tpu.dot_dimension_numbers<[1], [0], [0], [1], [0, 0, 1, 1], [], []>, precision = #tpu.contract_precision<fp32>} : vector<8x8xf32>, vector<8x32xf32>, vector<8x32xf32> -> vector<8x32xf32>
    %109 = vector.extract_strided_slice %88 {offsets = [0, 32], sizes = [8, 32], strides = [1, 1]} : vector<8x128xf32> to vector<8x32xf32>
    %110 = vector.extract_strided_slice %89 {offsets = [0, 32], sizes = [8, 32], strides = [1, 1]} : vector<8x128xf32> to vector<8x32xf32>
    %111 = vector.extract_strided_slice %90 {offsets = [0, 32], sizes = [8, 32], strides = [1, 1]} : vector<8x128xf32> to vector<8x32xf32>
    %cst_38 = arith.constant dense<0.000000e+00> : vector<8x8xf32>
    %112 = tpu.matmul %109, %110, %cst_38 {dimension_numbers = #tpu.dot_dimension_numbers<[1], [1], [0], [0], [0, 0, 1, 0], [], []>, precision = #tpu.contract_precision<fp32>} : vector<8x32xf32>, vector<8x32xf32>, vector<8x8xf32> -> vector<8x8xf32>
    %cst_39 = arith.constant dense<0xFF800000> : vector<8xf32>
    %113 = vector.multi_reduction <maximumf>, %112, %cst_39 [1] : vector<8x8xf32> to vector<8xf32>
    %cst_40 = arith.constant 0xFF800000 : f32
    %114 = vector.broadcast %cst_40 : f32 to vector<8xf32>
    %115 = arith.maximumf %114, %113 : vector<8xf32>
    %116 = vector.shape_cast %115 : vector<8xf32> to vector<8x1xf32>
    %117 = vector.broadcast %116 : vector<8x1xf32> to vector<8x8xf32>
    %118 = arith.subf %112, %117 : vector<8x8xf32>
    %119 = math.exp %118 : vector<8x8xf32>
    %cst_41 = arith.constant dense<0.000000e+00> : vector<8xf32>
    %120 = vector.multi_reduction <add>, %119, %cst_41 [1] : vector<8x8xf32> to vector<8xf32>
    %121 = vector.shape_cast %120 : vector<8xf32> to vector<8x1xf32>
    %122 = vector.broadcast %121 : vector<8x1xf32> to vector<8x8xf32>
    %123 = arith.divf %119, %122 : vector<8x8xf32>
    %124 = arith.addf %107, %123 : vector<8x8xf32>
    %cst_42 = arith.constant dense<0.000000e+00> : vector<8x32xf32>
    %125 = tpu.matmul %123, %111, %cst_42 {dimension_numbers = #tpu.dot_dimension_numbers<[1], [0], [0], [1], [0, 0, 1, 1], [], []>, precision = #tpu.contract_precision<fp32>} : vector<8x8xf32>, vector<8x32xf32>, vector<8x32xf32> -> vector<8x32xf32>
    %126 = vector.extract_strided_slice %88 {offsets = [0, 64], sizes = [8, 32], strides = [1, 1]} : vector<8x128xf32> to vector<8x32xf32>
    %127 = vector.extract_strided_slice %89 {offsets = [0, 64], sizes = [8, 32], strides = [1, 1]} : vector<8x128xf32> to vector<8x32xf32>
    %128 = vector.extract_strided_slice %90 {offsets = [0, 64], sizes = [8, 32], strides = [1, 1]} : vector<8x128xf32> to vector<8x32xf32>
    %cst_43 = arith.constant dense<0.000000e+00> : vector<8x8xf32>
    %129 = tpu.matmul %126, %127, %cst_43 {dimension_numbers = #tpu.dot_dimension_numbers<[1], [1], [0], [0], [0, 0, 1, 0], [], []>, precision = #tpu.contract_precision<fp32>} : vector<8x32xf32>, vector<8x32xf32>, vector<8x8xf32> -> vector<8x8xf32>
    %cst_44 = arith.constant dense<0xFF800000> : vector<8xf32>
    %130 = vector.multi_reduction <maximumf>, %129, %cst_44 [1] : vector<8x8xf32> to vector<8xf32>
    %cst_45 = arith.constant 0xFF800000 : f32
    %131 = vector.broadcast %cst_45 : f32 to vector<8xf32>
    %132 = arith.maximumf %131, %130 : vector<8xf32>
    %133 = vector.shape_cast %132 : vector<8xf32> to vector<8x1xf32>
    %134 = vector.broadcast %133 : vector<8x1xf32> to vector<8x8xf32>
    %135 = arith.subf %129, %134 : vector<8x8xf32>
    %136 = math.exp %135 : vector<8x8xf32>
    %cst_46 = arith.constant dense<0.000000e+00> : vector<8xf32>
    %137 = vector.multi_reduction <add>, %136, %cst_46 [1] : vector<8x8xf32> to vector<8xf32>
    %138 = vector.shape_cast %137 : vector<8xf32> to vector<8x1xf32>
    %139 = vector.broadcast %138 : vector<8x1xf32> to vector<8x8xf32>
    %140 = arith.divf %136, %139 : vector<8x8xf32>
    %141 = arith.addf %124, %140 : vector<8x8xf32>
    %cst_47 = arith.constant dense<0.000000e+00> : vector<8x32xf32>
    %142 = tpu.matmul %140, %128, %cst_47 {dimension_numbers = #tpu.dot_dimension_numbers<[1], [0], [0], [1], [0, 0, 1, 1], [], []>, precision = #tpu.contract_precision<fp32>} : vector<8x8xf32>, vector<8x32xf32>, vector<8x32xf32> -> vector<8x32xf32>
    %143 = vector.extract_strided_slice %88 {offsets = [0, 96], sizes = [8, 32], strides = [1, 1]} : vector<8x128xf32> to vector<8x32xf32>
    %144 = vector.extract_strided_slice %89 {offsets = [0, 96], sizes = [8, 32], strides = [1, 1]} : vector<8x128xf32> to vector<8x32xf32>
    %145 = vector.extract_strided_slice %90 {offsets = [0, 96], sizes = [8, 32], strides = [1, 1]} : vector<8x128xf32> to vector<8x32xf32>
    %cst_48 = arith.constant dense<0.000000e+00> : vector<8x8xf32>
    %146 = tpu.matmul %143, %144, %cst_48 {dimension_numbers = #tpu.dot_dimension_numbers<[1], [1], [0], [0], [0, 0, 1, 0], [], []>, precision = #tpu.contract_precision<fp32>} : vector<8x32xf32>, vector<8x32xf32>, vector<8x8xf32> -> vector<8x8xf32>
    %cst_49 = arith.constant dense<0xFF800000> : vector<8xf32>
    %147 = vector.multi_reduction <maximumf>, %146, %cst_49 [1] : vector<8x8xf32> to vector<8xf32>
    %cst_50 = arith.constant 0xFF800000 : f32
    %148 = vector.broadcast %cst_50 : f32 to vector<8xf32>
    %149 = arith.maximumf %148, %147 : vector<8xf32>
    %150 = vector.shape_cast %149 : vector<8xf32> to vector<8x1xf32>
    %151 = vector.broadcast %150 : vector<8x1xf32> to vector<8x8xf32>
    %152 = arith.subf %146, %151 : vector<8x8xf32>
    %153 = math.exp %152 : vector<8x8xf32>
    %cst_51 = arith.constant dense<0.000000e+00> : vector<8xf32>
    %154 = vector.multi_reduction <add>, %153, %cst_51 [1] : vector<8x8xf32> to vector<8xf32>
    %155 = vector.shape_cast %154 : vector<8xf32> to vector<8x1xf32>
    %156 = vector.broadcast %155 : vector<8x1xf32> to vector<8x8xf32>
    %157 = arith.divf %153, %156 : vector<8x8xf32>
    %158 = arith.addf %141, %157 : vector<8x8xf32>
    %cst_52 = arith.constant dense<0.000000e+00> : vector<8x32xf32>
    %159 = tpu.matmul %157, %145, %cst_52 {dimension_numbers = #tpu.dot_dimension_numbers<[1], [0], [0], [1], [0, 0, 1, 1], [], []>, precision = #tpu.contract_precision<fp32>} : vector<8x8xf32>, vector<8x32xf32>, vector<8x32xf32> -> vector<8x32xf32>
    %cst_53 = arith.constant 2.500000e-01 : f32
    %160 = vector.broadcast %cst_53 : f32 to vector<8x8xf32>
    %161 = arith.mulf %158, %160 : vector<8x8xf32>
    %c1 = arith.constant 1 : index
    %c0_54 = arith.constant 0 : index
    %c0_55 = arith.constant 0 : index
    %162 = vector.load %arg14[%c1, %c0_54, %c0_55] : memref<2x8x8xf32, #tpu.memory_space<vmem>>, vector<1x8x8xf32>
    %163 = vector.shape_cast %162 : vector<1x8x8xf32> to vector<8x8xf32>
    %164 = vector.shape_cast %161 : vector<8x8xf32> to vector<1x8x8xf32>
    tpu.vector_store %arg14[%c1, %c0_54, %c0_55], %164 {strides = array<i32>} : memref<2x8x8xf32, #tpu.memory_space<vmem>>, vector<1x8x8xf32>,
    %165 = tpu.concatenate %108, %125, %142, %159 in 1 : vector<8x32xf32>, vector<8x32xf32>, vector<8x32xf32>, vector<8x32xf32> -> vector<8x128xf32>
    %166 = tpu.concatenate %85, %165 in 0 : vector<8x128xf32>, vector<8x128xf32> -> vector<16x128xf32>
    %c0_56 = arith.constant 0 : index
    %c0_57 = arith.constant 0 : index
    %167 = vector.load %arg3[%c0_56, %c0_57] : memref<128x128xf32, #tpu.memory_space<vmem>>, vector<128x128xf32>
    %cst_58 = arith.constant dense<0.000000e+00> : vector<16x128xf32>
    %168 = tpu.matmul %166, %167, %cst_58 {dimension_numbers = #tpu.dot_dimension_numbers<[1], [0], [0], [1], [0, 0, 1, 1], [], []>, precision = #tpu.contract_precision<fp32>} : vector<16x128xf32>, vector<128x128xf32>, vector<16x128xf32> -> vector<16x128xf32>
    %c0_59 = arith.constant 0 : index
    %c0_60 = arith.constant 0 : index
    %169 = vector.load %arg4[%c0_59, %c0_60] : memref<1x128xf32, #tpu.memory_space<vmem>>, vector<1x128xf32>
    %170 = vector.broadcast %169 : vector<1x128xf32> to vector<16x128xf32>
    %171 = arith.addf %168, %170 : vector<16x128xf32>
    %172 = arith.addf %0, %171 : vector<16x128xf32>
    %c0_61 = arith.constant 0 : index
    %c0_62 = arith.constant 0 : index
    %173 = vector.load %arg5[%c0_61, %c0_62] : memref<1x128xf32, #tpu.memory_space<vmem>>, vector<1x128xf32>
    %c0_63 = arith.constant 0 : index
    %c0_64 = arith.constant 0 : index
    %174 = vector.load %arg6[%c0_63, %c0_64] : memref<1x128xf32, #tpu.memory_space<vmem>>, vector<1x128xf32>
    %cst_65 = arith.constant dense<0.000000e+00> : vector<16xf32>
    %175 = vector.multi_reduction <add>, %172, %cst_65 [1] : vector<16x128xf32> to vector<16xf32>
    %176 = vector.shape_cast %175 : vector<16xf32> to vector<16x1xf32>
    %cst_66 = arith.constant 1.280000e+02 : f32
    %177 = vector.broadcast %cst_66 : f32 to vector<16x1xf32>
    %178 = arith.divf %176, %177 : vector<16x1xf32>
    %179 = vector.broadcast %178 : vector<16x1xf32> to vector<16x128xf32>
    %180 = arith.subf %172, %179 : vector<16x128xf32>
    %181 = arith.mulf %180, %180 : vector<16x128xf32>
    %cst_67 = arith.constant dense<0.000000e+00> : vector<16xf32>
    %182 = vector.multi_reduction <add>, %181, %cst_67 [1] : vector<16x128xf32> to vector<16xf32>
    %183 = vector.shape_cast %182 : vector<16xf32> to vector<16x1xf32>
    %cst_68 = arith.constant 1.280000e+02 : f32
    %184 = vector.broadcast %cst_68 : f32 to vector<16x1xf32>
    %185 = arith.divf %183, %184 : vector<16x1xf32>
    %cst_69 = arith.constant 9.99999974E-6 : f32
    %186 = vector.broadcast %cst_69 : f32 to vector<16x1xf32>
    %187 = arith.addf %185, %186 : vector<16x1xf32>
    %188 = math.rsqrt %187 : vector<16x1xf32>
    %189 = vector.broadcast %188 : vector<16x1xf32> to vector<16x128xf32>
    %190 = arith.mulf %180, %189 : vector<16x128xf32>
    %191 = vector.broadcast %173 : vector<1x128xf32> to vector<16x128xf32>
    %192 = arith.mulf %190, %191 : vector<16x128xf32>
    %193 = vector.broadcast %174 : vector<1x128xf32> to vector<16x128xf32>
    %194 = arith.addf %192, %193 : vector<16x128xf32>
    %c0_70 = arith.constant 0 : index
    %c0_71 = arith.constant 0 : index
    %195 = vector.load %arg7[%c0_70, %c0_71] : memref<128x256xf32, #tpu.memory_space<vmem>>, vector<128x256xf32>
    %cst_72 = arith.constant dense<0.000000e+00> : vector<16x256xf32>
    %196 = tpu.matmul %194, %195, %cst_72 {dimension_numbers = #tpu.dot_dimension_numbers<[1], [0], [0], [1], [0, 0, 1, 1], [], []>, precision = #tpu.contract_precision<fp32>} : vector<16x128xf32>, vector<128x256xf32>, vector<16x256xf32> -> vector<16x256xf32>
    %c0_73 = arith.constant 0 : index
    %c0_74 = arith.constant 0 : index
    %197 = vector.load %arg8[%c0_73, %c0_74] : memref<1x256xf32, #tpu.memory_space<vmem>>, vector<1x256xf32>
    %198 = vector.broadcast %197 : vector<1x256xf32> to vector<16x256xf32>
    %199 = arith.addf %196, %198 : vector<16x256xf32>
    %200 = arith.mulf %199, %199 : vector<16x256xf32>
    %201 = arith.mulf %199, %200 : vector<16x256xf32>
    %cst_75 = arith.constant 4.471500e-02 : f32
    %202 = vector.broadcast %cst_75 : f32 to vector<16x256xf32>
    %203 = arith.mulf %202, %201 : vector<16x256xf32>
    %204 = arith.addf %199, %203 : vector<16x256xf32>
    %cst_76 = arith.constant 0.797884583 : f32
    %205 = vector.broadcast %cst_76 : f32 to vector<16x256xf32>
    %206 = arith.mulf %205, %204 : vector<16x256xf32>
    %207 = math.tanh %206 : vector<16x256xf32>
    %cst_77 = arith.constant 1.000000e+00 : f32
    %208 = vector.broadcast %cst_77 : f32 to vector<16x256xf32>
    %209 = arith.addf %208, %207 : vector<16x256xf32>
    %cst_78 = arith.constant 5.000000e-01 : f32
    %210 = vector.broadcast %cst_78 : f32 to vector<16x256xf32>
    %211 = arith.mulf %210, %209 : vector<16x256xf32>
    %212 = arith.mulf %199, %211 : vector<16x256xf32>
    %c0_79 = arith.constant 0 : index
    %c0_80 = arith.constant 0 : index
    %213 = vector.load %arg9[%c0_79, %c0_80] : memref<256x128xf32, #tpu.memory_space<vmem>>, vector<256x128xf32>
    %cst_81 = arith.constant dense<0.000000e+00> : vector<16x128xf32>
    %214 = tpu.matmul %212, %213, %cst_81 {dimension_numbers = #tpu.dot_dimension_numbers<[1], [0], [0], [1], [0, 0, 1, 1], [], []>, precision = #tpu.contract_precision<fp32>} : vector<16x256xf32>, vector<256x128xf32>, vector<16x128xf32> -> vector<16x128xf32>
    %c0_82 = arith.constant 0 : index
    %c0_83 = arith.constant 0 : index
    %215 = vector.load %arg10[%c0_82, %c0_83] : memref<1x128xf32, #tpu.memory_space<vmem>>, vector<1x128xf32>
    %216 = vector.broadcast %215 : vector<1x128xf32> to vector<16x128xf32>
    %217 = arith.addf %214, %216 : vector<16x128xf32>
    %218 = arith.addf %194, %217 : vector<16x128xf32>
    %c0_84 = arith.constant 0 : index
    %c0_85 = arith.constant 0 : index
    %219 = vector.load %arg11[%c0_84, %c0_85] : memref<1x128xf32, #tpu.memory_space<vmem>>, vector<1x128xf32>
    %c0_86 = arith.constant 0 : index
    %c0_87 = arith.constant 0 : index
    %220 = vector.load %arg12[%c0_86, %c0_87] : memref<1x128xf32, #tpu.memory_space<vmem>>, vector<1x128xf32>
    %cst_88 = arith.constant dense<0.000000e+00> : vector<16xf32>
    %221 = vector.multi_reduction <add>, %218, %cst_88 [1] : vector<16x128xf32> to vector<16xf32>
    %222 = vector.shape_cast %221 : vector<16xf32> to vector<16x1xf32>
    %cst_89 = arith.constant 1.280000e+02 : f32
    %223 = vector.broadcast %cst_89 : f32 to vector<16x1xf32>
    %224 = arith.divf %222, %223 : vector<16x1xf32>
    %225 = vector.broadcast %224 : vector<16x1xf32> to vector<16x128xf32>
    %226 = arith.subf %218, %225 : vector<16x128xf32>
    %227 = arith.mulf %226, %226 : vector<16x128xf32>
    %cst_90 = arith.constant dense<0.000000e+00> : vector<16xf32>
    %228 = vector.multi_reduction <add>, %227, %cst_90 [1] : vector<16x128xf32> to vector<16xf32>
    %229 = vector.shape_cast %228 : vector<16xf32> to vector<16x1xf32>
    %cst_91 = arith.constant 1.280000e+02 : f32
    %230 = vector.broadcast %cst_91 : f32 to vector<16x1xf32>
    %231 = arith.divf %229, %230 : vector<16x1xf32>
    %cst_92 = arith.constant 9.99999974E-6 : f32
    %232 = vector.broadcast %cst_92 : f32 to vector<16x1xf32>
    %233 = arith.addf %231, %232 : vector<16x1xf32>
    %234 = math.rsqrt %233 : vector<16x1xf32>
    %235 = vector.broadcast %234 : vector<16x1xf32> to vector<16x128xf32>
    %236 = arith.mulf %226, %235 : vector<16x128xf32>
    %237 = vector.broadcast %219 : vector<1x128xf32> to vector<16x128xf32>
    %238 = arith.mulf %236, %237 : vector<16x128xf32>
    %239 = vector.broadcast %220 : vector<1x128xf32> to vector<16x128xf32>
    %240 = arith.addf %238, %239 : vector<16x128xf32>
    %c0_93 = arith.constant 0 : index
    %c0_94 = arith.constant 0 : index
    %241 = vector.load %arg13[%c0_93, %c0_94] : memref<16x128xf32, #tpu.memory_space<vmem>>, vector<16x128xf32>
    tpu.vector_store %arg13[%c0_93, %c0_94], %240 {strides = array<i32>} : memref<16x128xf32, #tpu.memory_space<vmem>>, vector<16x128xf32>,
    return
  }
}

</mosaic_0001>

<bundles_post_ra>
// kernel: tpu_custom_call.1
= control target key start
LH: loop header
LB: loop body
LE: loop exit
PB: predicated region body
PF: predicated region fallthrough
CT: control target
= control target key end

     0   :  { %20 = vsyncpa [#allocation3], 0  ;;  %s16735_s0 = inlined_call_operand.hbm [shape: f32[16,128], index: 0, kind: input, shape index: {}]   ;;  %s16736_s1 = inlined_call_operand.hbm [shape: f32[128,384], index: 1, kind: input, shape index: {}]   ;;  %s16737_s2 = inlined_call_operand.vmem [shape: f32[1,384], index: 2, kind: input, shape index: {}]   ;;  %s16738_s3 = inlined_call_operand.hbm [shape: f32[128,128], index: 3, kind: input, shape index: {}]   ;;  %s16739_s4 = inlined_call_operand.vmem [shape: f32[1,128], index: 4, kind: input, shape index: {}]   ;;  %s16740_s5 = inlined_call_operand.vmem [shape: f32[1,128], index: 5, kind: input, shape index: {}]   ;;  %s16741_s6 = inlined_call_operand.vmem [shape: f32[1,128], index: 6, kind: input, shape index: {}]   ;;  %s16742_s7 = inlined_call_operand.hbm [shape: f32[128,256], index: 7, kind: input, shape index: {}]   ;;  %s16743_s8 = inlined_call_operand.vmem [shape: f32[1,256], index: 8, kind: input, shape index: {}]   ;;  %s16744_s9 = inlined_call_operand.hbm [shape: f32[256,128], index: 9, kind: input, shape index: {}]   ;;  %s16745_s10 = inlined_call_operand.vmem [shape: f32[1,128], index: 10, kind: input, shape index: {}]   ;;  %s16746_s11 = inlined_call_operand.vmem [shape: f32[1,128], index: 11, kind: input, shape index: {}]   ;;  %s16747_s12 = inlined_call_operand.vmem [shape: f32[1,128], index: 12, kind: input, shape index: {}]   ;;  %s16748_s13 = inlined_call_operand.hbm [shape: f32[16,128], index: 13, kind: output, shape index: {0}]   ;;  %s16749_s14 = inlined_call_operand.hbm [shape: f32[2,8,8], index: 14, kind: output, shape index: {1}]  }
   0x1   :  { %21 = vsyncpa [#allocation6], 0 }
   0x2   :  { %22 = vsyncpa [#allocation9], 0 }
   0x3   :  { %23 = vsyncpa [#allocation4], 0 }
   0x4   :  { %24 = vsyncpa [#allocation13], 0  ;;  %s13678_s29 = smov [#allocation5]  }
   0x5   :  { %s42_s30 = sshll.u32 %s13678_s29, 4  ;;  %s43_s30 = int_to_ptr.vmem [resolvable:$true] %s42_s30 }
   0x6   :  { %s13536_s15 = scalar_lea.vmem %s43_s30, 6144  ;;  %p13541_p1 = scmp.lt.s32.totalorder %s43_s30, %s43_s30 }
   0x7   :  { %p13537_p0 = scmp.ne.s32.totalorder %s43_s30, %s13536_s15  ;;  %p13542_p2 = scmp.lt.s32.totalorder %s13536_s15, %s13536_s15 }
   0x9   :  { %p13543_p3 = por %p13542_p2, %p13541_p1 }
   0xb   :  { %p13544_p4 = pnand %p13543_p3, %p13537_p0 }
   0xd   :  { %13547 = shalt.err (!%p13544_p4)
}
   0xe   :  { %s13679_s16 = smov 384   ;;  %s13680_s17 = smov 24  }
   0xf   :  { %48 = dma.hbm_to_vmem [thread:$0]  %s16736_s1, 6144, %s43_s30, [#allocation6], %s13679_s16, %s13679_s16, %s13680_s17  }
  0x10   :  { %s13681_s20 = smov [#allocation8]  }
  0x11   :  { %s74_s21 = sshll.u32 %s13681_s20, 4  ;;  %s75_s21 = int_to_ptr.vmem [resolvable:$true] %s74_s21 }
  0x12   :  { %s13556_s22 = scalar_lea.vmem %s75_s21, 4096  ;;  %p13561_p6 = scmp.lt.s32.totalorder %s75_s21, %s75_s21 }
  0x13   :  { %p13557_p5 = scmp.ne.s32.totalorder %s75_s21, %s13556_s22  ;;  %p13562_p7 = scmp.lt.s32.totalorder %s13556_s22, %s13556_s22 }
  0x15   :  { %p13563_p8 = por %p13562_p7, %p13561_p6 }
  0x17   :  { %p13564_p9 = pnand %p13563_p8, %p13557_p5 }
  0x19   :  { %13567 = shalt.err (!%p13564_p9)
}
  0x1a   :  { %s13682_s23 = smov 256   ;;  %s13683_s24 = smov 16  }
  0x1b   :  { %80 = dma.hbm_to_vmem [thread:$0]  %s16742_s7, 4096, %s75_s21, [#allocation9], %s13682_s23, %s13682_s23, %s13683_s24  }
  0x1c   :  { %s13684_s27 = smov [#allocation2]  }
  0x1d   :  { %s30_s28 = sshll.u32 %s13684_s27, 4  ;;  %s31_s28 = int_to_ptr.vmem [resolvable:$true] %s30_s28 }
  0x1e   :  { %s13576_s1 = scalar_lea.vmem %s31_s28, 256  ;;  %p13581_p11 = scmp.lt.s32.totalorder %s31_s28, %s31_s28 }
  0x1f   :  { %p13577_p10 = scmp.ne.s32.totalorder %s31_s28, %s13576_s1  ;;  %p13582_p12 = scmp.lt.s32.totalorder %s13576_s1, %s13576_s1 }
  0x21   :  { %p13583_p13 = por %p13582_p12, %p13581_p11 }
  0x23   :  { %p13584_p0 = pnand %p13583_p13, %p13577_p10 }
  0x25   :  { %13587 = shalt.err (!%p13584_p0)
}
  0x26   :  { %s13685_s29 = smov 128   ;;  %s13686_s30 = smov 8  }
  0x27   :  { %36 = dma.hbm_to_vmem [thread:$0]  %s16735_s0, 256, %s31_s28, [#allocation3], %s13685_s29, %s13685_s29, %s13686_s30  }
  0x28   :  { %s13687_s7 = smov [#allocation7]   ;;  %s13688_s18 = smov [#allocation10]  }
  0x29   :  { %s56_s17 = sshll.u32 %s13687_s7, 4  ;;  %s88_s19 = sshll.u32 %s13688_s18, 4  ;;  %s57_s17 = int_to_ptr.vmem [resolvable:$true] %s56_s17  ;;  %s89_s19 = int_to_ptr.vmem [resolvable:$true] %s88_s19 }
  0x2a   :  { %s13596_s20 = scalar_lea.vmem %s57_s17, 2048  ;;  %p13601_p2 = scmp.lt.s32.totalorder %s57_s17, %s57_s17 }
  0x2b   :  { %p13597_p1 = scmp.ne.s32.totalorder %s57_s17, %s13596_s20  ;;  %p13602_p3 = scmp.lt.s32.totalorder %s13596_s20, %s13596_s20 }
  0x2d   :  { %p13603_p4 = por %p13602_p3, %p13601_p2 }
  0x2f   :  { %p13604_p5 = pnand %p13603_p4, %p13597_p1 }
  0x31   :  { %13607 = shalt.err (!%p13604_p5)
}
  0x32   :  { %62 = dma.hbm_to_vmem [thread:$0]  %s16738_s3, 2048, %s57_s17, [#allocation6], %s13685_s29, %s13685_s29, %s13686_s30  }
  0x33   :  { %s13616_s0 = scalar_lea.vmem %s89_s19, 4096  ;;  %p13621_p7 = scmp.lt.s32.totalorder %s89_s19, %s89_s19 }
  0x34   :  { %p13617_p6 = scmp.ne.s32.totalorder %s89_s19, %s13616_s0  ;;  %p13622_p8 = scmp.lt.s32.totalorder %s13616_s0, %s13616_s0 }
  0x36   :  { %p13623_p9 = por %p13622_p8, %p13621_p7 }
  0x38   :  { %p13624_p10 = pnand %p13623_p9, %p13617_p6 }
  0x3a   :  { %13627 = shalt.err (!%p13624_p10)
}
  0x3b   :  { %94 = dma.hbm_to_vmem [thread:$0]  %s16744_s9, 4096, %s89_s19, [#allocation9], %s13685_s29, %s13685_s29, %s13686_s30  }
  0x3c   :  { %13668 = dma.done.wait [#allocation3], 256  }
  0x3d   :  { %13669 = vsyncadd [#allocation3], 4294967040 }
  0x3e   :  { %13670 = dma.done.wait [#allocation6], 8192  }
  0x3f   :  { %13671 = vsyncadd [#allocation6], 4294959104 }
  0x40   :  { %13672 = dma.done.wait [#allocation9], 8192  }
  0x41   :  { %13673 = vsyncadd [#allocation9], 4294959104  ;;  %v16764_v0 = vmov 0.0   ;;  %v164_v1 = vld [vmem:[#allocation5 + $0x170] sm:$0xff]  ;;  %v163_v2 = vld [vmem:[#allocation5 + $0x168] sm:$0xff]  ;;  %vm13690_vm0 = vmmov 0  }
  0x42   :  { %279 = vmatprep.mubr.f32.mxu0 %v16764_v0  ;;  %526 = vmatprep.mubr.f32.mxu1 %v16764_v0  ;;  %v161_v3 = vld [vmem:[#allocation5 + $0x158] sm:$0xff]  ;;  %v13797_v4 = vand.u32 4294901760, %v164_v1  ;;  %v13799_v5 = vand.u32 4294901760, %v163_v2  ;;  %v160_v7 = vld [vmem:[#allocation5 + $0x150] sm:$0xff]  ;;  %v158_v8 = vld [vmem:[#allocation5 + $0x140] sm:$0xff]  ;;  %vm1772_vm1 = vcmask 261120  }
  0x43   :  { %v13801_v6 = vand.u32 4294901760, %v161_v3  ;;  %v157_v9 = vld [vmem:[#allocation5 + $0x138] sm:$0xff]  ;;  %v13803_v10 = vand.u32 4294901760, %v160_v7  ;;  %v13805_v11 = vand.u32 4294901760, %v158_v8  ;;  %v155_v13 = vld [vmem:[#allocation5 + $0x128] sm:$0xff]  ;;  %v154_v14 = vld [vmem:[#allocation5 + $0x120] sm:$0xff] }
  0x44   :  { %v13807_v12 = vand.u32 4294901760, %v157_v9  ;;  %v152_v15 = vld [vmem:[#allocation5 + $0x110] sm:$0xff]  ;;  %184 = vmatprep.subr.mxu0 %v13797_v4  ;;  %v13810_v16 = vand.u32 4294901760, %v155_v13  ;;  %v13812_v17 = vand.u32 4294901760, %v154_v14  ;;  %v13817_v19 = vsub.f32 %v164_v1, %v13797_v4  ;;  %v13819_v20 = vld [vmem:[#allocation5 + $0x108] sm:$0xff]  ;;  %v13821_v21 = vld [vmem:[#allocation5 + $0xf8] sm:$0xff] }
  0x45   :  { %v13814_v18 = vand.u32 4294901760, %v152_v15  ;;  %v13823_v22 = vld [vmem:[#allocation5 + $0xf0] sm:$0xff]  ;;  %186 = vmatpush1.msra.mxu0 %v13799_v5  ;;  %v13827_v23 = vand.u32 4294901760, %v13819_v20  ;;  %v13830_v24 = vsub.f32 %v163_v2, %v13799_v5  ;;  %v13833_v25 = vand.u32 4294901760, %v13821_v21  ;;  %v13838_v27 = vld [vmem:[#allocation5 + $0xe0] sm:$0xff]  ;;  %v13840_v28 = vld [vmem:[#allocation5 + $0xd8] sm:$0xff] }
  0x46   :  { %v13836_v26 = vsub.f32 %v161_v3, %v13801_v6  ;;  %v13842_v29 = vld [vmem:[#allocation5 + $0xc8] sm:$0xff]  ;;  %188 = vmatprep.subr.mxu0 %v13801_v6  ;;  %v16762_v30 = vand.u32 4294901760, %v13817_v19  ;;  %v13847_v31 = vand.u32 4294901760, %v13823_v22  ;;  %v13850_v32 = vsub.f32 %v160_v7, %v13803_v10  ;;  %v13864_v38 = vld [vmem:[#allocation5 + $0xc0] sm:$0xff]  ;;  %v13888_v47 = vld [vmem:[#allocation5 + $0xb0] sm:$0xff]  ;;  %s13692_s25 = smov 64  }
  0x47   :  { %v13853_v33 = vand.u32 4294901760, %v13838_v27  ;;  %190 = vmatpush1.msra.mxu0 %v13803_v10  ;;  %v16761_v34 = vand.u32 4294901760, %v13830_v24  ;;  %v13859_v36 = vsub.f32 %v158_v8, %v13805_v11  ;;  %v13862_v37 = vand.u32 4294901760, %v13840_v28  ;;  %v13898_v52 = vld [vmem:[#allocation5 + $0xa8] sm:$0xff]  ;;  %v13905_v57 = vld [vmem:[#allocation5 + $0x98] sm:$0xff]  ;;  %v13917_v62 = vld [vmem:[#allocation5 + $0x90] sm:$0xff] }
  0x48   :  { %17016 = vst [vmem:[#allocation19_spill] sm:$0xff] %v13847_v31  ;;  %v16759_v35 = vand.u32 4294901760, %v13836_v26  ;;  %192 = vmatprep.subr.mxu0 %v13805_v11  ;;  %v305_v39 = vsub.f32 %v13817_v19, %v16762_v30  ;;  %v16757_v40 = vand.u32 4294901760, %v13850_v32  ;;  %v13872_v41 = vsub.f32 %v157_v9, %v13807_v12  ;;  %v13929_v7 = vld [vmem:[#allocation5 + $0x80] sm:$0xff]  ;;  %s13693_s26 = smov 32  }
  0x49   :  { %17017 = vst [vmem:[#allocation20_spill] sm:$0xff] %v13853_v33  ;;  %17018 = vst [vmem:[#allocation21_spill] sm:$0xff] %v13862_v37  ;;  %v13875_v42 = vand.u32 4294901760, %v13842_v29  ;;  %194 = vmatpush1.msra.mxu0 %v13807_v12  ;;  %v311_v43 = vsub.f32 %v13830_v24, %v16761_v34  ;;  %v16756_v45 = vand.u32 4294901760, %v13859_v36  ;;  %v13886_v46 = vsub.f32 %v155_v13, %v13810_v16  ;;  %v14030_v34 = vld [vmem:[#allocation5 + $0x30] sm:$0xff] }
  0x4a   :  { %v317_v44 = vsub.f32 %v13836_v26, %v16759_v35  ;;  %196 = vmatprep.subr.mxu0 %v13810_v16  ;;  %v306_v48 = vand.u32 4294901760, %v305_v39  ;;  %v323_v49 = vsub.f32 %v13850_v32, %v16757_v40  ;;  %v16754_v50 = vand.u32 4294901760, %v13872_v41  ;;  %v14020_v35 = vld [vmem:[#allocation5 + $0x38] sm:$0xff] }
  0x4b   :  { %17019 = vst [vmem:[#allocation22_spill] sm:$0xff] %v13875_v42  ;;  %v13896_v51 = vand.u32 4294901760, %v13864_v38  ;;  %198 = vmatpush1.msra.mxu0 %v13812_v17  ;;  %v312_v53 = vand.u32 4294901760, %v311_v43  ;;  %v329_v55 = vsub.f32 %v13859_v36, %v16756_v45  ;;  %v16752_v56 = vand.u32 4294901760, %v13886_v46  ;;  %v14007_v45 = vld [vmem:[#allocation5 + $0x48] sm:$0xff] }
  0x4c   :  { %v318_v54 = vand.u32 4294901760, %v317_v44  ;;  %200 = vmatprep.subr.mxu0 %v13814_v18  ;;  %307 = vmatprep.subr.mxu1 %v306_v48  ;;  %v324_v58 = vand.u32 4294901760, %v323_v49  ;;  %v335_v59 = vsub.f32 %v13872_v41, %v16754_v50  ;;  %v13912_v60 = vsub.f32 %v154_v14, %v13812_v17 }
  0x4d   :  { %17020 = vst [vmem:[#allocation23_spill] sm:$0xff] %v13896_v51  ;;  %v13915_v61 = vand.u32 4294901760, %v13888_v47  ;;  %202 = vmatpush1.msra.mxu0 %v13827_v23  ;;  %313 = vmatpush1.msra.mxu1 %v312_v53  ;;  %v330_v63 = vand.u32 4294901760, %v329_v55  ;;  %v341_v1 = vsub.f32 %v13886_v46, %v16752_v56  ;;  %v13924_v2 = vsub.f32 %v152_v15, %v13814_v18  ;;  %v13940_v15 = vld [vmem:[#allocation5 + $0x78] sm:$0xff] }
  0x4e   :  { %v13927_v3 = vand.u32 4294901760, %v13898_v52  ;;  %204 = vmatprep.subr.mxu0 %v13833_v25  ;;  %319 = vmatprep.subr.mxu1 %v318_v54  ;;  %v336_v8 = vand.u32 4294901760, %v335_v59  ;;  %v16751_v9 = vand.u32 4294901760, %v13912_v60  ;;  %v13935_v13 = vsub.f32 %v13819_v20, %v13827_v23 }
  0x4f   :  { %17021 = vst [vmem:[#allocation24_spill] sm:$0xff] %v13915_v61  ;;  %v13938_v14 = vand.u32 4294901760, %v13905_v57  ;;  %206 = vmatpush1.msra.mxu0 %v13847_v31  ;;  %325 = vmatpush1.msra.mxu1 %v324_v58  ;;  %v342_v39 = vand.u32 4294901760, %v341_v1  ;;  %v16750_v43 = vand.u32 4294901760, %v13924_v2  ;;  %v13946_v44 = vsub.f32 %v13821_v21, %v13833_v25  ;;  %v13963_v21 = vld [vmem:[#allocation5 + $0x68] sm:$0xff] }
  0x50   :  { %17022 = vst [vmem:[#allocation25_spill] sm:$0xff] %v13927_v3  ;;  %v13949_v48 = vand.u32 4294901760, %v13917_v62  ;;  %208 = vmatprep.subr.mxu0 %v13853_v33  ;;  %331 = vmatprep.subr.mxu1 %v330_v63  ;;  %v347_v20 = vsub.f32 %v13912_v60, %v16751_v9  ;;  %v16753_v49 = vand.u32 4294901760, %v13935_v13  ;;  %v13958_v53 = vsub.f32 %v13823_v22, %v13847_v31  ;;  %v13986_v9 = vld [vmem:[#allocation5 + $0x60] sm:$0xff] }
  0x51   :  { %17023 = vst [vmem:[#allocation26_spill] sm:$0xff] %v13938_v14  ;;  %v13961_v54 = vand.u32 4294901760, %v13929_v7  ;;  %210 = vmatpush1.msra.mxu0 %v13862_v37  ;;  %337 = vmatpush1.msra.mxu1 %v336_v8  ;;  %v353_v55 = vsub.f32 %v13924_v2, %v16750_v43  ;;  %v16755_v58 = vand.u32 4294901760, %v13946_v44  ;;  %v13972_v59 = vsub.f32 %v13838_v27, %v13853_v33  ;;  %v116_v33 = vld [vmem:[#allocation2] sm:$0xff] }
  0x52   :  { %17024 = vst [vmem:[#allocation27_spill] sm:$0xff] %v13949_v48  ;;  %v13975_v22 = vand.u32 4294901760, %v13940_v15  ;;  %212 = vmatprep.subr.mxu0 %v13875_v42  ;;  %343 = vmatprep.subr.mxu1 %v342_v39  ;;  %v348_v63 = vand.u32 4294901760, %v347_v20  ;;  %v359_v1 = vsub.f32 %v13935_v13, %v16753_v49  ;;  %v16758_v8 = vand.u32 4294901760, %v13958_v53  ;;  %v13996_v49 = vld [vmem:[#allocation5 + $0x50] sm:$0xff] }
  0x53   :  { %17025 = vst [vmem:[#allocation28_spill] sm:$0xff] %v13961_v54  ;;  %v13984_v43 = vsub.f32 %v13840_v28, %v13862_v37  ;;  %214 = vmatpush1.msra.mxu0 %v13896_v51  ;;  %v354_v27 = vand.u32 4294901760, %v353_v55  ;;  %v365_v39 = vsub.f32 %v13946_v44, %v16755_v58  ;;  %v16760_v20 = vand.u32 4294901760, %v13972_v59 }
  0x54   :  { %17026 = vst [vmem:[#allocation29_spill] sm:$0xff] %v13975_v22  ;;  %v13994_v56 = vand.u32 4294901760, %v13963_v21  ;;  %349 = vmatpush1.msra.mxu1 %v348_v63  ;;  %216 = vmatprep.subr.mxu0 %v13915_v61  ;;  %v360_v28 = vand.u32 4294901760, %v359_v1  ;;  %v371_v50 = vsub.f32 %v13958_v53, %v16758_v8  ;;  %v14005_v58 = vsub.f32 %v13842_v29, %v13875_v42 }
  0x55   :  { %v16763_v55 = vand.u32 4294901760, %v13984_v43  ;;  %355 = vmatprep.subr.mxu1 %v354_v27  ;;  %218 = vmatpush1.msra.mxu0 %v13927_v3  ;;  %v366_v40 = vand.u32 4294901760, %v365_v39  ;;  %v377_v63 = vsub.f32 %v13972_v59, %v16760_v20  ;;  %v14014_v1 = vand.u32 4294901760, %v13986_v9 }
  0x56   :  { %17027 = vst [vmem:[#allocation30_spill] sm:$0xff] %v13994_v56  ;;  %v14018_v8 = vsub.f32 %v13864_v38, %v13896_v51  ;;  %361 = vmatpush1.msra.mxu1 %v360_v28  ;;  %220 = vmatprep.subr.mxu0 %v13938_v14  ;;  %v372_v29 = vand.u32 4294901760, %v371_v50  ;;  %v16768_v39 = vand.u32 4294901760, %v14005_v58  ;;  %v14028_v20 = vand.u32 4294901760, %v13996_v49 }
  0x57   :  { %v383_v27 = vsub.f32 %v13984_v43, %v16763_v55  ;;  %367 = vmatprep.subr.mxu1 %v366_v40  ;;  %222 = vmatpush1.msra.mxu0 %v13949_v48  ;;  %v378_v38 = vand.u32 4294901760, %v377_v63  ;;  %v14036_v50 = vsub.f32 %v13888_v47, %v13915_v61  ;;  %v14039_v30 = vand.u32 4294901760, %v14007_v45  ;;  %v14041_v55 = vld [vmem:[#allocation5 + $0x20] sm:$0xff] }
  0x58   :  { %17028 = vst [vmem:[#allocation31_spill] sm:$0xff] %v14028_v20  ;;  %v16771_v28 = vand.u32 4294901760, %v14018_v8  ;;  %373 = vmatpush1.msra.mxu1 %v372_v29  ;;  %224 = vmatprep.subr.mxu0 %v13961_v54  ;;  %v389_v40 = vsub.f32 %v14005_v58, %v16768_v39  ;;  %v14049_v63 = vsub.f32 %v13898_v52, %v13927_v3  ;;  %v14052_v47 = vand.u32 4294901760, %v14020_v35  ;;  %v14066_v52 = vld [vmem:[#allocation5 + $0x18] sm:$0xff] }
  0x59   :  { %17029 = vst [vmem:[#allocation32_spill] sm:$0xff] %v14039_v30  ;;  %v384_v0 = vand.u32 4294901760, %v383_v27  ;;  %379 = vmatprep.subr.mxu1 %v378_v38  ;;  %226 = vmatpush1.msra.mxu0 %v13975_v22  ;;  %v14061_v61 = vsub.f32 %v13905_v57, %v13938_v14  ;;  %v14064_v39 = vand.u32 4294901760, %v14030_v34  ;;  %v14075_v27 = vand.u32 4294901760, %v14041_v55  ;;  %v14077_v57 = vld [vmem:[#allocation5 + $0x8] sm:$0xff] }
  0x5a   :  { %17030 = vst [vmem:[#allocation33_spill] sm:$0xff] %v14052_v47  ;;  %v395_v29 = vsub.f32 %v14018_v8, %v16771_v28  ;;  %228 = vmatprep.subr.mxu0 %v13994_v56  ;;  %v390_v38 = vand.u32 4294901760, %v389_v40  ;;  %v14072_v28 = vsub.f32 %v13917_v62, %v13949_v48  ;;  %v17033_v51 = vand.u32 4294901760, %v14036_v50  ;;  %v14100_v40 = vld [vmem:[#allocation5] sm:$0xff] }
  0x5b   :  { %17031 = vst [vmem:[#allocation34_spill] sm:$0xff] %v14064_v39  ;;  %385 = vmatpush1.msra.mxu1 %v384_v0  ;;  %17032 = vst [vmem:[#allocation35_spill] sm:$0xff] %v14075_v27  ;;  %230 = vmatpush1.msra.mxu0 %v14014_v1  ;;  %v14086_v3 = vsub.f32 %v13929_v7, %v13961_v54  ;;  %v17034_v62 = vand.u32 4294901760, %v14049_v63  ;;  %v14108_v42 = vand.u32 4294901760, %v14077_v57  ;;  %v14124_v31 = vand.u32 4294901760, %v14100_v40 }
  0x5c   :  { %v396_v14 = vand.u32 4294901760, %v395_v29  ;;  %v401_v0 = vsub.f32 %v14036_v50, %v17033_v51  ;;  %391 = vmatprep.subr.mxu1 %v390_v38  ;;  %232 = vmatprep.subr.mxu0 %v14028_v20  ;;  %v14094_v29 = vand.u32 4294901760, %v14066_v52  ;;  %v14098_v51 = vsub.f32 %v13940_v15, %v13975_v22 }
  0x5d   :  { %v407_v48 = vsub.f32 %v14049_v63, %v17034_v62  ;;  %234 = vmatpush1.msra.mxu0 %v14039_v30  ;;  %v17035_v38 = vand.u32 4294901760, %v14061_v61  ;;  %v16790_v62 = vand.u32 4294901760, %v14086_v3  ;;  %v17036_v15 = vand.u32 4294901760, %v14072_v28 }
  0x5e   :  { %397 = vmatpush1.msra.mxu1 %v396_v14  ;;  %v402_v7 = vand.u32 4294901760, %v401_v0  ;;  %236 = vmatprep.subr.mxu0 %v14052_v47  ;;  %v14117_v0 = vsub.f32 %v13963_v21, %v13994_v56  ;;  %v17037_v21 = vand.u32 4294901760, %v14098_v51  ;;  %vm2225_vm2 = vcmask 64512  }
  0x5f   :  { %v413_v54 = vsub.f32 %v14061_v61, %v17035_v38  ;;  %v408_v37 = vand.u32 4294901760, %v407_v48  ;;  %v419_v22 = vsub.f32 %v14072_v28, %v17036_v15  ;;  %238 = vmatpush1.msra.mxu0 %v14064_v39  ;;  %v425_v48 = vsub.f32 %v14086_v3, %v16790_v62 }
  0x60   :  { %403 = vmatprep.subr.mxu1 %v402_v7  ;;  %v14128_v15 = vsub.f32 %v13986_v9, %v14014_v1  ;;  %240 = vmatprep.subr.mxu0 %v14075_v27  ;;  %v16793_v7 = vand.u32 4294901760, %v14117_v0  ;;  %v14137_v62 = vsub.f32 %v13996_v49, %v14028_v20  ;;  %vm5457_vm3 = vcmask 523264  }
  0x61   :  { %v414_v38 = vand.u32 4294901760, %v413_v54  ;;  %409 = vmatpush1.msra.mxu1 %v408_v37  ;;  %v420_v14 = vand.u32 4294901760, %v419_v22  ;;  %v431_v54 = vsub.f32 %v14098_v51, %v17037_v21  ;;  %v426_v56 = vand.u32 4294901760, %v425_v48  ;;  %242 = vmatpush1.msra.mxu0 %v14094_v29 }
  0x62   :  { %v16796_v9 = vand.u32 4294901760, %v14128_v15  ;;  %v14141_v37 = vand.u32 4294901760, %v116_v33  ;;  %v14145_v22 = vsub.f32 %v14007_v45, %v14039_v30  ;;  %244 = vmatprep.subr.mxu0 %v14108_v42  ;;  %v437_v49 = vsub.f32 %v14117_v0, %v16793_v7 }
  0x63   :  { %415 = vmatprep.subr.mxu1 %v414_v38  ;;  %v432_v21 = vand.u32 4294901760, %v431_v54  ;;  %v14154_v48 = vsub.f32 %v14020_v35, %v14052_v47  ;;  %246 = vmatpush1.msra.mxu0 %v14124_v31  ;;  %v14166_v7 = vsub.f32 %v14030_v34, %v14064_v39  ;;  %v17040_v35 = vand.u32 4294901760, %v14137_v62 }
  0x64   :  { %17038 = vst [vmem:[#allocation36_spill] sm:$0xff] %v14141_v37  ;;  %421 = vmatpush1.msra.mxu1 %v420_v14  ;;  %v443_v45 = vsub.f32 %v14128_v15, %v16796_v9  ;;  %v14161_v14 = vsub.f32 %v116_v33, %v14141_v37  ;;  %v438_v38 = vand.u32 4294901760, %v437_v49  ;;  %543 = vmatprep.subr.mxu0 %v13817_v19  ;;  %v17042_v34 = vand.u32 4294901760, %v14145_v22 }
  0x65   :  { %427 = vmatprep.subr.mxu1 %v426_v56  ;;  %v449_v56 = vsub.f32 %v14137_v62, %v17040_v35  ;;  %v16803_v47 = vand.u32 4294901760, %v14154_v48  ;;  %v14175_v33 = vsub.f32 %v14041_v55, %v14075_v27  ;;  %v16804_v49 = vand.u32 4294901760, %v14166_v7 }
  0x66   :  { %17039 = vst [vmem:[#allocation37_spill] sm:$0xff] %v14161_v14  ;;  %433 = vmatpush1.msra.mxu1 %v432_v21  ;;  %v444_v9 = vand.u32 4294901760, %v443_v45  ;;  %v14178_v54 = vand.u32 4294901760, %v14161_v14  ;;  %v455_v21 = vsub.f32 %v14145_v22, %v17042_v34  ;;  %v14190_v55 = vsub.f32 %v14066_v52, %v14094_v29 }
  0x67   :  { %439 = vmatprep.subr.mxu1 %v438_v38  ;;  %v450_v35 = vand.u32 4294901760, %v449_v56  ;;  %v461_v39 = vsub.f32 %v14154_v48, %v16803_v47  ;;  %v16810_v30 = vand.u32 4294901760, %v14175_v33  ;;  %v467_v38 = vsub.f32 %v14166_v7, %v16804_v49 }
  0x68   :  { %17041 = vst [vmem:[#allocation38_spill] sm:$0xff] %v14178_v54  ;;  %17043 = vst [vmem:[#allocation39_spill] sm:$0xff] %v14190_v55  ;;  %445 = vmatpush1.msra.mxu1 %v444_v9  ;;  %v283_v45 = vsub.f32 %v14161_v14, %v14178_v54  ;;  %v456_v27 = vand.u32 4294901760, %v455_v21  ;;  %v14199_v56 = vsub.f32 %v14077_v57, %v14108_v42  ;;  %v16809_v9 = vand.u32 4294901760, %v14190_v55 }
  0x69   :  { %451 = vmatprep.subr.mxu1 %v450_v35  ;;  %v462_v34 = vand.u32 4294901760, %v461_v39  ;;  %v473_v52 = vsub.f32 %v14175_v33, %v16810_v30  ;;  %v14207_v47 = vsub.f32 %v14100_v40, %v14124_v31  ;;  %v468_v49 = vand.u32 4294901760, %v467_v38 }
  0x6a   :  { %v14209_v21 = vand.u32 4294901760, %v283_v45  ;;  %457 = vmatpush1.msra.mxu1 %v456_v27  ;;  %v16808_v54 = vand.u32 4294901760, %v14199_v56  ;;  %v479_v39 = vsub.f32 %v14190_v55, %v16809_v9  ;;  %v17053_v9 = vld [vmem:[#allocation25_spill] sm:$0xff]  ;;  %vm5459_vm4 = vcmask 785408  }
  0x6b   :  { %17044 = vst [vmem:[#allocation40_spill] sm:$0xff] %v14207_v47  ;;  %463 = vmatprep.subr.mxu1 %v462_v34  ;;  %v474_v57 = vand.u32 4294901760, %v473_v52  ;;  %v16807_v35 = vand.u32 4294901760, %v14207_v47  ;;  %v17046_v34 = vmov 0.0   ;;  %v117_v52 = vld [vmem:[#allocation2 + $0x8] sm:$0xff] }
  0x6c   :  { %17045 = vst [vmem:[#allocation41_spill] sm:$0xff] %v14209_v21  ;;  %285 = vmatmul.mubr.f32.vlgmr.msra.gmra.mxu0 %v14209_v21  ;;  %469 = vmatpush1.msra.mxu1 %v468_v49  ;;  %v485_v40 = vsub.f32 %v14199_v56, %v16808_v54  ;;  %v480_v27 = vand.u32 4294901760, %v479_v39  ;;  %v17052_v54 = vld [vmem:[#allocation24_spill] sm:$0xff]  ;;  %v17055_v21 = vld [vmem:[#allocation26_spill] sm:$0xff] }
  0x6d   :  { %546 = vmatpush1.msra.mxu0 %v13830_v24  ;;  %475 = vmatprep.subr.mxu1 %v474_v57  ;;  %v491_v45 = vsub.f32 %v14207_v47, %v16807_v35  ;;  %v14235_v57 = vand.u32 4294901760, %v117_v52  ;;  %v17051_v35 = vld [vmem:[#allocation23_spill] sm:$0xff] }
  0x6e   :  { %549 = vmatprep.subr.mxu0 %v13836_v26  ;;  %v486_v38 = vand.u32 4294901760, %v485_v40  ;;  %290 = vmatprep.mubr.f32.mxu0 %v17046_v34 }
  0x6f   :  { %552 = vmatpush1.msra.mxu0 %v13850_v32  ;;  %481 = vmatpush1.msra.mxu1 %v480_v27  ;;  %v492_v49 = vand.u32 4294901760, %v491_v45  ;;  %v14246_v39 = vsub.f32 %v117_v52, %v14235_v57  ;;  %v17047_v27 = vld [vmem:[#allocation19_spill] sm:$0xff]  ;;  %v17048_v45 = vld [vmem:[#allocation20_spill] sm:$0xff]  ;;  %v17050_v52 = vld [vmem:[#allocation22_spill] sm:$0xff] }
  0x70   :  { %555 = vmatprep.subr.mxu0 %v13859_v36  ;;  %487 = vmatprep.subr.mxu1 %v486_v38  ;;  %v17049_v38 = vld [vmem:[#allocation21_spill] sm:$0xff] }
  0x71   :  { %558 = vmatpush1.msra.mxu0 %v13872_v41  ;;  %493 = vmatpush1.msra.mxu1 %v492_v49  ;;  %v14257_v40 = vand.u32 4294901760, %v14246_v39 }
  0x72   :  { %561 = vmatprep.subr.mxu0 %v13886_v46  ;;  %528 = vmatmul.mubr.f32.vlgmr.msra.gmra.mxu1 %v14141_v37  ;;  %v17056_v37 = vld [vmem:[#allocation27_spill] sm:$0xff] }
  0x73   :  { %564 = vmatpush1.msra.mxu0 %v13912_v60  ;;  %687 = vmatprep.subr.mxu1 %v13797_v4  ;;  %v294_v49 = vsub.f32 %v14246_v39, %v14257_v40 }
  0x74   :  { %567 = vmatprep.subr.mxu0 %v13924_v2  ;;  %689 = vmatpush1.msra.mxu1 %v13799_v5 }
  0x75   :  { %570 = vmatpush1.msra.mxu0 %v13935_v13  ;;  %691 = vmatprep.subr.mxu1 %v13801_v6  ;;  %v14277_v30 = vand.u32 4294901760, %v294_v49  ;;  %v17058_v49 = vld [vmem:[#allocation29_spill] sm:$0xff] }
  0x76   :  { %573 = vmatprep.subr.mxu0 %v13946_v44  ;;  %693 = vmatpush1.msra.mxu1 %v13803_v10 }
  0x77   :  { %576 = vmatpush1.msra.mxu0 %v13958_v53  ;;  %695 = vmatprep.subr.mxu1 %v13805_v11  ;;  %17054 = vst [vmem:[#allocation19_spill] sm:$0xff] %v14277_v30 }
  0x78   :  { %579 = vmatprep.subr.mxu0 %v13972_v59  ;;  %697 = vmatpush1.msra.mxu1 %v13807_v12 }
  0x79   :  { %582 = vmatpush1.msra.mxu0 %v13984_v43  ;;  %699 = vmatprep.subr.mxu1 %v13810_v16 }
  0x7a   :  { %585 = vmatprep.subr.mxu0 %v14005_v58  ;;  %701 = vmatpush1.msra.mxu1 %v13812_v17 }
  0x7b   :  { %588 = vmatpush1.msra.mxu0 %v14018_v8  ;;  %703 = vmatprep.subr.mxu1 %v13814_v18 }
  0x7c   :  { %591 = vmatprep.subr.mxu0 %v14036_v50  ;;  %705 = vmatpush1.msra.mxu1 %v13827_v23 }
  0x7d   :  { %594 = vmatpush1.msra.mxu0 %v14049_v63  ;;  %707 = vmatprep.subr.mxu1 %v13833_v25 }
  0x7e   :  { %597 = vmatprep.subr.mxu0 %v14061_v61  ;;  %709 = vmatpush1.msra.mxu1 %v17047_v27 }
  0x7f   :  { %600 = vmatpush1.msra.mxu0 %v14072_v28  ;;  %711 = vmatprep.subr.mxu1 %v17048_v45 }
  0x80   :  { %603 = vmatprep.subr.mxu0 %v14086_v3  ;;  %713 = vmatpush1.msra.mxu1 %v17049_v38 }
  0x81   :  { %606 = vmatpush1.msra.mxu0 %v14098_v51  ;;  %715 = vmatprep.subr.mxu1 %v17050_v52 }
  0x82   :  { %609 = vmatprep.subr.mxu0 %v14117_v0  ;;  %717 = vmatpush1.msra.mxu1 %v17051_v35  ;;  %v17057_v35 = vld [vmem:[#allocation28_spill] sm:$0xff] }
  0x83   :  { %612 = vmatpush1.msra.mxu0 %v14128_v15  ;;  %719 = vmatprep.subr.mxu1 %v17052_v54 }
  0x84   :  { %615 = vmatprep.subr.mxu0 %v14137_v62  ;;  %721 = vmatpush1.msra.mxu1 %v17053_v9  ;;  %v17059_v9 = vld [vmem:[#allocation30_spill] sm:$0xff] }
  0x85   :  { %618 = vmatpush1.msra.mxu0 %v14145_v22  ;;  %723 = vmatprep.subr.mxu1 %v17055_v21 }
  0x86   :  { %621 = vmatprep.subr.mxu0 %v14154_v48  ;;  %725 = vmatpush1.msra.mxu1 %v17056_v37 }
  0x87   :  { %624 = vmatpush1.msra.mxu0 %v14166_v7  ;;  %727 = vmatprep.subr.mxu1 %v17057_v35 }
  0x88   :  { %296 = vmatmul.mubr.f32.gmra.mxu0 %v14277_v30  ;;  %627 = vmatprep.subr.mxu0 %v14175_v33  ;;  %v17060_v30 = vand.u32 4294901760, %v13817_v19  ;;  %v17067_v19 = vld [vmem:[#allocation35_spill] sm:$0xff] }
  0x89   :  { %630 = vmatpush1.msra.mxu0 %v14190_v55  ;;  %729 = vmatpush1.msra.mxu1 %v17058_v49  ;;  %v17061_v55 = vld [vmem:[#allocation32_spill] sm:$0xff]  ;;  %v17062_v49 = vand.u32 4294901760, %v13830_v24  ;;  %v17068_v24 = vand.u32 4294901760, %v13859_v36  ;;  %v17072_v36 = vld [vmem:[#allocation38_spill] sm:$0xff] }
  0x8a   :  { %633 = vmatprep.subr.mxu0 %v14199_v56  ;;  %731 = vmatprep.subr.mxu1 %v17059_v9  ;;  %v17063_v9 = vld [vmem:[#allocation33_spill] sm:$0xff] }
  0x8b   :  { %636 = vmatpush1.msra.mxu0 %v14207_v47  ;;  %669 = vmatprep.mubr.f32.mxu0 %v17046_v34  ;;  %v17064_v47 = vand.u32 4294901760, %v13836_v26  ;;  %v17069_v26 = vand.u32 4294901760, %v13872_v41  ;;  %v17074_v41 = vand.u32 4294901760, %v13935_v13  ;;  %v17084_v13 = vand.u32 4294901760, %v14072_v28  ;;  %v17092_v28 = vld [vmem:[#allocation25_spill] sm:$0xff] }
  0x8c   :  { %733 = vmatpush1.msra.mxu1 %v14014_v1  ;;  %672 = vmatmul.mubr.f32.vlgmr.msra.gmra.mxu0 %v14161_v14  ;;  %v17065_v14 = vld [vmem:[#allocation34_spill] sm:$0xff] }
  0x8d   :  { %735 = vmatprep.subr.mxu1 %v14028_v20  ;;  %804 = vmatprep.subr.mxu0 %v17060_v30  ;;  %v17066_v20 = vand.u32 4294901760, %v13850_v32  ;;  %v17070_v30 = vand.u32 4294901760, %v13886_v46  ;;  %v17071_v32 = vand.u32 4294901760, %v13912_v60  ;;  %v17075_v46 = vand.u32 4294901760, %v13946_v44 }
  0x8e   :  { %737 = vmatpush1.msra.mxu1 %v17061_v55  ;;  %808 = vmatpush1.msra.mxu0 %v17062_v49  ;;  %v17076_v60 = vand.u32 4294901760, %v13958_v53  ;;  %v17088_v44 = vand.u32 4294901760, %v14128_v15 }
  0x8f   :  { %533 = vmatprep.mubr.f32.mxu1 %v17046_v34  ;;  %739 = vmatprep.subr.mxu1 %v17063_v9 }
  0x90   :  { %812 = vmatprep.subr.mxu0 %v17064_v47  ;;  %535 = vmatmul.mubr.f32.gmra.mxu1 %v14235_v57  ;;  %v17093_v47 = vand.u32 4294901760, %v14154_v48  ;;  %v150_v48 = vld [vmem:[#allocation5 + $0x100] sm:$0xff] }
  0x91   :  { %741 = vmatpush1.msra.mxu1 %v17065_v14  ;;  %816 = vmatpush1.msra.mxu0 %v17066_v20  ;;  %v17073_v20 = vand.u32 4294901760, %v13924_v2  ;;  %v17077_v2 = vand.u32 4294901760, %v13972_v59  ;;  %v156_v59 = vld [vmem:[#allocation5 + $0x130] sm:$0xff] }
  0x92   :  { %677 = vmatprep.mubr.f32.mxu0 %v17046_v34  ;;  %743 = vmatprep.subr.mxu1 %v17067_v19  ;;  %v14399_v15 = vand.u32 4294901760, %v156_v59 }
  0x93   :  { %820 = vmatprep.subr.mxu0 %v17068_v24  ;;  %680 = vmatmul.mubr.f32.gmra.mxu0 %v14246_v39 }
  0x94   :  { %745 = vmatpush1.msra.mxu1 %v14094_v29  ;;  %824 = vmatpush1.msra.mxu0 %v17069_v26  ;;  %v14425_v26 = vsub.f32 %v156_v59, %v14399_v15  ;;  %v129_v59 = vld [vmem:[#allocation5 + $0x58] sm:$0xff] }
  0x95   :  { %747 = vmatprep.subr.mxu1 %v14108_v42  ;;  %828 = vmatprep.subr.mxu0 %v17070_v30  ;;  %v14427_v30 = vand.u32 4294901760, %v150_v48 }
  0x96   :  { %749 = vmatpush1.msra.mxu1 %v14124_v31  ;;  %782 = vmatprep.mubr.f32.mxu1 %v17046_v34 }
  0x97   :  { %832 = vmatpush1.msra.mxu0 %v17071_v32  ;;  %786 = vmatmul.mubr.f32.vlgmr.msra.gmra.mxu1 %v17072_v36  ;;  %v144_v32 = vld [vmem:[#allocation5 + $0xd0] sm:$0xff] }
  0x98   :  { %836 = vmatprep.subr.mxu0 %v17073_v20  ;;  %977 = vmatprep.subr.mxu1 %v13797_v4  ;;  %v17078_v4 = vand.u32 4294901760, %v13984_v43  ;;  %v17086_v43 = vand.u32 4294901760, %v14098_v51  ;;  %v153_v51 = vld [vmem:[#allocation5 + $0x118] sm:$0xff] }
  0x99   :  { %840 = vmatpush1.msra.mxu0 %v17074_v41  ;;  %979 = vmatpush1.msra.mxu1 %v13799_v5  ;;  %v17079_v5 = vand.u32 4294901760, %v14005_v58  ;;  %v17090_v58 = vand.u32 4294901760, %v14137_v62  ;;  %v17094_v62 = vand.u32 4294901760, %v14166_v7  ;;  %v17104_v41 = vld [vmem:[#allocation31_spill] sm:$0xff] }
  0x9a   :  { %844 = vmatprep.subr.mxu0 %v17075_v46  ;;  %981 = vmatprep.subr.mxu1 %v13801_v6  ;;  %v17080_v6 = vand.u32 4294901760, %v14018_v8  ;;  %v17091_v8 = vand.u32 4294901760, %v14145_v22  ;;  %v17095_v22 = vand.u32 4294901760, %v14175_v33  ;;  %v17099_v33 = vand.u32 4294901760, %v14199_v56  ;;  %v17103_v56 = vld [vmem:[#allocation36_spill] sm:$0xff] }
  0x9b   :  { %791 = vmatprep.mubr.f32.mxu1 %v17046_v34  ;;  %848 = vmatpush1.msra.mxu0 %v17076_v60 }
  0x9c   :  { %983 = vmatpush1.msra.mxu1 %v13803_v10  ;;  %852 = vmatprep.subr.mxu0 %v17077_v2  ;;  %v17081_v10 = vand.u32 4294901760, %v14036_v50 }
  0x9d   :  { %795 = vmatmul.mubr.f32.gmra.mxu1 %v14257_v40  ;;  %985 = vmatprep.subr.mxu1 %v13805_v11  ;;  %v17082_v11 = vand.u32 4294901760, %v14049_v63 }
  0x9e   :  { %856 = vmatpush1.msra.mxu0 %v17078_v4  ;;  %987 = vmatpush1.msra.mxu1 %v13807_v12  ;;  %v17083_v12 = vand.u32 4294901760, %v14061_v61  ;;  %v159_v61 = vld [vmem:[#allocation5 + $0x148] sm:$0xff]  ;;  %v141_v4 = vld [vmem:[#allocation5 + $0xb8] sm:$0xff] }
  0x9f   :  { %860 = vmatprep.subr.mxu0 %v17079_v5  ;;  %989 = vmatprep.subr.mxu1 %v13810_v16  ;;  %v165_v16 = vld [vmem:[#allocation5 + $0x178] sm:$0xff]  ;;  %v14388_v63 = vand.u32 4294901760, %v159_v61 }
  0xa0   :  { %864 = vmatpush1.msra.mxu0 %v17080_v6  ;;  %991 = vmatpush1.msra.mxu1 %v13812_v17  ;;  %v17085_v17 = vand.u32 4294901760, %v14086_v3  ;;  %v17089_v3 = vld [vmem:[#allocation23_spill] sm:$0xff]  ;;  %v14452_v6 = vand.u32 4294901760, %v14425_v26 }
  0xa1   :  { %868 = vmatprep.subr.mxu0 %v17081_v10  ;;  %993 = vmatprep.subr.mxu1 %v13814_v18  ;;  %v162_v18 = vld [vmem:[#allocation5 + $0x160] sm:$0xff]  ;;  %v14455_v10 = vsub.f32 %v150_v48, %v14427_v30 }
  0xa2   :  { %872 = vmatpush1.msra.mxu0 %v17082_v11  ;;  %995 = vmatpush1.msra.mxu1 %v13827_v23  ;;  %v14369_v23 = vand.u32 4294901760, %v165_v16  ;;  %v14377_v53 = vand.u32 4294901760, %v162_v18  ;;  %v138_v11 = vld [vmem:[#allocation5 + $0xa0] sm:$0xff] }
  0xa3   :  { %876 = vmatprep.subr.mxu0 %v17083_v12  ;;  %997 = vmatprep.subr.mxu1 %v13833_v25  ;;  %v17087_v25 = vand.u32 4294901760, %v14117_v0 }
  0xa4   :  { %880 = vmatpush1.msra.mxu0 %v17084_v13  ;;  %999 = vmatpush1.msra.mxu1 %v17047_v27  ;;  %v14386_v50 = vsub.f32 %v165_v16, %v14369_v23  ;;  %v14397_v0 = vsub.f32 %v162_v18, %v14377_v53  ;;  %v14469_v13 = vand.u32 4294901760, %v141_v4  ;;  %v1213_v18 = vsub.f32 %v14425_v26, %v14452_v6 }
  0xa5   :  { %884 = vmatprep.subr.mxu0 %v17085_v17  ;;  %1001 = vmatprep.subr.mxu1 %v17048_v45  ;;  %v14413_v45 = vand.u32 4294901760, %v153_v51  ;;  %v135_v17 = vld [vmem:[#allocation5 + $0x88] sm:$0xff] }
  0xa6   :  { %888 = vmatpush1.msra.mxu0 %v17086_v43  ;;  %1003 = vmatpush1.msra.mxu1 %v17049_v38  ;;  %v14408_v7 = vand.u32 4294901760, %v14386_v50  ;;  %v147_v38 = vld [vmem:[#allocation5 + $0xe8] sm:$0xff]  ;;  %v14422_v24 = vand.u32 4294901760, %v14397_v0  ;;  %v14481_v43 = vand.u32 4294901760, %v14455_v10 }
  0xa7   :  { %892 = vmatprep.subr.mxu0 %v17087_v25  ;;  %1005 = vmatprep.subr.mxu1 %v17050_v52  ;;  %v17100_v52 = vld [vmem:[#allocation30_spill] sm:$0xff]  ;;  %v14431_v20 = vand.u32 4294901760, %v147_v38  ;;  %v14441_v2 = vsub.f32 %v153_v51, %v14413_v45  ;;  %v14483_v25 = vand.u32 4294901760, %v138_v11 }
  0xa8   :  { %896 = vmatpush1.msra.mxu0 %v17088_v44  ;;  %1007 = vmatpush1.msra.mxu1 %v17089_v3  ;;  %v1192_v46 = vsub.f32 %v14386_v50, %v14408_v7  ;;  %v1199_v5 = vsub.f32 %v14397_v0, %v14422_v24  ;;  %v14494_v3 = vsub.f32 %v141_v4, %v14469_v13 }
  0xa9   :  { %900 = vmatprep.subr.mxu0 %v17090_v58  ;;  %1009 = vmatprep.subr.mxu1 %v17052_v54  ;;  %v17096_v54 = vld [vmem:[#allocation39_spill] sm:$0xff]  ;;  %v14467_v16 = vand.u32 4294901760, %v14441_v2  ;;  %v14496_v58 = vand.u32 4294901760, %v135_v17 }
  0xaa   :  { %904 = vmatpush1.msra.mxu0 %v17091_v8  ;;  %1011 = vmatpush1.msra.mxu1 %v17092_v28  ;;  %v17097_v27 = vand.u32 4294901760, %v17096_v54  ;;  %v1214_v8 = vand.u32 4294901760, %v1213_v18  ;;  %v1227_v28 = vsub.f32 %v14455_v10, %v14481_v43  ;;  %v14515_v54 = vand.u32 4294901760, %v14494_v3 }
  0xab   :  { %908 = vmatprep.subr.mxu0 %v17093_v47  ;;  %1013 = vmatprep.subr.mxu1 %v17055_v21  ;;  %v17098_v21 = vld [vmem:[#allocation29_spill] sm:$0xff]  ;;  %v1220_v44 = vsub.f32 %v14441_v2, %v14467_v16  ;;  %v14506_v47 = vsub.f32 %v138_v11, %v14483_v25 }
  0xac   :  { %912 = vmatpush1.msra.mxu0 %v17094_v62  ;;  %1015 = vmatpush1.msra.mxu1 %v17056_v37  ;;  %v14411_v37 = vsub.f32 %v159_v61, %v14388_v63  ;;  %v132_v61 = vld [vmem:[#allocation5 + $0x70] sm:$0xff]  ;;  %v1248_v4 = vsub.f32 %v14494_v3, %v14515_v54 }
  0xad   :  { %916 = vmatprep.subr.mxu0 %v17095_v22  ;;  %1017 = vmatprep.subr.mxu1 %v17057_v35  ;;  %v17101_v35 = vld [vmem:[#allocation40_spill] sm:$0xff]  ;;  %v14508_v51 = vand.u32 4294901760, %v132_v61  ;;  %v126_v22 = vld [vmem:[#allocation5 + $0x40] sm:$0xff]  ;;  %v1221_v48 = vand.u32 4294901760, %v1220_v44 }
  0xae   :  { %920 = vmatpush1.msra.mxu0 %v17097_v27  ;;  %1019 = vmatpush1.msra.mxu1 %v17098_v21  ;;  %v17102_v49 = vand.u32 4294901760, %v17101_v35  ;;  %v14438_v60 = vand.u32 4294901760, %v14411_v37  ;;  %v14518_v27 = vsub.f32 %v135_v17, %v14496_v58  ;;  %v14520_v21 = vand.u32 4294901760, %v129_v59 }
  0xaf   :  { %924 = vmatprep.subr.mxu0 %v17099_v33  ;;  %1021 = vmatprep.subr.mxu1 %v17100_v52  ;;  %v123_v33 = vld [vmem:[#allocation5 + $0x28] sm:$0xff]  ;;  %v1228_v52 = vand.u32 4294901760, %v1227_v28  ;;  %v14527_v35 = vand.u32 4294901760, %v14506_v47 }
  0xb0   :  { %928 = vmatpush1.msra.mxu0 %v17102_v49  ;;  %961 = vmatprep.mubr.f32.mxu0 %v17046_v34  ;;  %v1206_v12 = vsub.f32 %v14411_v37, %v14438_v60  ;;  %v14530_v49 = vsub.f32 %v132_v61, %v14508_v51  ;;  %v14542_v11 = vsub.f32 %v129_v59, %v14520_v21 }
  0xb1   :  { %1023 = vmatpush1.msra.mxu1 %v14014_v1  ;;  %963 = vmatmul.mubr.f32.vlgmr.msra.gmra.mxu0 %v17103_v56  ;;  %v14445_v1 = vand.u32 4294901760, %v144_v32  ;;  %v1255_v17 = vsub.f32 %v14506_v47, %v14527_v35 }
  0xb2   :  { %1025 = vmatprep.subr.mxu1 %v17104_v41  ;;  %968 = vmatprep.mubr.f32.mxu0 %v17046_v34  ;;  %v14563_v59 = vand.u32 4294901760, %v14542_v11 }
  0xb3   :  { %1027 = vmatpush1.msra.mxu1 %v17061_v55  ;;  %1072 = vmatprep.mubr.f32.mxu1 %v17046_v34  ;;  %v14460_v55 = vsub.f32 %v147_v38, %v14431_v20  ;;  %v1256_v28 = vand.u32 4294901760, %v1255_v17 }
  0xb4   :  { %1029 = vmatprep.subr.mxu1 %v17063_v9  ;;  %12560 = vmatprep.subr.mxu0 %v14369_v23  ;;  %v1193_v9 = vand.u32 4294901760, %v1192_v46  ;;  %v120_v46 = vld [vmem:[#allocation5 + $0x10] sm:$0xff] }
  0xb5   :  { %1031 = vmatpush1.msra.mxu1 %v17065_v14  ;;  %970 = vmatmul.mubr.f32.gmra.mxu0 %v14235_v57  ;;  %v14474_v14 = vsub.f32 %v144_v32, %v14445_v1  ;;  %v14532_v32 = vand.u32 4294901760, %v126_v22  ;;  %v14556_v61 = vand.u32 4294901760, %v120_v46 }
  0xb6   :  { %1033 = vmatprep.subr.mxu1 %v17067_v19  ;;  %12561 = vmatpush3.msra.mxu0 %v14369_v23  ;;  %v1200_v19 = vand.u32 4294901760, %v1199_v5  ;;  %v14539_v5 = vand.u32 4294901760, %v14518_v27 }
  0xb7   :  { %1035 = vmatpush1.msra.mxu1 %v14094_v29  ;;  %12562 = vmatprep.subr.mxu0 %v14377_v53  ;;  %v14488_v29 = vand.u32 4294901760, %v14460_v55  ;;  %v14554_v18 = vsub.f32 %v126_v22, %v14532_v32 }
  0xb8   :  { %1037 = vmatprep.subr.mxu1 %v14108_v42  ;;  %12563 = vmatpush3.msra.mxu0 %v14377_v53  ;;  %v1207_v42 = vand.u32 4294901760, %v1206_v12  ;;  %v1262_v44 = vsub.f32 %v14518_v27, %v14539_v5 }
  0xb9   :  { %1039 = vmatpush1.msra.mxu1 %v14124_v31  ;;  %12564 = vmatprep.subr.mxu0 %v14388_v63  ;;  %v14500_v31 = vand.u32 4294901760, %v14474_v14  ;;  %v1234_v62 = vsub.f32 %v14460_v55, %v14488_v29  ;;  %v14573_v22 = vand.u32 4294901760, %v14554_v18 }
  0xba   :  { %1074 = vmatmul.mubr.f32.vlgmr.msra.gmra.mxu1 %v17103_v56  ;;  %12595 = vmatprep.subr.mxu1 %v1193_v9 }
  0xbb   :  { %1079 = vmatprep.mubr.f32.mxu1 %v17046_v34  ;;  %12596 = vmatpush3.msra.mxu1 %v1193_v9  ;;  %v1241_v38 = vsub.f32 %v14474_v14, %v14500_v31  ;;  %v1235_v41 = vand.u32 4294901760, %v1234_v62  ;;  %v14544_v9 = vand.u32 4294901760, %v123_v33 }
  0xbc   :  { %12597 = vmatprep.subr.mxu1 %v1200_v19  ;;  %12565 = vmatpush3.msra.mxu0 %v14388_v63 }
  0xbd   :  { %12598 = vmatpush3.msra.mxu1 %v1200_v19  ;;  %12566 = vmatprep.subr.mxu0 %v14399_v15  ;;  %v1242_v12 = vand.u32 4294901760, %v1241_v38  ;;  %v14551_v19 = vand.u32 4294901760, %v14530_v49  ;;  %v1263_v38 = vand.u32 4294901760, %v1262_v44 }
  0xbe   :  { %1081 = vmatmul.mubr.f32.gmra.mxu1 %v14235_v57  ;;  %12599 = vmatprep.subr.mxu1 %v1207_v42 }
  0xbf   :  { %12567 = vmatpush3.msra.mxu0 %v14399_v15  ;;  %12600 = vmatpush3.msra.mxu1 %v1207_v42  ;;  %v1249_v42 = vand.u32 4294901760, %v1248_v4  ;;  %v1269_v62 = vsub.f32 %v14530_v49, %v14551_v19 }
  0xc0   :  { %12568 = vmatprep.subr.mxu0 %v14413_v45  ;;  %12601 = vmatprep.subr.mxu1 %v1214_v8 }
  0xc1   :  { %12569 = vmatpush3.msra.mxu0 %v14413_v45  ;;  %12602 = vmatpush3.msra.mxu1 %v1214_v8  ;;  %v14566_v8 = vsub.f32 %v123_v33, %v14544_v9  ;;  %v1276_v33 = vsub.f32 %v14542_v11, %v14563_v59 }
  0xc2   :  { %12570 = vmatprep.subr.mxu0 %v14427_v30  ;;  %12603 = vmatprep.subr.mxu1 %v1221_v48 }
  0xc3   :  { %12571 = vmatpush3.msra.mxu0 %v14427_v30  ;;  %12604 = vmatpush3.msra.mxu1 %v1221_v48  ;;  %v14576_v48 = vsub.f32 %v120_v46, %v14556_v61  ;;  %v1283_v46 = vsub.f32 %v14554_v18, %v14573_v22 }
  0xc4   :  { %12572 = vmatprep.subr.mxu0 %v14431_v20  ;;  %12605 = vmatprep.subr.mxu1 %v1228_v52 }
  0xc5   :  { %12573 = vmatpush3.msra.mxu0 %v14431_v20  ;;  %12606 = vmatpush3.msra.mxu1 %v1228_v52  ;;  %v14583_v52 = vand.u32 4294901760, %v14566_v8  ;;  %v14590_v4 = vand.u32 4294901760, %v14576_v48 }
  0xc6   :  { %12574 = vmatprep.subr.mxu0 %v14445_v1  ;;  %12607 = vmatprep.subr.mxu1 %v1235_v41 }
  0xc7   :  { %12575 = vmatpush3.msra.mxu0 %v14445_v1  ;;  %12608 = vmatpush3.msra.mxu1 %v1235_v41  ;;  %v1270_v41 = vand.u32 4294901760, %v1269_v62  ;;  %v1290_v17 = vsub.f32 %v14566_v8, %v14583_v52  ;;  %v1297_v44 = vsub.f32 %v14576_v48, %v14590_v4 }
  0xc8   :  { %12576 = vmatprep.subr.mxu0 %v14469_v13  ;;  %12609 = vmatprep.subr.mxu1 %v1242_v12 }
  0xc9   :  { %12577 = vmatpush3.msra.mxu0 %v14469_v13  ;;  %12610 = vmatpush3.msra.mxu1 %v1242_v12  ;;  %v1277_v12 = vand.u32 4294901760, %v1276_v33  ;;  %v1298_v62 = vand.u32 4294901760, %v1297_v44  ;;  %v17106_v33 = vld [vmem:[#allocation19_spill] sm:$0xff] }
  0xca   :  { %12578 = vmatprep.subr.mxu0 %v14483_v25  ;;  %12611 = vmatprep.subr.mxu1 %v1249_v42 }
  0xcb   :  { %12579 = vmatpush3.msra.mxu0 %v14483_v25  ;;  %12612 = vmatpush3.msra.mxu1 %v1249_v42  ;;  %v1284_v42 = vand.u32 4294901760, %v1283_v46 }
  0xcc   :  { %12580 = vmatprep.subr.mxu0 %v14496_v58  ;;  %12613 = vmatprep.subr.mxu1 %v1256_v28 }
  0xcd   :  { %12581 = vmatpush3.msra.mxu0 %v14496_v58  ;;  %12614 = vmatpush3.msra.mxu1 %v1256_v28  ;;  %v1291_v28 = vand.u32 4294901760, %v1290_v17 }
  0xce   :  { %12582 = vmatprep.subr.mxu0 %v14508_v51  ;;  %12615 = vmatprep.subr.mxu1 %v1263_v38 }
  0xcf   :  { %12583 = vmatpush3.msra.mxu0 %v14508_v51  ;;  %12616 = vmatpush3.msra.mxu1 %v1263_v38  ;;  %v17105_v38 = vld [vmem:[#allocation41_spill] sm:$0xff] }
  0xd0   :  { %12584 = vmatprep.subr.mxu0 %v14520_v21  ;;  %12617 = vmatprep.subr.mxu1 %v1270_v41 }
  0xd1   :  { %12585 = vmatpush3.msra.mxu0 %v14520_v21  ;;  %12618 = vmatpush3.msra.mxu1 %v1270_v41 }
  0xd2   :  { %12586 = vmatprep.subr.mxu0 %v14532_v32  ;;  %12619 = vmatprep.subr.mxu1 %v1277_v12 }
  0xd3   :  { %12587 = vmatpush3.msra.mxu0 %v14532_v32  ;;  %12620 = vmatpush3.msra.mxu1 %v1277_v12 }
  0xd4   :  { %12588 = vmatprep.subr.mxu0 %v14544_v9  ;;  %12621 = vmatprep.subr.mxu1 %v1284_v42 }
  0xd5   :  { %12589 = vmatpush3.msra.mxu0 %v14544_v9  ;;  %12622 = vmatpush3.msra.mxu1 %v1284_v42 }
  0xd6   :  { %12590 = vmatprep.subr.mxu0 %v14556_v61  ;;  %12623 = vmatprep.subr.mxu1 %v1291_v28 }
  0xd7   :  { %12591 = vmatpush3.msra.mxu0 %v14556_v61  ;;  %12624 = vmatpush3.msra.mxu1 %v1291_v28 }
  0xd8   :  { %12592 = vmatprep.mubr.f32.mxu0 %v17105_v38  ;;  %12625 = vmatprep.subr.mxu1 %v1298_v62 }
  0xd9   :  { %12630 = vmatprep.subr.mxu0 %v14386_v50  ;;  %12593 = vmatmul.mubr.f32.vlgmr.msra.gmra.mxu0 %v17106_v33 }
  0xda   :  { %12626 = vmatpush3.msra.mxu1 %v1298_v62  ;;  %12631 = vmatpush3.msra.mxu0 %v14386_v50  ;;  %v17107_v50 = vld [vmem:[#allocation37_spill] sm:$0xff] }
  0xdb   :  { %12627 = vmatprep.mubr.f32.mxu1 %v17103_v56  ;;  %12632 = vmatprep.subr.mxu0 %v14397_v0 }
  0xdc   :  { %12665 = vmatprep.subr.mxu1 %v14369_v23  ;;  %12628 = vmatmul.mubr.f32.vlgmr.msra.gmra.mxu1 %v14235_v57 }
  0xdd   :  { %12633 = vmatpush3.msra.mxu0 %v14397_v0  ;;  %12666 = vmatpush3.msra.mxu1 %v14369_v23 }
  0xde   :  { %12634 = vmatprep.subr.mxu0 %v14411_v37  ;;  %12667 = vmatprep.subr.mxu1 %v14377_v53 }
  0xdf   :  { %12635 = vmatpush3.msra.mxu0 %v14411_v37  ;;  %12668 = vmatpush3.msra.mxu1 %v14377_v53 }
  0xe0   :  { %12636 = vmatprep.subr.mxu0 %v14425_v26  ;;  %12669 = vmatprep.subr.mxu1 %v14388_v63 }
  0xe1   :  { %12637 = vmatpush3.msra.mxu0 %v14425_v26  ;;  %12670 = vmatpush3.msra.mxu1 %v14388_v63 }
  0xe2   :  { %12638 = vmatprep.subr.mxu0 %v14441_v2  ;;  %12671 = vmatprep.subr.mxu1 %v14399_v15 }
  0xe3   :  { %12639 = vmatpush3.msra.mxu0 %v14441_v2  ;;  %12672 = vmatpush3.msra.mxu1 %v14399_v15 }
  0xe4   :  { %12640 = vmatprep.subr.mxu0 %v14455_v10  ;;  %12673 = vmatprep.subr.mxu1 %v14413_v45 }
  0xe5   :  { %12641 = vmatpush3.msra.mxu0 %v14455_v10  ;;  %12674 = vmatpush3.msra.mxu1 %v14413_v45 }
  0xe6   :  { %12642 = vmatprep.subr.mxu0 %v14460_v55  ;;  %12675 = vmatprep.subr.mxu1 %v14427_v30 }
  0xe7   :  { %12643 = vmatpush3.msra.mxu0 %v14460_v55  ;;  %12676 = vmatpush3.msra.mxu1 %v14427_v30 }
  0xe8   :  { %12644 = vmatprep.subr.mxu0 %v14474_v14  ;;  %12677 = vmatprep.subr.mxu1 %v14431_v20 }
  0xe9   :  { %12645 = vmatpush3.msra.mxu0 %v14474_v14  ;;  %12678 = vmatpush3.msra.mxu1 %v14431_v20 }
  0xea   :  { %12646 = vmatprep.subr.mxu0 %v14494_v3  ;;  %12679 = vmatprep.subr.mxu1 %v14445_v1 }
  0xeb   :  { %12647 = vmatpush3.msra.mxu0 %v14494_v3  ;;  %12680 = vmatpush3.msra.mxu1 %v14445_v1 }
  0xec   :  { %12648 = vmatprep.subr.mxu0 %v14506_v47  ;;  %12681 = vmatprep.subr.mxu1 %v14469_v13 }
  0xed   :  { %12649 = vmatpush3.msra.mxu0 %v14506_v47  ;;  %12682 = vmatpush3.msra.mxu1 %v14469_v13 }
  0xee   :  { %12650 = vmatprep.subr.mxu0 %v14518_v27  ;;  %12683 = vmatprep.subr.mxu1 %v14483_v25 }
  0xef   :  { %12651 = vmatpush3.msra.mxu0 %v14518_v27  ;;  %12684 = vmatpush3.msra.mxu1 %v14483_v25 }
  0xf0   :  { %12652 = vmatprep.subr.mxu0 %v14530_v49  ;;  %12685 = vmatprep.subr.mxu1 %v14496_v58 }
  0xf1   :  { %12653 = vmatpush3.msra.mxu0 %v14530_v49  ;;  %12686 = vmatpush3.msra.mxu1 %v14496_v58 }
  0xf2   :  { %12654 = vmatprep.subr.mxu0 %v14542_v11  ;;  %12687 = vmatprep.subr.mxu1 %v14508_v51 }
  0xf3   :  { %12655 = vmatpush3.msra.mxu0 %v14542_v11  ;;  %12688 = vmatpush3.msra.mxu1 %v14508_v51 }
  0xf4   :  { %12656 = vmatprep.subr.mxu0 %v14554_v18  ;;  %12689 = vmatprep.subr.mxu1 %v14520_v21 }
  0xf5   :  { %12657 = vmatpush3.msra.mxu0 %v14554_v18  ;;  %12690 = vmatpush3.msra.mxu1 %v14520_v21 }
  0xf6   :  { %12658 = vmatprep.subr.mxu0 %v14566_v8  ;;  %12691 = vmatprep.subr.mxu1 %v14532_v32 }
  0xf7   :  { %12659 = vmatpush3.msra.mxu0 %v14566_v8  ;;  %12692 = vmatpush3.msra.mxu1 %v14532_v32 }
  0xf8   :  { %12660 = vmatprep.subr.mxu0 %v14576_v48  ;;  %12693 = vmatprep.subr.mxu1 %v14544_v9 }
  0xf9   :  { %12661 = vmatpush3.msra.mxu0 %v14576_v48  ;;  %12694 = vmatpush3.msra.mxu1 %v14544_v9 }
  0xfa   :  { %12662 = vmatprep.mubr.f32.mxu0 %v17107_v50  ;;  %12695 = vmatprep.subr.mxu1 %v14556_v61 }
  0xfb   :  { %12700 = vmatprep.subr.mxu0 %v14408_v7  ;;  %12663 = vmatmul.mubr.f32.vlgmr.msra.gmra.mxu0 %v14246_v39  ;;  %v168_v39 = vlaneseq }
  0xfc   :  { %12696 = vmatpush3.msra.mxu1 %v14556_v61  ;;  %12701 = vmatpush3.msra.mxu0 %v14408_v7 }
  0xfd   :  { %12697 = vmatprep.mubr.f32.mxu1 %v17072_v36  ;;  %12702 = vmatprep.subr.mxu0 %v14422_v24 }
  0xfe   :  { %12735 = vmatprep.subr.mxu1 %v14369_v23  ;;  %12698 = vmatmul.mubr.f32.vlgmr.msra.gmra.mxu1 %v14257_v40  ;;  %v14753_v40 = vshrl.u32 %v168_v39, 7 }
  0xff   :  { %12703 = vmatpush3.msra.mxu0 %v14422_v24  ;;  %12736 = vmatpush3.msra.mxu1 %v14369_v23 }
 0x100   :  { %12704 = vmatprep.subr.mxu0 %v14438_v60  ;;  %12737 = vmatprep.subr.mxu1 %v14377_v53  ;;  %17108 = vst [vmem:[#allocation20_spill] sm:$0xff] %v14753_v40  ;;  %v16820_v23 = vsub.s32 0, %v14753_v40  ;;  %v178_v38 = vsub.s32 2, %v14753_v40 }
 0x101   :  { %12705 = vmatpush3.msra.mxu0 %v14438_v60  ;;  %12738 = vmatpush3.msra.mxu1 %v14377_v53  ;;  %v14759_v53 = vld [vmem:[%s16737_s2] sm:$0x7]  ;;  %s13691_s2 = smov 96  }
 0x102   :  { %12706 = vmatprep.subr.mxu0 %v14452_v6  ;;  %12739 = vmatprep.subr.mxu1 %v14388_v63  ;;  %v179_v33 = vrot.slane %v14759_v53, %v178_v38 }
 0x103   :  { %12707 = vmatpush3.msra.mxu0 %v14452_v6  ;;  %12740 = vmatpush3.msra.mxu1 %v14388_v63  ;;  %v171_v63 = vrot.slane %v14759_v53, %v16820_v23 }
 0x104   :  { %12708 = vmatprep.subr.mxu0 %v14467_v16  ;;  %12741 = vmatprep.subr.mxu1 %v14399_v15 }
 0x105   :  { %12709 = vmatpush3.msra.mxu0 %v14467_v16  ;;  %12742 = vmatpush3.msra.mxu1 %v14399_v15  ;;  %v16819_v16 = vsub.s32 1, %v14753_v40 }
 0x106   :  { %12710 = vmatprep.subr.mxu0 %v14481_v43  ;;  %12743 = vmatprep.subr.mxu1 %v14413_v45 }
 0x107   :  { %12711 = vmatpush3.msra.mxu0 %v14481_v43  ;;  %12744 = vmatpush3.msra.mxu1 %v14413_v45 }
 0x108   :  { %12712 = vmatprep.subr.mxu0 %v14488_v29  ;;  %12745 = vmatprep.subr.mxu1 %v14427_v30 }
 0x109   :  { %12713 = vmatpush3.msra.mxu0 %v14488_v29  ;;  %12746 = vmatpush3.msra.mxu1 %v14427_v30 }
 0x10a   :  { %12714 = vmatprep.subr.mxu0 %v14500_v31  ;;  %12747 = vmatprep.subr.mxu1 %v14431_v20 }
 0x10b   :  { %12715 = vmatpush3.msra.mxu0 %v14500_v31  ;;  %12748 = vmatpush3.msra.mxu1 %v14431_v20 }
 0x10c   :  { %12716 = vmatprep.subr.mxu0 %v14515_v54  ;;  %12749 = vmatprep.subr.mxu1 %v14445_v1 }
 0x10d   :  { %12717 = vmatpush3.msra.mxu0 %v14515_v54  ;;  %12750 = vmatpush3.msra.mxu1 %v14445_v1 }
 0x10e   :  { %12718 = vmatprep.subr.mxu0 %v14527_v35  ;;  %12751 = vmatprep.subr.mxu1 %v14469_v13 }
 0x10f   :  { %12719 = vmatpush3.msra.mxu0 %v14527_v35  ;;  %12752 = vmatpush3.msra.mxu1 %v14469_v13  ;;  %v14772_v13 = vrot.slane %v14759_v53, %v16819_v16 }
 0x110   :  { %12720 = vmatprep.subr.mxu0 %v14539_v5  ;;  %12753 = vmatprep.subr.mxu1 %v14483_v25 }
 0x111   :  { %12721 = vmatpush3.msra.mxu0 %v14539_v5  ;;  %12754 = vmatpush3.msra.mxu1 %v14483_v25 }
 0x112   :  { %12722 = vmatprep.subr.mxu0 %v14551_v19  ;;  %12755 = vmatprep.subr.mxu1 %v14496_v58 }
 0x113   :  { %12723 = vmatpush3.msra.mxu0 %v14551_v19  ;;  %12756 = vmatpush3.msra.mxu1 %v14496_v58 }
 0x114   :  { %12724 = vmatprep.subr.mxu0 %v14563_v59  ;;  %12757 = vmatprep.subr.mxu1 %v14508_v51 }
 0x115   :  { %12725 = vmatpush3.msra.mxu0 %v14563_v59  ;;  %12758 = vmatpush3.msra.mxu1 %v14508_v51 }
 0x116   :  { %12726 = vmatprep.subr.mxu0 %v14573_v22  ;;  %12759 = vmatprep.subr.mxu1 %v14520_v21 }
 0x117   :  { %12727 = vmatpush3.msra.mxu0 %v14573_v22  ;;  %12760 = vmatpush3.msra.mxu1 %v14520_v21 }
 0x118   :  { %12728 = vmatprep.subr.mxu0 %v14583_v52  ;;  %12761 = vmatprep.subr.mxu1 %v14532_v32 }
 0x119   :  { %12729 = vmatpush3.msra.mxu0 %v14583_v52  ;;  %12762 = vmatpush3.msra.mxu1 %v14532_v32 }
 0x11a   :  { %12730 = vmatprep.subr.mxu0 %v14590_v4  ;;  %12763 = vmatprep.subr.mxu1 %v14544_v9 }
 0x11b   :  { %12731 = vmatpush3.msra.mxu0 %v14590_v4  ;;  %12732 = vmatprep.mubr.f32.mxu0 %v17103_v56 }
 0x11c   :  { %12764 = vmatpush3.msra.mxu1 %v14544_v9  ;;  %12733 = vmatmul.mubr.f32.vlgmr.msra.gmra.mxu0 %v14235_v57 }
 0x11d   :  { %12765 = vmatprep.subr.mxu1 %v14556_v61  ;;  %12767 = vmatprep.mubr.f32.mxu1 %v17103_v56 }
 0x11e   :  { %12766 = vmatpush3.msra.mxu1 %v14556_v61  ;;  %12770 = vmatprep.subr.mxu0 %v17046_v34 }
 0x11f   :  { %12768 = vmatmul.mubr.f32.vlgmr.msra.gmra.mxu1 %v14235_v57  ;;  %12772 = vmatprep.mubr.msk.f32.mxu0 %vm13690_vm0, %v17046_v34 }
 0x120   :  { %12775 = vmatprep.subr.mxu1 %v17046_v34  ;;  %12777 = vmatprep.mubr.msk.f32.mxu1 %vm13690_vm0, %v17046_v34 }
 0x12c   :  { %v286_v36 = vpop.f32.mrf.mxu0 }
 0x12d   :  { %v287_v14 = vadd.f32 %v286_v36, %v171_v63 }
 0x12e   :  { %v288_v57 = vpop.f32.mrf.mxu0 }
 0x12f   :  { %v289_v25 = vadd.f32 %v288_v57, %v14772_v13 }
 0x132   :  { %v529_v7 = vpop.f32.mrf.mxu1 }
 0x133   :  { %v530_v3 = vadd.f32 %v529_v7, %v287_v14 }
 0x134   :  { %v531_v24 = vpop.f32.mrf.mxu1 }
 0x135   :  { %v532_v31 = vadd.f32 %v531_v24, %v289_v25 }
 0x148   :  { %v297_v0 = vpop.f32.mrf.mxu0 }
 0x149   :  { %v298_v15 = vadd.f32 %v297_v0, %v171_v63 }
 0x14a   :  { %v14764_v37 = vpop.f32.mrf.mxu0 }
 0x14c   :  { %v673_v45 = vpop.f32.mrf.mxu0 }
 0x14d   :  { %v674_v47 = vadd.f32 %v673_v45, %v530_v3 }
 0x14e   :  { %v675_v26 = vpop.f32.mrf.mxu0 }
 0x14f   :  { %v676_v27 = vadd.f32 %v675_v26, %v532_v31 }
 0x150   :  { %v536_v30 = vpop.f32.mrf.mxu1 }
 0x151   :  { %v537_v56 = vadd.f32 %v536_v30, %v298_v15 }
 0x152   :  { %v14766_v20 = vpop.f32.mrf.mxu1 }
 0x153   :  { %v681_v60 = vpop.f32.mrf.mxu0 }
 0x154   :  { %v682_v2 = vadd.f32 %v681_v60, %v537_v56 }
 0x155   :  { %v14774_v43 = vpop.f32.mrf.mxu0 }
 0x157   :  { %v787_v1 = vpop.f32.mrf.mxu1 }
 0x158   :  { %v788_v21 = vadd.f32 %v787_v1, %v674_v47 }
 0x159   :  { %v789_v6 = vpop.f32.mrf.mxu1 }
 0x15a   :  { %v790_v49 = vadd.f32 %v789_v6, %v676_v27 }
 0x15d   :  { %v796_v10 = vpop.f32.mrf.mxu1 }
 0x15e   :  { %v797_v55 = vadd.f32 %v796_v10, %v682_v2 }
 0x15f   :  { %v14777_v35 = vpop.f32.mrf.mxu1 }
 0x171   :  { %v964_v29 = vpop.f32.mrf.mxu0 }
 0x172   :  { %v965_v32 = vadd.f32 %v964_v29, %v788_v21 }
 0x173   :  { %v966_v58 = vpop.f32.mrf.mxu0 }
 0x174   :  { %v967_v11 = vadd.f32 %v966_v58, %v790_v49 }
 0x175   :  { %v971_v51 = vpop.f32.mrf.mxu0 }
 0x176   :  { %v972_v54 = vadd.f32 %v971_v51, %v797_v55 }
 0x177   :  { %v14813_v50 = vpop.f32.mrf.mxu0 }
 0x17a   :  { %v1075_v5 = vpop.f32.mrf.mxu1 }
 0x17b   :  { %v1076_v9 = vadd.f32 %v1075_v5, %v965_v32 }
 0x17c   :  { %v1077_v19 = vpop.f32.mrf.mxu1 }
 0x17d   :  { %v14779_v18 = vmul.f32 0.17677669, %v1076_v9  ;;  %v14781_v61 = vadd.f32 %v1077_v19, %v967_v11 }
 0x17e   :  { %v1082_v59 = vpop.f32.mrf.mxu1 }
 0x17f   :  { %v1774_v8 = vsel %vm1772_vm1, %v14779_v18, 0  ;;  %v14785_v22 = vadd.f32 %v1082_v59, %v972_v54  ;;  %2689 = vrot.lane.b32.xlu1 %v14781_v61, %s13691_s2  ;;  %v1777_v48 = vsel %vm1772_vm1, %v14781_v61, 0 }
 0x180   :  { %v1845_v52 = vand.u32 4294901760, %v1774_v8  ;;  %v1810_v41 = vand.u32 4294901760, %v1777_v48  ;;  %v14815_v36 = vpop.f32.mrf.mxu1 }
 0x182   :  { %v1846_v46 = vsub.f32 %v1774_v8, %v1845_v52  ;;  %12771 = vmatpush3.xpose.msra.mxu0 %v1810_v41  ;;  %v1887_v4 = vsub.f32 %v1777_v48, %v1810_v41 }
 0x183   :  { %2687 = vrot.lane.b32.xlu1 %v14779_v18, %s13691_s2  ;;  %12780 = vmatprep.subr.mxu0 %v17046_v34 }
 0x184   :  { %v1847_v12 = vand.u32 4294901760, %v1846_v46  ;;  %v1888_v17 = vand.u32 4294901760, %v1887_v4 }
 0x186   :  { %v1848_v42 = vsub.f32 %v1846_v46, %v1847_v12  ;;  %v1889_v44 = vsub.f32 %v1887_v4, %v1888_v17 }
 0x188   :  { %v1849_v28 = vand.u32 4294901760, %v1848_v42  ;;  %v1890_v62 = vand.u32 4294901760, %v1889_v44 }
 0x18a   :  { %12773 = vmatmul.mubr.f32.vlgmr.msra.gmra.mxu0 %v1849_v28  ;;  %12776 = vmatpush3.xpose.msra.mxu1 %v1890_v62 }
 0x18b   :  { %12781 = vmatpush3.xpose.msra.mxu0 %v1887_v4  ;;  %12782 = vmatprep.mubr.msk.f32.mxu0 %vm13690_vm0, %v17046_v34 }
 0x18c   :  { %12785 = vmatprep.subr.mxu1 %v17046_v34  ;;  %12790 = vmatprep.subr.mxu0 %v17046_v34 }
 0x18d   :  { %12778 = vmatmul.mubr.f32.vlgmr.msra.gmra.mxu1 %v1845_v52 }
 0x18e   :  { %12783 = vmatmul.mubr.f32.vlgmr.msra.gmra.mxu0 %v1846_v46  ;;  %12786 = vmatpush3.xpose.msra.mxu1 %v1810_v41 }
 0x18f   :  { %12791 = vmatpush3.xpose.msra.mxu0 %v1888_v17  ;;  %12787 = vmatprep.mubr.msk.f32.mxu1 %vm13690_vm0, %v17046_v34 }
 0x190   :  { %12792 = vmatprep.mubr.msk.f32.mxu0 %vm13690_vm0, %v17046_v34  ;;  %12795 = vmatprep.subr.mxu1 %v17046_v34 }
 0x191   :  { %12788 = vmatmul.mubr.f32.vlgmr.msra.gmra.mxu1 %v1847_v12  ;;  %12800 = vmatprep.subr.mxu0 %v17046_v34 }
 0x192   :  { %12793 = vmatmul.mubr.f32.vlgmr.msra.gmra.mxu0 %v1845_v52  ;;  %12796 = vmatpush3.xpose.msra.mxu1 %v1810_v41 }
 0x193   :  { %12797 = vmatprep.mubr.msk.f32.mxu1 %vm13690_vm0, %v17046_v34  ;;  %12805 = vmatprep.subr.mxu1 %v17046_v34 }
 0x194   :  { %12802 = vmatprep.mubr.msk.f32.mxu0 %vm13690_vm0, %v17046_v34 }
 0x195   :  { %12798 = vmatmul.mubr.f32.vlgmr.msra.gmra.mxu1 %v1845_v52 }
 0x196   :  { %12807 = vmatprep.mubr.msk.f32.mxu1 %vm13690_vm0, %v17046_v34 }
 0x199   :  { %v12594_v39 = vpop.f32.mrf.mxu0 }
 0x19a   :  { %v1185_v57 = vadd.f32 %v12594_v39, %v179_v33 }
 0x19b   :  { %v1174_v15 = vpop.f32.mrf.mxu0 }
 0x19c   :  { %v12629_v63 = vpop.f32.mrf.mxu1  ;;  %v1175_v56 = vadd.f32 %v1174_v15, %v179_v33 }
 0x19d   :  { %v1342_v0 = vadd.f32 %v12629_v63, %v1185_v57 }
 0x19e   :  { %v1335_v7 = vpop.f32.mrf.mxu1 }
 0x19f   :  { %v1336_v60 = vadd.f32 %v1335_v7, %v1175_v56 }
 0x1bb   :  { %v12664_v45 = vpop.f32.mrf.mxu0 }
 0x1bc   :  { %v1453_v24 = vadd.f32 %v12664_v45, %v1342_v0 }
 0x1bd   :  { %v1445_v53 = vpop.f32.mrf.mxu0 }
 0x1be   :  { %v12699_v26 = vpop.f32.mrf.mxu1  ;;  %v1446_v2 = vadd.f32 %v1445_v53, %v1336_v60 }
 0x1bf   :  { %v1550_v30 = vadd.f32 %v12699_v26, %v1453_v24 }
 0x1c0   :  { %v1541_v1 = vpop.f32.mrf.mxu1 }
 0x1c1   :  { %v1542_v6 = vadd.f32 %v1541_v1, %v1446_v2 }
 0x1dc   :  { %v12734_v10 = vpop.f32.mrf.mxu0 }
 0x1dd   :  { %v1675_v55 = vadd.f32 %v12734_v10, %v1550_v30 }
 0x1de   :  { %v1668_v14 = vpop.f32.mrf.mxu0 }
 0x1df   :  { %v1669_v25 = vadd.f32 %v1668_v14, %v1542_v6  ;;  %v12769_v29 = vpop.f32.mrf.mxu1 }
 0x1e0   :  { %v14817_v3 = vadd.f32 %v12769_v29, %v1675_v55 }
 0x1e1   :  { %v1761_v58 = vpop.f32.mrf.mxu1 }
 0x1e2   :  { %v14819_v31 = vadd.f32 %v1761_v58, %v1669_v25 }
 0x1e4   :  { %v2272_v47 = vand.u32 4294901760, %v14819_v31 }
 0x1e6   :  { %12801 = vmatpush3.msra.mxu0 %v2272_v47  ;;  %v14823_v51 = vsub.f32 %v14819_v31, %v2272_v47 }
 0x1e7   :  { %12810 = vmatprep.subr.mxu0 %v17046_v34 }
 0x1e8   :  { %v2350_v54 = vand.u32 4294901760, %v14823_v51 }
 0x1ea   :  { %v2351_v27 = vsub.f32 %v14823_v51, %v2350_v54 }
 0x1ec   :  { %v2352_v21 = vand.u32 4294901760, %v2351_v27 }
 0x1ee   :  { %12806 = vmatpush3.msra.mxu1 %v2352_v21 }
 0x1ef   :  { %12815 = vmatprep.subr.mxu1 %v17046_v34 }
 0x1f1   :  { %v2690_v0 = vpop.permute.xlu1 %2689 }
 0x1f2   :  { %v2693_v15 = vsel %vm1772_vm1, %v2690_v0, 0 }
 0x1f3   :  { %v2726_v7 = vand.u32 4294901760, %v2693_v15 }
 0x1f5   :  { %v2803_v24 = vsub.f32 %v2693_v15, %v2726_v7  ;;  %v2688_v30 = vpop.permute.xlu1 %2687 }
 0x1f6   :  { %v2691_v2 = vsel %vm1772_vm1, %v2688_v30, 0 }
 0x1f7   :  { %v2804_v53 = vand.u32 4294901760, %v2803_v24  ;;  %v2761_v6 = vand.u32 4294901760, %v2691_v2 }
 0x1f9   :  { %v2805_v55 = vsub.f32 %v2803_v24, %v2804_v53  ;;  %v2762_v25 = vsub.f32 %v2691_v2, %v2761_v6 }
 0x1fb   :  { %v2806_v58 = vand.u32 4294901760, %v2805_v55  ;;  %v2763_v27 = vand.u32 4294901760, %v2762_v25 }
 0x24a   :  { %v1851_v49 = vpop.f32.mrf.mxu0 }
 0x24c   :  { %v12774_v32 = vpop.f32.mrf.mxu0 }
 0x24d   :  { %v1927_v5 = vpop.f32.mrf.mxu1 }
 0x24e   :  { %v1928_v11 = vadd.f32 %v1927_v5, %v1851_v49  ;;  %v2001_v9 = vpop.f32.mrf.mxu0 }
 0x24f   :  { %v12779_v19 = vpop.f32.mrf.mxu1 }
 0x250   :  { %v2002_v59 = vadd.f32 %v2001_v9, %v1928_v11  ;;  %v12784_v8 = vpop.f32.mrf.mxu0 }
 0x251   :  { %v2075_v48 = vpop.f32.mrf.mxu1 }
 0x252   :  { %v2076_v52 = vadd.f32 %v2075_v48, %v2002_v59  ;;  %v2149_v41 = vpop.f32.mrf.mxu0 }
 0x253   :  { %v12789_v46 = vpop.f32.mrf.mxu1 }
 0x254   :  { %v2150_v4 = vadd.f32 %v2149_v41, %v2076_v52  ;;  %v12794_v12 = vpop.f32.mrf.mxu0 }
 0x255   :  { %v2221_v17 = vpop.f32.mrf.mxu1 }
 0x256   :  { %v2222_v42 = vadd.f32 %v2221_v17, %v2150_v4 }
 0x257   :  { %v12799_v44 = vpop.f32.mrf.mxu1 }
 0x258   :  { %v2226_v28 = vsel %vm2225_vm2, %v2222_v42, -inf }
 0x259   :  { %2227 = vmax.xlane.f32.xlu0 %v2226_v28 }
 0x2e2   :  { %v2228_v62 = vpop.xlane.xlu0 %2227 }
 0x2e3   :  { %v2229_v38 = vsub.f32 %v2222_v42, %v2228_v62 }
 0x2e5   :  { %v2230_v33 = vmul.f32 1.442695, %v2229_v38 }
 0x2e7   :  { %13478 = vpow2.f32 %v2230_v33 }
 0x2f4   :  { %v13479_v39 = vpop.eup %13478 }
 0x2f5   :  { %v2232_v57 = vsel %vm2225_vm2, %v13479_v39, 0.0 }
 0x2f6   :  { %2233 = vadd.xlane.f32.xlu0 %v2232_v57 }
 0x37f   :  { %v2234_v63 = vpop.xlane.xlu0 %2233 }
 0x380   :  { %13480 = vrcp.f32 %v2234_v63 }
 0x38d   :  { %v13481_v45 = vpop.eup %13480 }
 0x38e   :  { %v14834_v26 = vmul.f32 %v13481_v45, %v13479_v39 }
 0x390   :  { %v2239_v56 = vsel %vm2225_vm2, %v14834_v26, 0 }
 0x391   :  { %v2307_v60 = vand.u32 4294901760, %v2239_v56 }
 0x393   :  { %v2308_v1 = vsub.f32 %v2239_v56, %v2307_v60  ;;  %12808 = vmatmul.mubr.f32.vlgmr.msra.gmra.mxu1 %v2307_v60 }
 0x394   :  { %12816 = vmatpush3.msra.mxu1 %v2272_v47  ;;  %12817 = vmatprep.mubr.msk.f32.mxu1 %vm13690_vm0, %v17046_v34 }
 0x395   :  { %12825 = vmatprep.subr.mxu1 %v17046_v34  ;;  %v2309_v10 = vand.u32 4294901760, %v2308_v1 }
 0x397   :  { %12818 = vmatmul.mubr.f32.vlgmr.msra.gmra.mxu1 %v2309_v10  ;;  %v2310_v14 = vsub.f32 %v2308_v1, %v2309_v10 }
 0x398   :  { %12826 = vmatpush3.msra.mxu1 %v2272_v47  ;;  %12827 = vmatprep.mubr.msk.f32.mxu1 %vm13690_vm0, %v17046_v34  ;;  %v2764_v47 = vsub.f32 %v2762_v25, %v2763_v27 }
 0x399   :  { %12835 = vmatprep.subr.mxu1 %v17046_v34  ;;  %v2311_v29 = vand.u32 4294901760, %v2310_v14 }
 0x39a   :  { %v2765_v21 = vand.u32 4294901760, %v2764_v47 }
 0x39b   :  { %12803 = vmatmul.mubr.f32.vlgmr.msra.gmra.mxu0 %v2311_v29  ;;  %12828 = vmatmul.mubr.f32.vlgmr.msra.gmra.mxu1 %v2307_v60 }
 0x39c   :  { %12811 = vmatpush3.msra.mxu0 %v14823_v51  ;;  %12836 = vmatpush3.xpose.msra.mxu1 %v2806_v58 }
 0x39d   :  { %12812 = vmatprep.mubr.msk.f32.mxu0 %vm13690_vm0, %v17046_v34  ;;  %12820 = vmatprep.subr.mxu0 %v17046_v34 }
 0x39e   :  { %12837 = vmatprep.mubr.msk.f32.mxu1 %vm13690_vm0, %v17046_v34  ;;  %12845 = vmatprep.subr.mxu1 %v17046_v34 }
 0x39f   :  { %12813 = vmatmul.mubr.f32.vlgmr.msra.gmra.mxu0 %v2308_v1  ;;  %12838 = vmatmul.mubr.f32.vlgmr.msra.gmra.mxu1 %v2761_v6 }
 0x3a0   :  { %12821 = vmatpush3.msra.mxu0 %v2350_v54  ;;  %12846 = vmatpush3.xpose.msra.mxu1 %v2726_v7 }
 0x3a1   :  { %12822 = vmatprep.mubr.msk.f32.mxu0 %vm13690_vm0, %v17046_v34  ;;  %12830 = vmatprep.subr.mxu0 %v17046_v34 }
 0x3a2   :  { %12847 = vmatprep.mubr.msk.f32.mxu1 %vm13690_vm0, %v17046_v34  ;;  %12855 = vmatprep.subr.mxu1 %v17046_v34 }
 0x3a3   :  { %12823 = vmatmul.mubr.f32.vlgmr.msra.gmra.mxu0 %v2307_v60  ;;  %12848 = vmatmul.mubr.f32.vlgmr.msra.gmra.mxu1 %v2763_v27 }
 0x3a4   :  { %12831 = vmatpush3.xpose.msra.mxu0 %v2726_v7  ;;  %12856 = vmatpush3.xpose.msra.mxu1 %v2726_v7 }
 0x3a5   :  { %12832 = vmatprep.mubr.msk.f32.mxu0 %vm13690_vm0, %v17046_v34  ;;  %12840 = vmatprep.subr.mxu0 %v17046_v34 }
 0x3a6   :  { %12857 = vmatprep.mubr.msk.f32.mxu1 %vm13690_vm0, %v17046_v34  ;;  %12865 = vmatprep.subr.mxu1 %v17046_v34 }
 0x3a7   :  { %12833 = vmatmul.mubr.f32.vlgmr.msra.gmra.mxu0 %v2765_v21  ;;  %12858 = vmatmul.mubr.f32.vlgmr.msra.gmra.mxu1 %v2761_v6 }
 0x3a8   :  { %12841 = vmatpush3.xpose.msra.mxu0 %v2803_v24  ;;  %12842 = vmatprep.mubr.msk.f32.mxu0 %vm13690_vm0, %v17046_v34 }
 0x3a9   :  { %12850 = vmatprep.subr.mxu0 %v17046_v34  ;;  %12867 = vmatprep.mubr.msk.f32.mxu1 %vm13690_vm0, %v17046_v34 }
 0x3ab   :  { %12843 = vmatmul.mubr.f32.vlgmr.msra.gmra.mxu0 %v2762_v25 }
 0x3ac   :  { %12851 = vmatpush3.xpose.msra.mxu0 %v2804_v53  ;;  %12852 = vmatprep.mubr.msk.f32.mxu0 %vm13690_vm0, %v17046_v34 }
 0x3ad   :  { %12860 = vmatprep.subr.mxu0 %v17046_v34 }
 0x3af   :  { %12853 = vmatmul.mubr.f32.vlgmr.msra.gmra.mxu0 %v2761_v6 }
 0x3b0   :  { %12862 = vmatprep.mubr.msk.f32.mxu0 %vm13690_vm0, %v17046_v34 }
 0x453   :  { %v2389_v51 = vpop.f32.mrf.mxu1 }
 0x455   :  { %v12809_v54 = vpop.f32.mrf.mxu1 }
 0x457   :  { %v2537_v49 = vpop.f32.mrf.mxu1 }
 0x459   :  { %v12819_v32 = vpop.f32.mrf.mxu1 }
 0x45b   :  { %v2313_v5 = vpop.f32.mrf.mxu0  ;;  %v2683_v11 = vpop.f32.mrf.mxu1 }
 0x45c   :  { %v2390_v9 = vadd.f32 %v2389_v51, %v2313_v5 }
 0x45d   :  { %v12804_v19 = vpop.f32.mrf.mxu0  ;;  %v12829_v59 = vpop.f32.mrf.mxu1 }
 0x45f   :  { %v2463_v8 = vpop.f32.mrf.mxu0  ;;  %v2843_v48 = vpop.f32.mrf.mxu1 }
 0x460   :  { %v2464_v52 = vadd.f32 %v2463_v8, %v2390_v9 }
 0x461   :  { %v12814_v41 = vpop.f32.mrf.mxu0  ;;  %v12839_v46 = vpop.f32.mrf.mxu1 }
 0x462   :  { %v2538_v4 = vadd.f32 %v2537_v49, %v2464_v52 }
 0x463   :  { %v2611_v12 = vpop.f32.mrf.mxu0  ;;  %v2991_v17 = vpop.f32.mrf.mxu1 }
 0x464   :  { %v2612_v42 = vadd.f32 %v2611_v12, %v2538_v4 }
 0x465   :  { %v12824_v44 = vpop.f32.mrf.mxu0  ;;  %v12849_v28 = vpop.f32.mrf.mxu1 }
 0x466   :  { %v14876_v62 = vadd.f32 %v2683_v11, %v2612_v42 }
 0x467   :  { %v2767_v38 = vpop.f32.mrf.mxu0  ;;  %v3137_v33 = vpop.f32.mrf.mxu1 }
 0x468   :  { %v2844_v63 = vadd.f32 %v2843_v48, %v2767_v38 }
 0x469   :  { %v12834_v39 = vpop.f32.mrf.mxu0  ;;  %v12859_v57 = vpop.f32.mrf.mxu1 }
 0x46b   :  { %v2917_v0 = vpop.f32.mrf.mxu0 }
 0x46c   :  { %v2918_v15 = vadd.f32 %v2917_v0, %v2844_v63 }
 0x46d   :  { %v12844_v7 = vpop.f32.mrf.mxu0 }
 0x46e   :  { %v2992_v45 = vadd.f32 %v2991_v17, %v2918_v15 }
 0x46f   :  { %v3065_v24 = vpop.f32.mrf.mxu0 }
 0x470   :  { %v3066_v30 = vadd.f32 %v3065_v24, %v2992_v45 }
 0x471   :  { %v12854_v56 = vpop.f32.mrf.mxu0 }
 0x472   :  { %v3138_v60 = vadd.f32 %v3137_v33, %v3066_v30 }
 0x474   :  { %v3141_v53 = vsel %vm2225_vm2, %v3138_v60, -inf }
 0x475   :  { %3142 = vmax.xlane.f32.xlu0 %v3141_v53 }
 0x48b   :  { %3154 = vrot.lane.b32.xlu0 %v14819_v31, %s13691_s2 }
 0x48f   :  { %3608 = vrot.lane.b32.xlu0 %v14781_v61, %s13692_s25 }
 0x493   :  { %3606 = vrot.lane.b32.xlu0 %v14779_v18, %s13692_s25 }
 0x4fe   :  { %v3143_v2 = vpop.xlane.xlu0 %3142 }
 0x4ff   :  { %v3144_v1 = vsub.f32 %v3138_v60, %v3143_v2 }
 0x501   :  { %v3145_v6 = vmul.f32 1.442695, %v3144_v1 }
 0x502   :  { %v3155_v10 = vpop.permute.xlu0 %3154 }
 0x503   :  { %13482 = vpow2.f32 %v3145_v6  ;;  %v3191_v55 = vand.u32 4294901760, %v3155_v10 }
 0x505   :  { %v3268_v14 = vsub.f32 %v3155_v10, %v3191_v55  ;;  %12861 = vmatpush3.msra.mxu0 %v3191_v55 }
 0x506   :  { %12870 = vmatprep.subr.mxu0 %v17046_v34  ;;  %v3609_v51 = vpop.permute.xlu0 %3608 }
 0x507   :  { %v3269_v25 = vand.u32 4294901760, %v3268_v14  ;;  %v3612_v54 = vsel %vm1772_vm1, %v3609_v51, 0 }
 0x508   :  { %v3645_v49 = vand.u32 4294901760, %v3612_v54 }
 0x509   :  { %v3270_v29 = vsub.f32 %v3268_v14, %v3269_v25 }
 0x50a   :  { %v14891_v5 = vsub.f32 %v3612_v54, %v3645_v49  ;;  %v3607_v9 = vpop.permute.xlu0 %3606 }
 0x50b   :  { %v3271_v58 = vand.u32 4294901760, %v3270_v29  ;;  %v3610_v48 = vsel %vm1772_vm1, %v3607_v9, 0 }
 0x50c   :  { %v3723_v8 = vand.u32 4294901760, %v14891_v5  ;;  %v3680_v46 = vand.u32 4294901760, %v3610_v48 }
 0x50d   :  { %12866 = vmatpush3.msra.mxu1 %v3271_v58 }
 0x50e   :  { %12875 = vmatprep.subr.mxu1 %v17046_v34  ;;  %v3724_v12 = vsub.f32 %v14891_v5, %v3723_v8  ;;  %v3681_v44 = vsub.f32 %v3610_v48, %v3680_v46 }
 0x510   :  { %v13483_v27 = vpop.eup %13482  ;;  %v3725_v38 = vand.u32 4294901760, %v3724_v12  ;;  %v3682_v39 = vand.u32 4294901760, %v3681_v44 }
 0x511   :  { %v3147_v47 = vsel %vm2225_vm2, %v13483_v27, 0.0 }
 0x512   :  { %3148 = vadd.xlane.f32.xlu1 %v3147_v47  ;;  %v3683_v63 = vsub.f32 %v3681_v44, %v3682_v39 }
 0x514   :  { %v3684_v15 = vand.u32 4294901760, %v3683_v63 }
 0x523   :  { %4072 = vrot.lane.b32.xlu1 %v14819_v31, %s13692_s25 }
 0x59b   :  { %v3149_v21 = vpop.xlane.xlu1 %3148 }
 0x59c   :  { %13484 = vrcp.f32 %v3149_v21 }
 0x59f   :  { %v4073_v52 = vpop.permute.xlu1 %4072 }
 0x5a0   :  { %v14903_v17 = vand.u32 4294901760, %v4073_v52 }
 0x5a2   :  { %v14909_v33 = vsub.f32 %v4073_v52, %v14903_v17 }
 0x5a4   :  { %v4187_v57 = vand.u32 4294901760, %v14909_v33 }
 0x5a6   :  { %v4188_v0 = vsub.f32 %v14909_v33, %v4187_v57 }
 0x5a8   :  { %v4189_v7 = vand.u32 4294901760, %v4188_v0 }
 0x5a9   :  { %v13485_v32 = vpop.eup %13484 }
 0x5aa   :  { %v14893_v11 = vmul.f32 %v13485_v32, %v13483_v27 }
 0x5ac   :  { %v3158_v19 = vsel %vm2225_vm2, %v14893_v11, 0 }
 0x5ad   :  { %v3226_v59 = vand.u32 4294901760, %v3158_v19 }
 0x5af   :  { %v3227_v41 = vsub.f32 %v3158_v19, %v3226_v59  ;;  %12868 = vmatmul.mubr.f32.vlgmr.msra.gmra.mxu1 %v3226_v59 }
 0x5b0   :  { %12876 = vmatpush3.msra.mxu1 %v3191_v55  ;;  %12877 = vmatprep.mubr.msk.f32.mxu1 %vm13690_vm0, %v17046_v34 }
 0x5b1   :  { %12885 = vmatprep.subr.mxu1 %v17046_v34  ;;  %v3228_v4 = vand.u32 4294901760, %v3227_v41 }
 0x5b3   :  { %12878 = vmatmul.mubr.f32.vlgmr.msra.gmra.mxu1 %v3228_v4  ;;  %v3229_v42 = vsub.f32 %v3227_v41, %v3228_v4 }
 0x5b4   :  { %12886 = vmatpush3.msra.mxu1 %v3191_v55  ;;  %12887 = vmatprep.mubr.msk.f32.mxu1 %vm13690_vm0, %v17046_v34 }
 0x5b5   :  { %12895 = vmatprep.subr.mxu1 %v17046_v34  ;;  %v3230_v28 = vand.u32 4294901760, %v3229_v42 }
 0x5b7   :  { %12863 = vmatmul.mubr.f32.vlgmr.msra.gmra.mxu0 %v3230_v28  ;;  %12888 = vmatmul.mubr.f32.vlgmr.msra.gmra.mxu1 %v3226_v59 }
 0x5b8   :  { %12871 = vmatpush3.msra.mxu0 %v3268_v14  ;;  %12896 = vmatpush3.xpose.msra.mxu1 %v3725_v38 }
 0x5b9   :  { %12872 = vmatprep.mubr.msk.f32.mxu0 %vm13690_vm0, %v17046_v34  ;;  %12880 = vmatprep.subr.mxu0 %v17046_v34 }
 0x5ba   :  { %12897 = vmatprep.mubr.msk.f32.mxu1 %vm13690_vm0, %v17046_v34  ;;  %12905 = vmatprep.subr.mxu1 %v17046_v34 }
 0x5bb   :  { %12873 = vmatmul.mubr.f32.vlgmr.msra.gmra.mxu0 %v3227_v41  ;;  %12898 = vmatmul.mubr.f32.vlgmr.msra.gmra.mxu1 %v3680_v46 }
 0x5bc   :  { %12881 = vmatpush3.msra.mxu0 %v3269_v25  ;;  %12906 = vmatpush3.xpose.msra.mxu1 %v3645_v49 }
 0x5bd   :  { %12882 = vmatprep.mubr.msk.f32.mxu0 %vm13690_vm0, %v17046_v34  ;;  %12890 = vmatprep.subr.mxu0 %v17046_v34 }
 0x5be   :  { %12907 = vmatprep.mubr.msk.f32.mxu1 %vm13690_vm0, %v17046_v34  ;;  %12915 = vmatprep.subr.mxu1 %v17046_v34 }
 0x5bf   :  { %12883 = vmatmul.mubr.f32.vlgmr.msra.gmra.mxu0 %v3226_v59  ;;  %12908 = vmatmul.mubr.f32.vlgmr.msra.gmra.mxu1 %v3682_v39 }
 0x5c0   :  { %12891 = vmatpush3.xpose.msra.mxu0 %v3645_v49  ;;  %12916 = vmatpush3.xpose.msra.mxu1 %v3645_v49 }
 0x5c1   :  { %12892 = vmatprep.mubr.msk.f32.mxu0 %vm13690_vm0, %v17046_v34  ;;  %12900 = vmatprep.subr.mxu0 %v17046_v34 }
 0x5c2   :  { %12917 = vmatprep.mubr.msk.f32.mxu1 %vm13690_vm0, %v17046_v34  ;;  %12925 = vmatprep.subr.mxu1 %v17046_v34 }
 0x5c3   :  { %12893 = vmatmul.mubr.f32.vlgmr.msra.gmra.mxu0 %v3684_v15  ;;  %12918 = vmatmul.mubr.f32.vlgmr.msra.gmra.mxu1 %v3680_v46 }
 0x5c4   :  { %12901 = vmatpush3.xpose.msra.mxu0 %v14891_v5  ;;  %12926 = vmatpush3.msra.mxu1 %v4189_v7 }
 0x5c5   :  { %12902 = vmatprep.mubr.msk.f32.mxu0 %vm13690_vm0, %v17046_v34  ;;  %12910 = vmatprep.subr.mxu0 %v17046_v34 }
 0x5c6   :  { %12927 = vmatprep.mubr.msk.f32.mxu1 %vm13690_vm0, %v17046_v34  ;;  %12935 = vmatprep.subr.mxu1 %v17046_v34 }
 0x5c7   :  { %12903 = vmatmul.mubr.f32.vlgmr.msra.gmra.mxu0 %v3681_v44 }
 0x5c8   :  { %12911 = vmatpush3.xpose.msra.mxu0 %v3723_v8  ;;  %12912 = vmatprep.mubr.msk.f32.mxu0 %vm13690_vm0, %v17046_v34 }
 0x5c9   :  { %12920 = vmatprep.subr.mxu0 %v17046_v34 }
 0x5cb   :  { %12913 = vmatmul.mubr.f32.vlgmr.msra.gmra.mxu0 %v3680_v46 }
 0x5cc   :  { %12921 = vmatpush3.msra.mxu0 %v14903_v17  ;;  %12922 = vmatprep.mubr.msk.f32.mxu0 %vm13690_vm0, %v17046_v34 }
 0x5cd   :  { %12930 = vmatprep.subr.mxu0 %v17046_v34 }
 0x66f   :  { %v3308_v45 = vpop.f32.mrf.mxu1 }
 0x671   :  { %v12869_v24 = vpop.f32.mrf.mxu1 }
 0x673   :  { %v3456_v30 = vpop.f32.mrf.mxu1 }
 0x675   :  { %v12879_v56 = vpop.f32.mrf.mxu1 }
 0x677   :  { %v3232_v60 = vpop.f32.mrf.mxu0  ;;  %v3602_v53 = vpop.f32.mrf.mxu1 }
 0x678   :  { %v3309_v2 = vadd.f32 %v3308_v45, %v3232_v60 }
 0x679   :  { %v12864_v1 = vpop.f32.mrf.mxu0  ;;  %v12889_v6 = vpop.f32.mrf.mxu1 }
 0x67b   :  { %v3382_v10 = vpop.f32.mrf.mxu0  ;;  %v3762_v55 = vpop.f32.mrf.mxu1 }
 0x67c   :  { %v3383_v14 = vadd.f32 %v3382_v10, %v3309_v2 }
 0x67d   :  { %v12874_v25 = vpop.f32.mrf.mxu0  ;;  %v12899_v29 = vpop.f32.mrf.mxu1 }
 0x67e   :  { %v3457_v58 = vadd.f32 %v3456_v30, %v3383_v14 }
 0x67f   :  { %v3530_v27 = vpop.f32.mrf.mxu0  ;;  %v3910_v47 = vpop.f32.mrf.mxu1 }
 0x680   :  { %v3531_v21 = vadd.f32 %v3530_v27, %v3457_v58 }
 0x681   :  { %v12884_v51 = vpop.f32.mrf.mxu0  ;;  %v12909_v54 = vpop.f32.mrf.mxu1 }
 0x682   :  { %v14947_v49 = vadd.f32 %v3602_v53, %v3531_v21  ;;  %v3152_v53 = vadd.f32 %v14893_v11, %v14834_v26 }
 0x683   :  { %v3686_v32 = vpop.f32.mrf.mxu0  ;;  %v4056_v5 = vpop.f32.mrf.mxu1 }
 0x684   :  { %v3763_v59 = vadd.f32 %v3762_v55, %v3686_v32 }
 0x685   :  { %v12894_v9 = vpop.f32.mrf.mxu0  ;;  %v12919_v19 = vpop.f32.mrf.mxu1 }
 0x687   :  { %v3836_v8 = vpop.f32.mrf.mxu0 }
 0x688   :  { %v3837_v48 = vadd.f32 %v3836_v8, %v3763_v59 }
 0x689   :  { %v12904_v52 = vpop.f32.mrf.mxu0 }
 0x68a   :  { %v3911_v41 = vadd.f32 %v3910_v47, %v3837_v48 }
 0x68b   :  { %v3984_v46 = vpop.f32.mrf.mxu0 }
 0x68c   :  { %v3985_v4 = vadd.f32 %v3984_v46, %v3911_v41 }
 0x68d   :  { %v12914_v12 = vpop.f32.mrf.mxu0 }
 0x68e   :  { %v4057_v42 = vadd.f32 %v4056_v5, %v3985_v4 }
 0x690   :  { %v4060_v44 = vsel %vm2225_vm2, %v4057_v42, -inf }
 0x691   :  { %4061 = vmax.xlane.f32.xlu0 %v4060_v44 }
 0x71a   :  { %v4062_v28 = vpop.xlane.xlu0 %4061 }
 0x71b   :  { %v4063_v38 = vsub.f32 %v4057_v42, %v4062_v28 }
 0x71d   :  { %v4064_v39 = vmul.f32 1.442695, %v4063_v38 }
 0x71f   :  { %13486 = vpow2.f32 %v4064_v39 }
 0x72c   :  { %v13487_v63 = vpop.eup %13486 }
 0x72d   :  { %v4066_v0 = vsel %vm2225_vm2, %v13487_v63, 0.0 }
 0x72e   :  { %4067 = vadd.xlane.f32.xlu1 %v4066_v0 }
 0x73f   :  { %4526 = vrot.lane.b32.xlu1 %v14781_v61, %s13693_s26 }
 0x743   :  { %4524 = vrot.lane.b32.xlu1 %v14779_v18, %s13693_s26 }
 0x7b7   :  { %v4068_v15 = vpop.xlane.xlu1 %4067 }
 0x7b8   :  { %13488 = vrcp.f32 %v4068_v15 }
 0x7bb   :  { %v4527_v7 = vpop.permute.xlu1 %4526 }
 0x7bc   :  { %v4530_v45 = vsel %vm1772_vm1, %v4527_v7, 0 }
 0x7bd   :  { %v4563_v24 = vand.u32 4294901760, %v4530_v45 }
 0x7bf   :  { %v4640_v56 = vsub.f32 %v4530_v45, %v4563_v24  ;;  %v4525_v2 = vpop.permute.xlu1 %4524 }
 0x7c0   :  { %v4528_v18 = vsel %vm1772_vm1, %v4525_v2, 0 }
 0x7c1   :  { %v4641_v10 = vand.u32 4294901760, %v4640_v56  ;;  %v4598_v14 = vand.u32 4294901760, %v4528_v18 }
 0x7c3   :  { %v4642_v11 = vsub.f32 %v4640_v56, %v4641_v10  ;;  %v4599_v29 = vsub.f32 %v4528_v18, %v4598_v14 }
 0x7c5   :  { %v13489_v30 = vpop.eup %13488  ;;  %v4643_v27 = vand.u32 4294901760, %v4642_v11  ;;  %v4600_v47 = vand.u32 4294901760, %v4599_v29 }
 0x7c6   :  { %v4070_v60 = vmul.f32 %v13489_v30, %v13487_v63 }
 0x7c8   :  { %v4076_v1 = vsel %vm2225_vm2, %v4070_v60, 0  ;;  %v14959_v6 = vadd.f32 %v4070_v60, %v3152_v53 }
 0x7c9   :  { %v4144_v61 = vand.u32 4294901760, %v4076_v1 }
 0x7cb   :  { %v4145_v55 = vsub.f32 %v4076_v1, %v4144_v61  ;;  %12928 = vmatmul.mubr.f32.vlgmr.msra.gmra.mxu1 %v4144_v61 }
 0x7cc   :  { %12936 = vmatpush3.msra.mxu1 %v14903_v17  ;;  %12937 = vmatprep.mubr.msk.f32.mxu1 %vm13690_vm0, %v17046_v34 }
 0x7cd   :  { %12945 = vmatprep.subr.mxu1 %v17046_v34  ;;  %v4146_v26 = vand.u32 4294901760, %v4145_v55 }
 0x7cf   :  { %12938 = vmatmul.mubr.f32.vlgmr.msra.gmra.mxu1 %v4146_v26  ;;  %v4147_v25 = vsub.f32 %v4145_v55, %v4146_v26 }
 0x7d0   :  { %12946 = vmatpush3.msra.mxu1 %v14903_v17  ;;  %12947 = vmatprep.mubr.msk.f32.mxu1 %vm13690_vm0, %v17046_v34  ;;  %v4601_v17 = vsub.f32 %v4599_v29, %v4600_v47 }
 0x7d1   :  { %12955 = vmatprep.subr.mxu1 %v17046_v34  ;;  %v4148_v58 = vand.u32 4294901760, %v4147_v25 }
 0x7d2   :  { %v4602_v21 = vand.u32 4294901760, %v4601_v17 }
 0x7d3   :  { %12923 = vmatmul.mubr.f32.vlgmr.msra.gmra.mxu0 %v4148_v58  ;;  %12948 = vmatmul.mubr.f32.vlgmr.msra.gmra.mxu1 %v4144_v61 }
 0x7d4   :  { %12931 = vmatpush3.msra.mxu0 %v14909_v33  ;;  %12956 = vmatpush3.xpose.msra.mxu1 %v4643_v27 }
 0x7d5   :  { %12932 = vmatprep.mubr.msk.f32.mxu0 %vm13690_vm0, %v17046_v34  ;;  %12940 = vmatprep.subr.mxu0 %v17046_v34 }
 0x7d6   :  { %12957 = vmatprep.mubr.msk.f32.mxu1 %vm13690_vm0, %v17046_v34  ;;  %12965 = vmatprep.subr.mxu1 %v17046_v34 }
 0x7d7   :  { %12933 = vmatmul.mubr.f32.vlgmr.msra.gmra.mxu0 %v4145_v55  ;;  %12958 = vmatmul.mubr.f32.vlgmr.msra.gmra.mxu1 %v4598_v14 }
 0x7d8   :  { %12941 = vmatpush3.msra.mxu0 %v4187_v57  ;;  %12966 = vmatpush3.xpose.msra.mxu1 %v4563_v24 }
 0x7d9   :  { %12942 = vmatprep.mubr.msk.f32.mxu0 %vm13690_vm0, %v17046_v34  ;;  %12950 = vmatprep.subr.mxu0 %v17046_v34 }
 0x7da   :  { %12967 = vmatprep.mubr.msk.f32.mxu1 %vm13690_vm0, %v17046_v34  ;;  %12975 = vmatprep.subr.mxu1 %v17046_v34 }
 0x7db   :  { %12943 = vmatmul.mubr.f32.vlgmr.msra.gmra.mxu0 %v4144_v61  ;;  %12968 = vmatmul.mubr.f32.vlgmr.msra.gmra.mxu1 %v4600_v47 }
 0x7dc   :  { %12951 = vmatpush3.xpose.msra.mxu0 %v4563_v24  ;;  %12976 = vmatpush3.xpose.msra.mxu1 %v4563_v24 }
 0x7dd   :  { %12952 = vmatprep.mubr.msk.f32.mxu0 %vm13690_vm0, %v17046_v34  ;;  %12960 = vmatprep.subr.mxu0 %v17046_v34 }
 0x7de   :  { %12977 = vmatprep.mubr.msk.f32.mxu1 %vm13690_vm0, %v17046_v34  ;;  %12985 = vmatprep.subr.mxu1 %v17046_v34 }
 0x7df   :  { %12953 = vmatmul.mubr.f32.vlgmr.msra.gmra.mxu0 %v4602_v21  ;;  %12978 = vmatmul.mubr.f32.vlgmr.msra.gmra.mxu1 %v4598_v14 }
 0x7e0   :  { %12961 = vmatpush3.xpose.msra.mxu0 %v4640_v56  ;;  %12962 = vmatprep.mubr.msk.f32.mxu0 %vm13690_vm0, %v17046_v34 }
 0x7e1   :  { %12970 = vmatprep.subr.mxu0 %v17046_v34  ;;  %12987 = vmatprep.mubr.msk.f32.mxu1 %vm13690_vm0, %v17046_v34 }
 0x7e3   :  { %12963 = vmatmul.mubr.f32.vlgmr.msra.gmra.mxu0 %v4599_v29 }
 0x7e4   :  { %12971 = vmatpush3.xpose.msra.mxu0 %v4641_v10  ;;  %12972 = vmatprep.mubr.msk.f32.mxu0 %vm13690_vm0, %v17046_v34 }
 0x7e5   :  { %12980 = vmatprep.subr.mxu0 %v17046_v34 }
 0x7e7   :  { %12973 = vmatmul.mubr.f32.vlgmr.msra.gmra.mxu0 %v4598_v14 }
 0x7e8   :  { %12982 = vmatprep.mubr.msk.f32.mxu0 %vm13690_vm0, %v17046_v34 }
 0x88b   :  { %v4226_v33 = vpop.f32.mrf.mxu1 }
 0x88d   :  { %v12929_v57 = vpop.f32.mrf.mxu1 }
 0x88f   :  { %v4374_v51 = vpop.f32.mrf.mxu1 }
 0x891   :  { %v12939_v54 = vpop.f32.mrf.mxu1 }
 0x893   :  { %v4150_v32 = vpop.f32.mrf.mxu0  ;;  %v4520_v5 = vpop.f32.mrf.mxu1 }
 0x894   :  { %v4227_v9 = vadd.f32 %v4226_v33, %v4150_v32 }
 0x895   :  { %v12924_v19 = vpop.f32.mrf.mxu0  ;;  %v12949_v59 = vpop.f32.mrf.mxu1 }
 0x897   :  { %v4300_v8 = vpop.f32.mrf.mxu0  ;;  %v4680_v48 = vpop.f32.mrf.mxu1 }
 0x898   :  { %v4301_v52 = vadd.f32 %v4300_v8, %v4227_v9 }
 0x899   :  { %v12934_v41 = vpop.f32.mrf.mxu0  ;;  %v12959_v46 = vpop.f32.mrf.mxu1 }
 0x89a   :  { %v4375_v4 = vadd.f32 %v4374_v51, %v4301_v52 }
 0x89b   :  { %v4448_v12 = vpop.f32.mrf.mxu0  ;;  %v4828_v42 = vpop.f32.mrf.mxu1 }
 0x89c   :  { %v4449_v44 = vadd.f32 %v4448_v12, %v4375_v4 }
 0x89d   :  { %v12944_v28 = vpop.f32.mrf.mxu0  ;;  %v12969_v38 = vpop.f32.mrf.mxu1 }
 0x89e   :  { %v15001_v39 = vadd.f32 %v4520_v5, %v4449_v44 }
 0x89f   :  { %v4604_v63 = vpop.f32.mrf.mxu0  ;;  %v4974_v0 = vpop.f32.mrf.mxu1 }
 0x8a0   :  { %v4681_v45 = vadd.f32 %v4680_v48, %v4604_v63 }
 0x8a1   :  { %v12954_v15 = vpop.f32.mrf.mxu0  ;;  %v12979_v7 = vpop.f32.mrf.mxu1 }
 0x8a3   :  { %v4754_v24 = vpop.f32.mrf.mxu0 }
 0x8a4   :  { %v4755_v30 = vadd.f32 %v4754_v24, %v4681_v45 }
 0x8a5   :  { %v12964_v56 = vpop.f32.mrf.mxu0 }
 0x8a6   :  { %v4829_v60 = vadd.f32 %v4828_v42, %v4755_v30 }
 0x8a7   :  { %v4902_v53 = vpop.f32.mrf.mxu0 }
 0x8a8   :  { %v4903_v2 = vadd.f32 %v4902_v53, %v4829_v60 }
 0x8a9   :  { %v12974_v1 = vpop.f32.mrf.mxu0 }
 0x8aa   :  { %v4975_v61 = vadd.f32 %v4974_v0, %v4903_v2 }
 0x8ac   :  { %v4978_v10 = vsel %vm2225_vm2, %v4975_v61, -inf }
 0x8ad   :  { %4979 = vmax.xlane.f32.xlu0 %v4978_v10 }
 0x8c3   :  { %4990 = vrot.lane.b32.xlu0 %v14819_v31, %s13693_s26  ;;  %v300_v31 = vadd.f32 %v14764_v37, %v14772_v13  ;;  %v15021_v37 = vmul.f32 0.17677669, %v14785_v22 }
 0x8c5   :  { %v539_v21 = vadd.f32 %v14766_v20, %v300_v31 }
 0x8c7   :  { %v684_v33 = vadd.f32 %v14774_v43, %v539_v21 }
 0x8c9   :  { %v799_v57 = vadd.f32 %v14777_v35, %v684_v33 }
 0x8cb   :  { %v974_v54 = vadd.f32 %v14813_v50, %v799_v57 }
 0x8cd   :  { %v15016_v32 = vadd.f32 %v14815_v36, %v974_v54  ;;  %v5463_v36 = vsel %vm1772_vm1, %v15021_v37, 0 }
 0x8ce   :  { %v5534_v52 = vand.u32 4294901760, %v5463_v36 }
 0x8cf   :  { %v5466_v5 = vsel %vm1772_vm1, %v15016_v32, 0 }
 0x8d0   :  { %v5499_v9 = vand.u32 4294901760, %v5466_v5  ;;  %v5535_v12 = vsub.f32 %v5463_v36, %v5534_v52 }
 0x8d2   :  { %v15023_v20 = vsub.f32 %v5466_v5, %v5499_v9  ;;  %v5536_v28 = vand.u32 4294901760, %v5535_v12 }
 0x8d4   :  { %v5577_v50 = vand.u32 4294901760, %v15023_v20  ;;  %v5537_v63 = vsub.f32 %v5535_v12, %v5536_v28 }
 0x8d6   :  { %v5578_v41 = vsub.f32 %v15023_v20, %v5577_v50  ;;  %v5538_v15 = vand.u32 4294901760, %v5537_v63 }
 0x8d8   :  { %v5579_v42 = vand.u32 4294901760, %v5578_v41 }
 0x936   :  { %v4980_v18 = vpop.xlane.xlu0 %4979 }
 0x937   :  { %v4981_v55 = vsub.f32 %v4975_v61, %v4980_v18 }
 0x939   :  { %v4982_v14 = vmul.f32 1.442695, %v4981_v55 }
 0x93a   :  { %v4991_v26 = vpop.permute.xlu0 %4990 }
 0x93b   :  { %13490 = vpow2.f32 %v4982_v14  ;;  %v5027_v11 = vand.u32 4294901760, %v4991_v26 }
 0x93d   :  { %v5104_v25 = vsub.f32 %v4991_v26, %v5027_v11  ;;  %12981 = vmatpush3.msra.mxu0 %v5027_v11 }
 0x93e   :  { %12990 = vmatprep.subr.mxu0 %v17046_v34 }
 0x93f   :  { %v5105_v29 = vand.u32 4294901760, %v5104_v25 }
 0x941   :  { %v5106_v58 = vsub.f32 %v5104_v25, %v5105_v29 }
 0x943   :  { %v5107_v27 = vand.u32 4294901760, %v5106_v58 }
 0x945   :  { %12986 = vmatpush3.msra.mxu1 %v5107_v27 }
 0x946   :  { %12995 = vmatprep.subr.mxu1 %v17046_v34 }
 0x948   :  { %v13491_v47 = vpop.eup %13490 }
 0x949   :  { %v4984_v17 = vsel %vm2225_vm2, %v13491_v47, 0.0 }
 0x94a   :  { %4985 = vadd.xlane.f32.xlu1 %v4984_v17 }
 0x9d3   :  { %v4986_v51 = vpop.xlane.xlu1 %4985 }
 0x9d4   :  { %13492 = vrcp.f32 %v4986_v51 }
 0x9e1   :  { %v13493_v19 = vpop.eup %13492 }
 0x9e2   :  { %v4988_v13 = vmul.f32 %v13493_v19, %v13491_v47 }
 0x9e4   :  { %v4994_v43 = vsel %vm2225_vm2, %v4988_v13, 0  ;;  %v4989_v35 = vadd.f32 %v4988_v13, %v14959_v6  ;;  %v15035_v6 = vand.u32 4294901760, %v14817_v3 }
 0x9e5   :  { %v5062_v59 = vand.u32 4294901760, %v4994_v43 }
 0x9e6   :  { %v5442_v8 = vmul.f32 0.25, %v4989_v35  ;;  %v15043_v44 = vsub.f32 %v14817_v3, %v15035_v6 }
 0x9e7   :  { %v5063_v48 = vsub.f32 %v4994_v43, %v5062_v59  ;;  %12988 = vmatmul.mubr.f32.vlgmr.msra.gmra.mxu1 %v5062_v59 }
 0x9e8   :  { %12996 = vmatpush3.msra.mxu1 %v5027_v11  ;;  %12997 = vmatprep.mubr.msk.f32.mxu1 %vm13690_vm0, %v17046_v34  ;;  %5443 = vst.msk [vmem:[#allocation12] sm:$0xff] %vm2225_vm2, %v5442_v8  ;;  %v6038_v38 = vand.u32 4294901760, %v15043_v44 }
 0x9e9   :  { %13005 = vmatprep.subr.mxu1 %v17046_v34  ;;  %v5064_v22 = vand.u32 4294901760, %v5063_v48 }
 0x9ea   :  { %v6039_v0 = vsub.f32 %v15043_v44, %v6038_v38 }
 0x9eb   :  { %12998 = vmatmul.mubr.f32.vlgmr.msra.gmra.mxu1 %v5064_v22  ;;  %v5065_v46 = vsub.f32 %v5063_v48, %v5064_v22 }
 0x9ec   :  { %13006 = vmatpush3.msra.mxu1 %v5027_v11  ;;  %13007 = vmatprep.mubr.msk.f32.mxu1 %vm13690_vm0, %v17046_v34  ;;  %v6040_v7 = vand.u32 4294901760, %v6039_v0 }
 0x9ed   :  { %13015 = vmatprep.subr.mxu1 %v17046_v34  ;;  %v5066_v4 = vand.u32 4294901760, %v5065_v46 }
 0x9ef   :  { %12983 = vmatmul.mubr.f32.vlgmr.msra.gmra.mxu0 %v5066_v4  ;;  %13008 = vmatmul.mubr.f32.vlgmr.msra.gmra.mxu1 %v5062_v59 }
 0x9f0   :  { %12991 = vmatpush3.msra.mxu0 %v5104_v25  ;;  %13016 = vmatpush3.xpose.msra.mxu1 %v5579_v42 }
 0x9f1   :  { %12992 = vmatprep.mubr.msk.f32.mxu0 %vm13690_vm0, %v17046_v34  ;;  %13000 = vmatprep.subr.mxu0 %v17046_v34 }
 0x9f2   :  { %13017 = vmatprep.mubr.msk.f32.mxu1 %vm13690_vm0, %v17046_v34  ;;  %13025 = vmatprep.subr.mxu1 %v17046_v34 }
 0x9f3   :  { %12993 = vmatmul.mubr.f32.vlgmr.msra.gmra.mxu0 %v5063_v48  ;;  %13018 = vmatmul.mubr.f32.vlgmr.msra.gmra.mxu1 %v5534_v52 }
 0x9f4   :  { %13001 = vmatpush3.msra.mxu0 %v5105_v29  ;;  %13026 = vmatpush3.xpose.msra.mxu1 %v5499_v9 }
 0x9f5   :  { %13002 = vmatprep.mubr.msk.f32.mxu0 %vm13690_vm0, %v17046_v34  ;;  %13010 = vmatprep.subr.mxu0 %v17046_v34 }
 0x9f6   :  { %13027 = vmatprep.mubr.msk.f32.mxu1 %vm13690_vm0, %v17046_v34  ;;  %13035 = vmatprep.subr.mxu1 %v17046_v34 }
 0x9f7   :  { %13003 = vmatmul.mubr.f32.vlgmr.msra.gmra.mxu0 %v5062_v59  ;;  %13028 = vmatmul.mubr.f32.vlgmr.msra.gmra.mxu1 %v5536_v28 }
 0x9f8   :  { %13011 = vmatpush3.xpose.msra.mxu0 %v5499_v9  ;;  %13036 = vmatpush3.xpose.msra.mxu1 %v5499_v9 }
 0x9f9   :  { %13012 = vmatprep.mubr.msk.f32.mxu0 %vm13690_vm0, %v17046_v34  ;;  %13020 = vmatprep.subr.mxu0 %v17046_v34 }
 0x9fa   :  { %13037 = vmatprep.mubr.msk.f32.mxu1 %vm13690_vm0, %v17046_v34  ;;  %13045 = vmatprep.subr.mxu1 %v17046_v34 }
 0x9fb   :  { %13013 = vmatmul.mubr.f32.vlgmr.msra.gmra.mxu0 %v5538_v15  ;;  %13038 = vmatmul.mubr.f32.vlgmr.msra.gmra.mxu1 %v5534_v52 }
 0x9fc   :  { %13021 = vmatpush3.xpose.msra.mxu0 %v15023_v20  ;;  %13046 = vmatpush3.msra.mxu1 %v6040_v7 }
 0x9fd   :  { %13022 = vmatprep.mubr.msk.f32.mxu0 %vm13690_vm0, %v17046_v34  ;;  %13030 = vmatprep.subr.mxu0 %v17046_v34 }
 0x9fe   :  { %13047 = vmatprep.mubr.msk.f32.mxu1 %vm13690_vm0, %v17046_v34  ;;  %13055 = vmatprep.subr.mxu1 %v17046_v34 }
 0x9ff   :  { %13023 = vmatmul.mubr.f32.vlgmr.msra.gmra.mxu0 %v5535_v12 }
 0xa00   :  { %13031 = vmatpush3.xpose.msra.mxu0 %v5577_v50  ;;  %13032 = vmatprep.mubr.msk.f32.mxu0 %vm13690_vm0, %v17046_v34 }
 0xa01   :  { %13040 = vmatprep.subr.mxu0 %v17046_v34 }
 0xa03   :  { %13033 = vmatmul.mubr.f32.vlgmr.msra.gmra.mxu0 %v5534_v52 }
 0xa04   :  { %13041 = vmatpush3.msra.mxu0 %v15035_v6  ;;  %13042 = vmatprep.mubr.msk.f32.mxu0 %vm13690_vm0, %v17046_v34 }
 0xa05   :  { %13050 = vmatprep.subr.mxu0 %v17046_v34 }
 0xaa7   :  { %v5144_v45 = vpop.f32.mrf.mxu1 }
 0xaa9   :  { %v12989_v24 = vpop.f32.mrf.mxu1 }
 0xaab   :  { %v5292_v30 = vpop.f32.mrf.mxu1 }
 0xaad   :  { %v12999_v56 = vpop.f32.mrf.mxu1 }
 0xaaf   :  { %v5068_v60 = vpop.f32.mrf.mxu0  ;;  %v5438_v53 = vpop.f32.mrf.mxu1 }
 0xab0   :  { %v5145_v2 = vadd.f32 %v5144_v45, %v5068_v60 }
 0xab1   :  { %v12984_v1 = vpop.f32.mrf.mxu0  ;;  %v13009_v61 = vpop.f32.mrf.mxu1 }
 0xab3   :  { %v5218_v10 = vpop.f32.mrf.mxu0  ;;  %v5616_v18 = vpop.f32.mrf.mxu1 }
 0xab4   :  { %v5219_v55 = vadd.f32 %v5218_v10, %v5145_v2 }
 0xab5   :  { %v12994_v14 = vpop.f32.mrf.mxu0  ;;  %v13019_v26 = vpop.f32.mrf.mxu1 }
 0xab6   :  { %v5293_v11 = vadd.f32 %v5292_v30, %v5219_v55 }
 0xab7   :  { %v5366_v25 = vpop.f32.mrf.mxu0  ;;  %v5764_v29 = vpop.f32.mrf.mxu1 }
 0xab8   :  { %v5367_v58 = vadd.f32 %v5366_v25, %v5293_v11 }
 0xab9   :  { %v13004_v27 = vpop.f32.mrf.mxu0  ;;  %v13029_v47 = vpop.f32.mrf.mxu1 }
 0xaba   :  { %v15081_v17 = vadd.f32 %v5438_v53, %v5367_v58 }
 0xabb   :  { %v5540_v31 = vpop.f32.mrf.mxu0  ;;  %v5910_v21 = vpop.f32.mrf.mxu1 }
 0xabc   :  { %v5617_v51 = vadd.f32 %v5616_v18, %v5540_v31 }
 0xabd   :  { %v13014_v33 = vpop.f32.mrf.mxu0  ;;  %v13039_v57 = vpop.f32.mrf.mxu1 }
 0xabf   :  { %v5690_v54 = vpop.f32.mrf.mxu0 }
 0xac0   :  { %v5691_v5 = vadd.f32 %v5690_v54, %v5617_v51 }
 0xac1   :  { %v13024_v9 = vpop.f32.mrf.mxu0 }
 0xac2   :  { %v5765_v19 = vadd.f32 %v5764_v29, %v5691_v5 }
 0xac3   :  { %v5838_v20 = vpop.f32.mrf.mxu0 }
 0xac4   :  { %v5839_v13 = vadd.f32 %v5838_v20, %v5765_v19 }
 0xac5   :  { %v13034_v43 = vpop.f32.mrf.mxu0 }
 0xac6   :  { %v5911_v35 = vadd.f32 %v5910_v21, %v5839_v13 }
 0xac8   :  { %v5914_v59 = vsel %vm2225_vm2, %v5911_v35, -inf }
 0xac9   :  { %5915 = vmax.xlane.f32.xlu0 %v5914_v59 }
 0xadf   :  { %6375 = vrot.lane.b32.xlu0 %v15021_v37, %s13691_s2 }
 0xb52   :  { %v5916_v50 = vpop.xlane.xlu0 %5915 }
 0xb53   :  { %v5917_v36 = vsub.f32 %v5911_v35, %v5916_v50 }
 0xb55   :  { %v5918_v8 = vmul.f32 1.442695, %v5917_v36 }
 0xb56   :  { %v6376_v63 = vpop.permute.xlu0 %6375 }
 0xb57   :  { %13494 = vpow2.f32 %v5918_v8  ;;  %v6379_v7 = vsel %vm1772_vm1, %v6376_v63, 0 }
 0xb58   :  { %v6449_v30 = vand.u32 4294901760, %v6379_v7 }
 0xb5a   :  { %v6450_v2 = vsub.f32 %v6379_v7, %v6449_v30 }
 0xb5c   :  { %v6451_v10 = vand.u32 4294901760, %v6450_v2 }
 0xb64   :  { %v13495_v48 = vpop.eup %13494 }
 0xb65   :  { %v5920_v22 = vsel %vm2225_vm2, %v13495_v48, 0.0 }
 0xb66   :  { %5921 = vadd.xlane.f32.xlu1 %v5920_v22 }
 0xb77   :  { %6377 = vrot.lane.b32.xlu1 %v15016_v32, %s13691_s2 }
 0xbef   :  { %v5922_v52 = vpop.xlane.xlu1 %5921 }
 0xbf0   :  { %13496 = vrcp.f32 %v5922_v52 }
 0xbf3   :  { %v6378_v41 = vpop.permute.xlu1 %6377 }
 0xbf4   :  { %v6381_v46 = vsel %vm1772_vm1, %v6378_v41, 0 }
 0xbf5   :  { %v6414_v4 = vand.u32 4294901760, %v6381_v46 }
 0xbf7   :  { %v6491_v42 = vsub.f32 %v6381_v46, %v6414_v4 }
 0xbf9   :  { %v6492_v45 = vand.u32 4294901760, %v6491_v42 }
 0xbfb   :  { %v6493_v60 = vsub.f32 %v6491_v42, %v6492_v45 }
 0xbfd   :  { %v13497_v12 = vpop.eup %13496  ;;  %v6494_v61 = vand.u32 4294901760, %v6493_v60 }
 0xbfe   :  { %v15090_v28 = vmul.f32 %v13497_v12, %v13495_v48 }
 0xc00   :  { %v5927_v0 = vsel %vm2225_vm2, %v15090_v28, 0 }
 0xc01   :  { %v5995_v15 = vand.u32 4294901760, %v5927_v0 }
 0xc03   :  { %v5996_v24 = vsub.f32 %v5927_v0, %v5995_v15  ;;  %13048 = vmatmul.mubr.f32.vlgmr.msra.gmra.mxu1 %v5995_v15 }
 0xc04   :  { %13056 = vmatpush3.msra.mxu1 %v15035_v6  ;;  %13057 = vmatprep.mubr.msk.f32.mxu1 %vm13690_vm0, %v17046_v34 }
 0xc05   :  { %13065 = vmatprep.subr.mxu1 %v17046_v34  ;;  %v5997_v56 = vand.u32 4294901760, %v5996_v24 }
 0xc07   :  { %13058 = vmatmul.mubr.f32.vlgmr.msra.gmra.mxu1 %v5997_v56  ;;  %v5998_v53 = vsub.f32 %v5996_v24, %v5997_v56 }
 0xc08   :  { %13066 = vmatpush3.msra.mxu1 %v15035_v6  ;;  %13067 = vmatprep.mubr.msk.f32.mxu1 %vm13690_vm0, %v17046_v34  ;;  %v6452_v6 = vsub.f32 %v6450_v2, %v6451_v10 }
 0xc09   :  { %13075 = vmatprep.subr.mxu1 %v17046_v34  ;;  %v5999_v1 = vand.u32 4294901760, %v5998_v53 }
 0xc0a   :  { %v6453_v18 = vand.u32 4294901760, %v6452_v6 }
 0xc0b   :  { %13043 = vmatmul.mubr.f32.vlgmr.msra.gmra.mxu0 %v5999_v1  ;;  %13068 = vmatmul.mubr.f32.vlgmr.msra.gmra.mxu1 %v5995_v15 }
 0xc0c   :  { %13051 = vmatpush3.msra.mxu0 %v15043_v44  ;;  %13076 = vmatpush3.xpose.msra.mxu1 %v6494_v61 }
 0xc0d   :  { %13052 = vmatprep.mubr.msk.f32.mxu0 %vm13690_vm0, %v17046_v34  ;;  %13060 = vmatprep.subr.mxu0 %v17046_v34 }
 0xc0e   :  { %13077 = vmatprep.mubr.msk.f32.mxu1 %vm13690_vm0, %v17046_v34  ;;  %13085 = vmatprep.subr.mxu1 %v17046_v34 }
 0xc0f   :  { %13053 = vmatmul.mubr.f32.vlgmr.msra.gmra.mxu0 %v5996_v24  ;;  %13078 = vmatmul.mubr.f32.vlgmr.msra.gmra.mxu1 %v6449_v30 }
 0xc10   :  { %13061 = vmatpush3.msra.mxu0 %v6038_v38  ;;  %13086 = vmatpush3.xpose.msra.mxu1 %v6414_v4 }
 0xc11   :  { %13062 = vmatprep.mubr.msk.f32.mxu0 %vm13690_vm0, %v17046_v34  ;;  %13070 = vmatprep.subr.mxu0 %v17046_v34 }
 0xc12   :  { %13087 = vmatprep.mubr.msk.f32.mxu1 %vm13690_vm0, %v17046_v34  ;;  %13095 = vmatprep.subr.mxu1 %v17046_v34 }
 0xc13   :  { %13063 = vmatmul.mubr.f32.vlgmr.msra.gmra.mxu0 %v5995_v15  ;;  %13088 = vmatmul.mubr.f32.vlgmr.msra.gmra.mxu1 %v6451_v10 }
 0xc14   :  { %13071 = vmatpush3.xpose.msra.mxu0 %v6414_v4  ;;  %13096 = vmatpush3.xpose.msra.mxu1 %v6414_v4 }
 0xc15   :  { %13072 = vmatprep.mubr.msk.f32.mxu0 %vm13690_vm0, %v17046_v34  ;;  %13080 = vmatprep.subr.mxu0 %v17046_v34 }
 0xc16   :  { %13097 = vmatprep.mubr.msk.f32.mxu1 %vm13690_vm0, %v17046_v34  ;;  %13105 = vmatprep.subr.mxu1 %v17046_v34 }
 0xc17   :  { %13073 = vmatmul.mubr.f32.vlgmr.msra.gmra.mxu0 %v6453_v18  ;;  %13098 = vmatmul.mubr.f32.vlgmr.msra.gmra.mxu1 %v6449_v30 }
 0xc18   :  { %13081 = vmatpush3.xpose.msra.mxu0 %v6491_v42  ;;  %13082 = vmatprep.mubr.msk.f32.mxu0 %vm13690_vm0, %v17046_v34 }
 0xc19   :  { %13090 = vmatprep.subr.mxu0 %v17046_v34  ;;  %13107 = vmatprep.mubr.msk.f32.mxu1 %vm13690_vm0, %v17046_v34 }
 0xc1b   :  { %13083 = vmatmul.mubr.f32.vlgmr.msra.gmra.mxu0 %v6450_v2 }
 0xc1c   :  { %13091 = vmatpush3.xpose.msra.mxu0 %v6492_v45  ;;  %13092 = vmatprep.mubr.msk.f32.mxu0 %vm13690_vm0, %v17046_v34 }
 0xc1d   :  { %13100 = vmatprep.subr.mxu0 %v17046_v34 }
 0xc1f   :  { %13093 = vmatmul.mubr.f32.vlgmr.msra.gmra.mxu0 %v6449_v30 }
 0xc20   :  { %13102 = vmatprep.mubr.msk.f32.mxu0 %vm13690_vm0, %v17046_v34 }
 0xcc3   :  { %v6077_v44 = vpop.f32.mrf.mxu1 }
 0xcc5   :  { %v13049_v38 = vpop.f32.mrf.mxu1 }
 0xcc7   :  { %v6225_v55 = vpop.f32.mrf.mxu1 }
 0xcc9   :  { %v13059_v14 = vpop.f32.mrf.mxu1 }
 0xccb   :  { %v6001_v26 = vpop.f32.mrf.mxu0  ;;  %v6371_v11 = vpop.f32.mrf.mxu1 }
 0xccc   :  { %v6078_v25 = vadd.f32 %v6077_v44, %v6001_v26 }
 0xccd   :  { %v13044_v29 = vpop.f32.mrf.mxu0  ;;  %v13069_v58 = vpop.f32.mrf.mxu1 }
 0xccf   :  { %v6151_v27 = vpop.f32.mrf.mxu0  ;;  %v6531_v47 = vpop.f32.mrf.mxu1 }
 0xcd0   :  { %v6152_v31 = vadd.f32 %v6151_v27, %v6078_v25 }
 0xcd1   :  { %v13054_v21 = vpop.f32.mrf.mxu0  ;;  %v13079_v33 = vpop.f32.mrf.mxu1 }
 0xcd2   :  { %v6226_v57 = vadd.f32 %v6225_v55, %v6152_v31 }
 0xcd3   :  { %v6299_v51 = vpop.f32.mrf.mxu0  ;;  %v6679_v54 = vpop.f32.mrf.mxu1 }
 0xcd4   :  { %v6300_v5 = vadd.f32 %v6299_v51, %v6226_v57 }
 0xcd5   :  { %v13064_v9 = vpop.f32.mrf.mxu0  ;;  %v13089_v19 = vpop.f32.mrf.mxu1 }
 0xcd6   :  { %v15134_v20 = vadd.f32 %v6371_v11, %v6300_v5 }
 0xcd7   :  { %v6455_v13 = vpop.f32.mrf.mxu0  ;;  %v6825_v43 = vpop.f32.mrf.mxu1 }
 0xcd8   :  { %v6532_v50 = vadd.f32 %v6531_v47, %v6455_v13 }
 0xcd9   :  { %v13074_v35 = vpop.f32.mrf.mxu0  ;;  %v13099_v59 = vpop.f32.mrf.mxu1 }
 0xcdb   :  { %v6605_v36 = vpop.f32.mrf.mxu0 }
 0xcdc   :  { %v6606_v8 = vadd.f32 %v6605_v36, %v6532_v50 }
 0xcdd   :  { %v13084_v48 = vpop.f32.mrf.mxu0 }
 0xcde   :  { %v6680_v22 = vadd.f32 %v6679_v54, %v6606_v8 }
 0xcdf   :  { %v6753_v52 = vpop.f32.mrf.mxu0 }
 0xce0   :  { %v6754_v41 = vadd.f32 %v6753_v52, %v6680_v22 }
 0xce1   :  { %v13094_v46 = vpop.f32.mrf.mxu0 }
 0xce2   :  { %v6826_v4 = vadd.f32 %v6825_v43, %v6754_v41 }
 0xce4   :  { %v6829_v12 = vsel %vm2225_vm2, %v6826_v4, -inf }
 0xce5   :  { %6830 = vmax.xlane.f32.xlu1 %v6829_v12 }
 0xcf6   :  { %6842 = vrot.lane.b32.xlu1 %v14817_v3, %s13691_s2 }
 0xcfa   :  { %7294 = vrot.lane.b32.xlu1 %v15021_v37, %s13692_s25 }
 0xd6e   :  { %v6831_v42 = vpop.xlane.xlu1 %6830 }
 0xd6f   :  { %v6832_v63 = vsub.f32 %v6826_v4, %v6831_v42 }
 0xd71   :  { %v6833_v0 = vmul.f32 1.442695, %v6832_v63 }
 0xd72   :  { %v6843_v15 = vpop.permute.xlu1 %6842 }
 0xd73   :  { %13498 = vpow2.f32 %v6833_v0  ;;  %v6879_v7 = vand.u32 4294901760, %v6843_v15 }
 0xd75   :  { %v6956_v45 = vsub.f32 %v6843_v15, %v6879_v7  ;;  %13101 = vmatpush3.msra.mxu0 %v6879_v7 }
 0xd76   :  { %13110 = vmatprep.subr.mxu0 %v17046_v34  ;;  %v7295_v38 = vpop.permute.xlu1 %7294 }
 0xd77   :  { %v6957_v24 = vand.u32 4294901760, %v6956_v45  ;;  %v7298_v26 = vsel %vm1772_vm1, %v7295_v38, 0 }
 0xd78   :  { %v7368_v29 = vand.u32 4294901760, %v7298_v26 }
 0xd79   :  { %v6958_v30 = vsub.f32 %v6956_v45, %v6957_v24 }
 0xd7a   :  { %v7369_v31 = vsub.f32 %v7298_v26, %v7368_v29 }
 0xd7b   :  { %v6959_v56 = vand.u32 4294901760, %v6958_v30 }
 0xd7c   :  { %v7370_v57 = vand.u32 4294901760, %v7369_v31 }
 0xd7d   :  { %13106 = vmatpush3.msra.mxu1 %v6959_v56 }
 0xd7e   :  { %13115 = vmatprep.subr.mxu1 %v17046_v34  ;;  %v7371_v51 = vsub.f32 %v7369_v31, %v7370_v57 }
 0xd80   :  { %v13499_v60 = vpop.eup %13498  ;;  %v7372_v54 = vand.u32 4294901760, %v7371_v51 }
 0xd81   :  { %v6835_v53 = vsel %vm2225_vm2, %v13499_v60, 0.0 }
 0xd82   :  { %6836 = vadd.xlane.f32.xlu0 %v6835_v53 }
 0xd98   :  { %7296 = vrot.lane.b32.xlu0 %v15016_v32, %s13692_s25 }
 0xe0b   :  { %v6837_v2 = vpop.xlane.xlu0 %6836 }
 0xe0c   :  { %13500 = vrcp.f32 %v6837_v2 }
 0xe0f   :  { %v7297_v1 = vpop.permute.xlu0 %7296 }
 0xe10   :  { %v7300_v61 = vsel %vm1772_vm1, %v7297_v1, 0 }
 0xe11   :  { %v7333_v10 = vand.u32 4294901760, %v7300_v61 }
 0xe13   :  { %v7410_v18 = vsub.f32 %v7300_v61, %v7333_v10 }
 0xe15   :  { %v7411_v11 = vand.u32 4294901760, %v7410_v18 }
 0xe17   :  { %v7412_v27 = vsub.f32 %v7410_v18, %v7411_v11 }
 0xe19   :  { %v13501_v6 = vpop.eup %13500  ;;  %v7413_v33 = vand.u32 4294901760, %v7412_v27 }
 0xe1a   :  { %v15147_v44 = vmul.f32 %v13501_v6, %v13499_v60 }
 0xe1c   :  { %v6846_v55 = vsel %vm2225_vm2, %v15147_v44, 0 }
 0xe1d   :  { %v6914_v14 = vand.u32 4294901760, %v6846_v55 }
 0xe1f   :  { %v6915_v25 = vsub.f32 %v6846_v55, %v6914_v14  ;;  %13108 = vmatmul.mubr.f32.vlgmr.msra.gmra.mxu1 %v6914_v14 }
 0xe20   :  { %13116 = vmatpush3.msra.mxu1 %v6879_v7  ;;  %13117 = vmatprep.mubr.msk.f32.mxu1 %vm13690_vm0, %v17046_v34 }
 0xe21   :  { %13125 = vmatprep.subr.mxu1 %v17046_v34  ;;  %v6916_v58 = vand.u32 4294901760, %v6915_v25 }
 0xe23   :  { %13118 = vmatmul.mubr.f32.vlgmr.msra.gmra.mxu1 %v6916_v58  ;;  %v6917_v47 = vsub.f32 %v6915_v25, %v6916_v58 }
 0xe24   :  { %13126 = vmatpush3.msra.mxu1 %v6879_v7  ;;  %13127 = vmatprep.mubr.msk.f32.mxu1 %vm13690_vm0, %v17046_v34 }
 0xe25   :  { %13135 = vmatprep.subr.mxu1 %v17046_v34  ;;  %v6918_v21 = vand.u32 4294901760, %v6917_v47 }
 0xe27   :  { %13103 = vmatmul.mubr.f32.vlgmr.msra.gmra.mxu0 %v6918_v21  ;;  %13128 = vmatmul.mubr.f32.vlgmr.msra.gmra.mxu1 %v6914_v14 }
 0xe28   :  { %13111 = vmatpush3.msra.mxu0 %v6956_v45  ;;  %13136 = vmatpush3.xpose.msra.mxu1 %v7413_v33 }
 0xe29   :  { %13112 = vmatprep.mubr.msk.f32.mxu0 %vm13690_vm0, %v17046_v34  ;;  %13120 = vmatprep.subr.mxu0 %v17046_v34 }
 0xe2a   :  { %13137 = vmatprep.mubr.msk.f32.mxu1 %vm13690_vm0, %v17046_v34  ;;  %13145 = vmatprep.subr.mxu1 %v17046_v34 }
 0xe2b   :  { %13113 = vmatmul.mubr.f32.vlgmr.msra.gmra.mxu0 %v6915_v25  ;;  %13138 = vmatmul.mubr.f32.vlgmr.msra.gmra.mxu1 %v7368_v29 }
 0xe2c   :  { %13121 = vmatpush3.msra.mxu0 %v6957_v24  ;;  %13146 = vmatpush3.xpose.msra.mxu1 %v7333_v10 }
 0xe2d   :  { %13122 = vmatprep.mubr.msk.f32.mxu0 %vm13690_vm0, %v17046_v34  ;;  %13130 = vmatprep.subr.mxu0 %v17046_v34 }
 0xe2e   :  { %13147 = vmatprep.mubr.msk.f32.mxu1 %vm13690_vm0, %v17046_v34  ;;  %13155 = vmatprep.subr.mxu1 %v17046_v34 }
 0xe2f   :  { %13123 = vmatmul.mubr.f32.vlgmr.msra.gmra.mxu0 %v6914_v14  ;;  %13148 = vmatmul.mubr.f32.vlgmr.msra.gmra.mxu1 %v7370_v57 }
 0xe30   :  { %13131 = vmatpush3.xpose.msra.mxu0 %v7333_v10  ;;  %13156 = vmatpush3.xpose.msra.mxu1 %v7333_v10 }
 0xe31   :  { %13132 = vmatprep.mubr.msk.f32.mxu0 %vm13690_vm0, %v17046_v34  ;;  %13140 = vmatprep.subr.mxu0 %v17046_v34 }
 0xe32   :  { %13157 = vmatprep.mubr.msk.f32.mxu1 %vm13690_vm0, %v17046_v34  ;;  %13165 = vmatprep.subr.mxu1 %v17046_v34 }
 0xe33   :  { %13133 = vmatmul.mubr.f32.vlgmr.msra.gmra.mxu0 %v7372_v54  ;;  %13158 = vmatmul.mubr.f32.vlgmr.msra.gmra.mxu1 %v7368_v29 }
 0xe34   :  { %13141 = vmatpush3.xpose.msra.mxu0 %v7410_v18  ;;  %13142 = vmatprep.mubr.msk.f32.mxu0 %vm13690_vm0, %v17046_v34 }
 0xe35   :  { %13150 = vmatprep.subr.mxu0 %v17046_v34  ;;  %13167 = vmatprep.mubr.msk.f32.mxu1 %vm13690_vm0, %v17046_v34 }
 0xe37   :  { %13143 = vmatmul.mubr.f32.vlgmr.msra.gmra.mxu0 %v7369_v31 }
 0xe38   :  { %13151 = vmatpush3.xpose.msra.mxu0 %v7411_v11  ;;  %13152 = vmatprep.mubr.msk.f32.mxu0 %vm13690_vm0, %v17046_v34 }
 0xe39   :  { %13160 = vmatprep.subr.mxu0 %v17046_v34 }
 0xe3b   :  { %13153 = vmatmul.mubr.f32.vlgmr.msra.gmra.mxu0 %v7368_v29 }
 0xe3c   :  { %13162 = vmatprep.mubr.msk.f32.mxu0 %vm13690_vm0, %v17046_v34 }
 0xedf   :  { %v6996_v5 = vpop.f32.mrf.mxu1 }
 0xee1   :  { %v13109_v9 = vpop.f32.mrf.mxu1 }
 0xee3   :  { %v7144_v19 = vpop.f32.mrf.mxu1 }
 0xee5   :  { %v13119_v13 = vpop.f32.mrf.mxu1 }
 0xee7   :  { %v6920_v43 = vpop.f32.mrf.mxu0  ;;  %v7290_v35 = vpop.f32.mrf.mxu1 }
 0xee8   :  { %v6997_v59 = vadd.f32 %v6996_v5, %v6920_v43 }
 0xee9   :  { %v13104_v50 = vpop.f32.mrf.mxu0  ;;  %v13129_v36 = vpop.f32.mrf.mxu1 }
 0xeeb   :  { %v7070_v8 = vpop.f32.mrf.mxu0  ;;  %v7450_v48 = vpop.f32.mrf.mxu1 }
 0xeec   :  { %v7071_v22 = vadd.f32 %v7070_v8, %v6997_v59 }
 0xeed   :  { %v13114_v52 = vpop.f32.mrf.mxu0  ;;  %v13139_v41 = vpop.f32.mrf.mxu1 }
 0xeee   :  { %v7145_v46 = vadd.f32 %v7144_v19, %v7071_v22  ;;  %v6840_v19 = vadd.f32 %v15147_v44, %v15090_v28 }
 0xeef   :  { %v7218_v4 = vpop.f32.mrf.mxu0  ;;  %v7598_v12 = vpop.f32.mrf.mxu1 }
 0xef0   :  { %v7219_v42 = vadd.f32 %v7218_v4, %v7145_v46 }
 0xef1   :  { %v13124_v63 = vpop.f32.mrf.mxu0  ;;  %v13149_v0 = vpop.f32.mrf.mxu1 }
 0xef2   :  { %v15186_v15 = vadd.f32 %v7290_v35, %v7219_v42 }
 0xef3   :  { %v7374_v7 = vpop.f32.mrf.mxu0  ;;  %v7744_v45 = vpop.f32.mrf.mxu1 }
 0xef4   :  { %v7451_v56 = vadd.f32 %v7450_v48, %v7374_v7 }
 0xef5   :  { %v13134_v24 = vpop.f32.mrf.mxu0  ;;  %v13159_v30 = vpop.f32.mrf.mxu1 }
 0xef7   :  { %v7524_v60 = vpop.f32.mrf.mxu0 }
 0xef8   :  { %v7525_v53 = vadd.f32 %v7524_v60, %v7451_v56 }
 0xef9   :  { %v13144_v2 = vpop.f32.mrf.mxu0 }
 0xefa   :  { %v7599_v1 = vadd.f32 %v7598_v12, %v7525_v53 }
 0xefb   :  { %v7672_v61 = vpop.f32.mrf.mxu0 }
 0xefc   :  { %v7673_v10 = vadd.f32 %v7672_v61, %v7599_v1 }
 0xefd   :  { %v13154_v6 = vpop.f32.mrf.mxu0 }
 0xefe   :  { %v7745_v18 = vadd.f32 %v7744_v45, %v7673_v10 }
 0xf00   :  { %v7748_v38 = vsel %vm2225_vm2, %v7745_v18, -inf }
 0xf01   :  { %7749 = vmax.xlane.f32.xlu1 %v7748_v38 }
 0xf12   :  { %7760 = vrot.lane.b32.xlu1 %v14817_v3, %s13692_s25 }
 0xf16   :  { %8212 = vrot.lane.b32.xlu1 %v15021_v37, %s13693_s26 }
 0xf8a   :  { %v7750_v55 = vpop.xlane.xlu1 %7749 }
 0xf8b   :  { %v7751_v14 = vsub.f32 %v7745_v18, %v7750_v55 }
 0xf8d   :  { %v7752_v26 = vmul.f32 1.442695, %v7751_v14 }
 0xf8e   :  { %v7761_v11 = vpop.permute.xlu1 %7760 }
 0xf8f   :  { %13502 = vpow2.f32 %v7752_v26  ;;  %v7797_v25 = vand.u32 4294901760, %v7761_v11 }
 0xf91   :  { %v7874_v29 = vsub.f32 %v7761_v11, %v7797_v25  ;;  %13161 = vmatpush3.msra.mxu0 %v7797_v25 }
 0xf92   :  { %13170 = vmatprep.subr.mxu0 %v17046_v34  ;;  %v8213_v13 = vpop.permute.xlu1 %8212 }
 0xf93   :  { %v7875_v58 = vand.u32 4294901760, %v7874_v29 }
 0xf95   :  { %v7876_v27 = vsub.f32 %v7874_v29, %v7875_v58 }
 0xf97   :  { %v7877_v47 = vand.u32 4294901760, %v7876_v27 }
 0xf99   :  { %13166 = vmatpush3.msra.mxu1 %v7877_v47 }
 0xf9a   :  { %13175 = vmatprep.subr.mxu1 %v17046_v34 }
 0xf9c   :  { %v13503_v31 = vpop.eup %13502 }
 0xf9d   :  { %v7754_v21 = vsel %vm2225_vm2, %v13503_v31, 0.0 }
 0xf9e   :  { %7755 = vadd.xlane.f32.xlu0 %v7754_v21 }
 0xfb4   :  { %8214 = vrot.lane.b32.xlu0 %v15016_v32, %s13693_s26  ;;  %v8216_v32 = vsel %vm1772_vm1, %v8213_v13, 0 }
 0xfb5   :  { %v8286_v8 = vand.u32 4294901760, %v8216_v32 }
 0xfb7   :  { %v8287_v22 = vsub.f32 %v8216_v32, %v8286_v8 }
 0xfb9   :  { %v8288_v46 = vand.u32 4294901760, %v8287_v22 }
 0xfbb   :  { %v8289_v4 = vsub.f32 %v8287_v22, %v8288_v46 }
 0xfbd   :  { %v8290_v12 = vand.u32 4294901760, %v8289_v4 }
0x1027   :  { %v7756_v37 = vpop.xlane.xlu0 %7755 }
0x1028   :  { %13504 = vrcp.f32 %v7756_v37 }
0x102b   :  { %v8215_v33 = vpop.permute.xlu0 %8214 }
0x102c   :  { %v8218_v57 = vsel %vm1772_vm1, %v8215_v33, 0 }
0x102d   :  { %v8251_v51 = vand.u32 4294901760, %v8218_v57 }
0x102f   :  { %v8328_v5 = vsub.f32 %v8218_v57, %v8251_v51 }
0x1031   :  { %v8329_v50 = vand.u32 4294901760, %v8328_v5 }
0x1033   :  { %v8330_v28 = vsub.f32 %v8328_v5, %v8329_v50 }
0x1035   :  { %v13505_v54 = vpop.eup %13504  ;;  %v8331_v41 = vand.u32 4294901760, %v8330_v28 }
0x1036   :  { %v7758_v9 = vmul.f32 %v13505_v54, %v13503_v31 }
0x1038   :  { %v7764_v43 = vsel %vm2225_vm2, %v7758_v9, 0  ;;  %v15202_v35 = vadd.f32 %v7758_v9, %v6840_v19 }
0x1039   :  { %v7832_v59 = vand.u32 4294901760, %v7764_v43 }
0x103b   :  { %v7833_v36 = vsub.f32 %v7764_v43, %v7832_v59  ;;  %13168 = vmatmul.mubr.f32.vlgmr.msra.gmra.mxu1 %v7832_v59 }
0x103c   :  { %13176 = vmatpush3.msra.mxu1 %v7797_v25  ;;  %13177 = vmatprep.mubr.msk.f32.mxu1 %vm13690_vm0, %v17046_v34 }
0x103d   :  { %13185 = vmatprep.subr.mxu1 %v17046_v34  ;;  %v7834_v48 = vand.u32 4294901760, %v7833_v36 }
0x103f   :  { %13178 = vmatmul.mubr.f32.vlgmr.msra.gmra.mxu1 %v7834_v48  ;;  %v7835_v44 = vsub.f32 %v7833_v36, %v7834_v48 }
0x1040   :  { %13186 = vmatpush3.msra.mxu1 %v7797_v25  ;;  %13187 = vmatprep.mubr.msk.f32.mxu1 %vm13690_vm0, %v17046_v34 }
0x1041   :  { %13195 = vmatprep.subr.mxu1 %v17046_v34  ;;  %v7836_v52 = vand.u32 4294901760, %v7835_v44 }
0x1043   :  { %13163 = vmatmul.mubr.f32.vlgmr.msra.gmra.mxu0 %v7836_v52  ;;  %13188 = vmatmul.mubr.f32.vlgmr.msra.gmra.mxu1 %v7832_v59 }
0x1044   :  { %13171 = vmatpush3.msra.mxu0 %v7874_v29  ;;  %13196 = vmatpush3.xpose.msra.mxu1 %v8331_v41 }
0x1045   :  { %13172 = vmatprep.mubr.msk.f32.mxu0 %vm13690_vm0, %v17046_v34  ;;  %13180 = vmatprep.subr.mxu0 %v17046_v34 }
0x1046   :  { %13197 = vmatprep.mubr.msk.f32.mxu1 %vm13690_vm0, %v17046_v34  ;;  %13205 = vmatprep.subr.mxu1 %v17046_v34 }
0x1047   :  { %13173 = vmatmul.mubr.f32.vlgmr.msra.gmra.mxu0 %v7833_v36  ;;  %13198 = vmatmul.mubr.f32.vlgmr.msra.gmra.mxu1 %v8286_v8 }
0x1048   :  { %13181 = vmatpush3.msra.mxu0 %v7875_v58  ;;  %13206 = vmatpush3.xpose.msra.mxu1 %v8251_v51 }
0x1049   :  { %13182 = vmatprep.mubr.msk.f32.mxu0 %vm13690_vm0, %v17046_v34  ;;  %13190 = vmatprep.subr.mxu0 %v17046_v34 }
0x104a   :  { %13207 = vmatprep.mubr.msk.f32.mxu1 %vm13690_vm0, %v17046_v34  ;;  %13215 = vmatprep.subr.mxu1 %v17046_v34 }
0x104b   :  { %13183 = vmatmul.mubr.f32.vlgmr.msra.gmra.mxu0 %v7832_v59  ;;  %13208 = vmatmul.mubr.f32.vlgmr.msra.gmra.mxu1 %v8288_v46 }
0x104c   :  { %13191 = vmatpush3.xpose.msra.mxu0 %v8251_v51  ;;  %13216 = vmatpush3.xpose.msra.mxu1 %v8251_v51 }
0x104d   :  { %13192 = vmatprep.mubr.msk.f32.mxu0 %vm13690_vm0, %v17046_v34  ;;  %13200 = vmatprep.subr.mxu0 %v17046_v34 }
0x104e   :  { %13217 = vmatprep.mubr.msk.f32.mxu1 %vm13690_vm0, %v17046_v34  ;;  %13225 = vmatprep.subr.mxu1 %v17046_v34 }
0x104f   :  { %13193 = vmatmul.mubr.f32.vlgmr.msra.gmra.mxu0 %v8290_v12  ;;  %13218 = vmatmul.mubr.f32.vlgmr.msra.gmra.mxu1 %v8286_v8 }
0x1050   :  { %13201 = vmatpush3.xpose.msra.mxu0 %v8328_v5  ;;  %13202 = vmatprep.mubr.msk.f32.mxu0 %vm13690_vm0, %v17046_v34 }
0x1051   :  { %13210 = vmatprep.subr.mxu0 %v17046_v34  ;;  %13227 = vmatprep.mubr.msk.f32.mxu1 %vm13690_vm0, %v17046_v34 }
0x1053   :  { %13203 = vmatmul.mubr.f32.vlgmr.msra.gmra.mxu0 %v8287_v22 }
0x1054   :  { %13211 = vmatpush3.xpose.msra.mxu0 %v8329_v50  ;;  %13212 = vmatprep.mubr.msk.f32.mxu0 %vm13690_vm0, %v17046_v34 }
0x1055   :  { %13220 = vmatprep.subr.mxu0 %v17046_v34 }
0x1057   :  { %13213 = vmatmul.mubr.f32.vlgmr.msra.gmra.mxu0 %v8286_v8 }
0x1058   :  { %13222 = vmatprep.mubr.msk.f32.mxu0 %vm13690_vm0, %v17046_v34 }
0x10fb   :  { %v7914_v42 = vpop.f32.mrf.mxu1 }
0x10fd   :  { %v13169_v63 = vpop.f32.mrf.mxu1 }
0x10ff   :  { %v8062_v0 = vpop.f32.mrf.mxu1 }
0x1101   :  { %v13179_v7 = vpop.f32.mrf.mxu1 }
0x1103   :  { %v7838_v45 = vpop.f32.mrf.mxu0  ;;  %v8208_v24 = vpop.f32.mrf.mxu1 }
0x1104   :  { %v7915_v57 = vadd.f32 %v7914_v42, %v7838_v45 }
0x1105   :  { %v13164_v30 = vpop.f32.mrf.mxu0  ;;  %v13189_v56 = vpop.f32.mrf.mxu1 }
0x1107   :  { %v7988_v60 = vpop.f32.mrf.mxu0  ;;  %v8368_v53 = vpop.f32.mrf.mxu1 }
0x1108   :  { %v7989_v51 = vadd.f32 %v7988_v60, %v7915_v57 }
0x1109   :  { %v13174_v2 = vpop.f32.mrf.mxu0  ;;  %v13199_v1 = vpop.f32.mrf.mxu1 }
0x110a   :  { %v8063_v54 = vadd.f32 %v8062_v0, %v7989_v51  ;;  %v9163_v2 = vld [vmem:[#allocation7 + $0x78] sm:$0xff]  ;;  %v9162_v1 = vld [vmem:[#allocation7 + $0x70] sm:$0xff] }
0x110b   :  { %v8136_v61 = vpop.f32.mrf.mxu0  ;;  %v8516_v10 = vpop.f32.mrf.mxu1 }
0x110c   :  { %v8137_v5 = vadd.f32 %v8136_v61, %v8063_v54  ;;  %v9161_v61 = vld [vmem:[#allocation7 + $0x68] sm:$0xff] }
0x110d   :  { %v13184_v6 = vpop.f32.mrf.mxu0  ;;  %v13209_v18 = vpop.f32.mrf.mxu1 }
0x110e   :  { %v8209_v9 = vadd.f32 %v8208_v24, %v8137_v5  ;;  %v15287_v6 = vand.u32 4294901760, %v9162_v1  ;;  %v15289_v18 = vand.u32 4294901760, %v9161_v61 }
0x110f   :  { %v8292_v38 = vpop.f32.mrf.mxu0  ;;  %v8662_v55 = vpop.f32.mrf.mxu1 }
0x1110   :  { %v8369_v11 = vadd.f32 %v8368_v53, %v8292_v38  ;;  %v9160_v38 = vld [vmem:[#allocation7 + $0x60] sm:$0xff] }
0x1111   :  { %v13194_v14 = vpop.f32.mrf.mxu0  ;;  %v13219_v26 = vpop.f32.mrf.mxu1 }
0x1112   :  { %v9158_v14 = vld [vmem:[#allocation7 + $0x50] sm:$0xff]  ;;  %v15291_v26 = vand.u32 4294901760, %v9160_v38 }
0x1113   :  { %v8442_v25 = vpop.f32.mrf.mxu0 }
0x1114   :  { %v8443_v29 = vadd.f32 %v8442_v25, %v8369_v11  ;;  %v15295_v25 = vand.u32 4294901760, %v9158_v14 }
0x1115   :  { %v13204_v58 = vpop.f32.mrf.mxu0 }
0x1116   :  { %v8517_v27 = vadd.f32 %v8516_v10, %v8443_v29  ;;  %v15285_v10 = vand.u32 4294901760, %v9163_v2  ;;  %v9157_v29 = vld [vmem:[#allocation7 + $0x48] sm:$0xff]  ;;  %v9156_v58 = vld [vmem:[#allocation7 + $0x40] sm:$0xff]  ;;  %v15317_v57 = vsub.f32 %v9158_v14, %v15295_v25 }
0x1117   :  { %v8590_v47 = vpop.f32.mrf.mxu0  ;;  %v15319_v51 = vand.u32 4294901760, %v9156_v58 }
0x1118   :  { %v8591_v31 = vadd.f32 %v8590_v47, %v8517_v27  ;;  %v15298_v27 = vsub.f32 %v9163_v2, %v15285_v10  ;;  %v15301_v47 = vsub.f32 %v9162_v1, %v15287_v6 }
0x1119   :  { %v13214_v21 = vpop.f32.mrf.mxu0 }
0x111a   :  { %v8663_v37 = vadd.f32 %v8662_v55, %v8591_v31  ;;  %v9159_v55 = vld [vmem:[#allocation7 + $0x58] sm:$0xff]  ;;  %v15304_v31 = vsub.f32 %v9161_v61, %v15289_v18  ;;  %v15307_v21 = vand.u32 4294901760, %v9157_v29  ;;  %v15322_v54 = vand.u32 4294901760, %v15298_v27 }
0x111b   :  { %v15293_v11 = vand.u32 4294901760, %v9159_v55  ;;  %v15325_v5 = vand.u32 4294901760, %v15301_v47 }
0x111c   :  { %v8666_v33 = vsel %vm2225_vm2, %v8663_v37, -inf }
0x111d   :  { %8667 = vmax.xlane.f32.xlu1 %v8666_v33  ;;  %v15313_v33 = vsub.f32 %v9159_v55, %v15293_v11  ;;  %v9149_v55 = vld [vmem:[#allocation7 + $0x8] sm:$0xff] }
0x112e   :  { %8678 = vrot.lane.b32.xlu1 %v14817_v3, %s13693_s26 }
0x1132   :  { %5449 = vrot.lane.b32.xlu1 %v15001_v39, %s13692_s25 }
0x1136   :  { %9134 = vrot.lane.b32.xlu1 %v15186_v15, %s13693_s26 }
0x113a   :  { %5453 = vrot.lane.b32.xlu1 %v15081_v17, %s13691_s2 }
0x113e   :  { %9138 = vrot.lane.b32.xlu1 %v8209_v9, %s13692_s25  ;;  %v15328_v9 = vand.u32 4294901760, %v15304_v31 }
0x11a6   :  { %v8668_v19 = vpop.xlane.xlu1 %8667 }
0x11a7   :  { %v8669_v13 = vsub.f32 %v8663_v37, %v8668_v19  ;;  %v15310_v37 = vsub.f32 %v9160_v38, %v15291_v26 }
0x11a9   :  { %v8670_v43 = vmul.f32 1.442695, %v8669_v13  ;;  %v15332_v19 = vand.u32 4294901760, %v15310_v37  ;;  %v15335_v13 = vand.u32 4294901760, %v15313_v33 }
0x11aa   :  { %v8679_v59 = vpop.permute.xlu1 %8678 }
0x11ab   :  { %13506 = vpow2.f32 %v8670_v43  ;;  %v8715_v3 = vand.u32 4294901760, %v8679_v59  ;;  %v15339_v43 = vsub.f32 %v9157_v29, %v15307_v21 }
0x11ad   :  { %v8792_v32 = vsub.f32 %v8679_v59, %v8715_v3  ;;  %13221 = vmatpush3.msra.mxu0 %v8715_v3  ;;  %v9276_v59 = vsub.f32 %v15298_v27, %v15322_v54 }
0x11ae   :  { %v5450_v39 = vpop.permute.xlu1 %5449  ;;  %13230 = vmatprep.subr.mxu0 %v17046_v34 }
0x11af   :  { %v8793_v50 = vand.u32 4294901760, %v8792_v32 }
0x11b1   :  { %v8794_v15 = vsub.f32 %v8792_v32, %v8793_v50 }
0x11b2   :  { %v9135_v36 = vpop.permute.xlu1 %9134 }
0x11b3   :  { %v8795_v8 = vand.u32 4294901760, %v8794_v15  ;;  %v15252_v17 = vsel %vm1772_vm1, %v15134_v20, %v9135_v36  ;;  %v9155_v15 = vld [vmem:[#allocation7 + $0x38] sm:$0xff]  ;;  %v9154_v36 = vld [vmem:[#allocation7 + $0x30] sm:$0xff] }
0x11b5   :  { %13226 = vmatpush3.msra.mxu1 %v8795_v8  ;;  %v9153_v8 = vld [vmem:[#allocation7 + $0x28] sm:$0xff] }
0x11b6   :  { %13235 = vmatprep.subr.mxu1 %v17046_v34  ;;  %v5454_v46 = vpop.permute.xlu1 %5453 }
0x11b8   :  { %v13507_v48 = vpop.eup %13506 }
0x11b9   :  { %v8672_v28 = vsel %vm2225_vm2, %v13507_v48, 0.0 }
0x11ba   :  { %8673 = vadd.xlane.f32.xlu0 %v8672_v28 }
0x11d0   :  { %5445 = vrot.lane.b32.xlu0 %v14947_v49, %s13693_s26 }
0x1243   :  { %v8674_v44 = vpop.xlane.xlu0 %8673 }
0x1244   :  { %13508 = vrcp.f32 %v8674_v44  ;;  %v9297_v44 = vsub.f32 %v15310_v37, %v15332_v19 }
0x1247   :  { %v5446_v22 = vpop.permute.xlu0 %5445 }
0x1248   :  { %v5456_v52 = vsel %vm1772_vm1, %v14876_v62, %v5446_v22  ;;  %v9304_v22 = vsub.f32 %v15313_v33, %v15335_v13 }
0x1249   :  { %v5458_v20 = vsel %vm5457_vm3, %v5456_v52, %v5450_v39  ;;  %v15349_v39 = vand.u32 4294901760, %v15317_v57  ;;  %v15361_v52 = vand.u32 4294901760, %v15339_v43 }
0x124a   :  { %v5460_v12 = vsel %vm5459_vm4, %v5458_v20, %v5454_v46  ;;  %v9152_v20 = vld [vmem:[#allocation7 + $0x20] sm:$0xff]  ;;  %v15365_v46 = vand.u32 4294901760, %v9155_v15 }
0x124b   :  { %v15264_v0 = vand.u32 4294901760, %v5460_v12 }
0x124d   :  { %v15271_v24 = vsub.f32 %v5460_v12, %v15264_v0  ;;  %v15369_v12 = vand.u32 4294901760, %v9153_v8 }
0x124f   :  { %v16821_v56 = vand.u32 4294901760, %v15271_v24  ;;  %v15394_v1 = vsub.f32 %v9153_v8, %v15369_v12  ;;  %v15420_v8 = vand.u32 4294901760, %v9149_v55 }
0x1251   :  { %v13509_v41 = vpop.eup %13508  ;;  %v9255_v60 = vsub.f32 %v15271_v24, %v16821_v56 }
0x1252   :  { %v8676_v4 = vmul.f32 %v13509_v41, %v13507_v48  ;;  %v9277_v48 = vand.u32 4294901760, %v9276_v59 }
0x1253   :  { %v9256_v53 = vand.u32 4294901760, %v9255_v60  ;;  %v9150_v60 = vld [vmem:[#allocation7 + $0x10] sm:$0xff] }
0x1254   :  { %v8682_v42 = vsel %vm2225_vm2, %v8676_v4, 0  ;;  %v8677_v63 = vadd.f32 %v8676_v4, %v15202_v35  ;;  %v15367_v4 = vand.u32 4294901760, %v9154_v36  ;;  %v15408_v59 = vand.u32 4294901760, %v9150_v60 }
0x1255   :  { %v8750_v49 = vand.u32 4294901760, %v8682_v42 }
0x1256   :  { %v9130_v7 = vmul.f32 0.25, %v8677_v63 }
0x1257   :  { %v8751_v45 = vsub.f32 %v8682_v42, %v8750_v49  ;;  %13228 = vmatmul.mubr.f32.vlgmr.msra.gmra.mxu1 %v8750_v49  ;;  %v9311_v42 = vsub.f32 %v15317_v57, %v15349_v39 }
0x1258   :  { %13236 = vmatpush3.msra.mxu1 %v8715_v3  ;;  %13237 = vmatprep.mubr.msk.f32.mxu1 %vm13690_vm0, %v17046_v34  ;;  %9132 = vst.msk [vmem:[#allocation12 + $0x8] sm:$0xff] %vm2225_vm2, %v9130_v7  ;;  %v9298_v7 = vand.u32 4294901760, %v9297_v44 }
0x1259   :  { %13245 = vmatprep.subr.mxu1 %v17046_v34  ;;  %v8752_v62 = vand.u32 4294901760, %v8751_v45  ;;  %v9312_v38 = vand.u32 4294901760, %v9311_v42 }
0x125b   :  { %13238 = vmatmul.mubr.f32.vlgmr.msra.gmra.mxu1 %v8752_v62  ;;  %v8753_v35 = vsub.f32 %v8751_v45, %v8752_v62  ;;  %v15382_v62 = vsub.f32 %v9154_v36, %v15367_v4 }
0x125c   :  { %13246 = vmatpush3.msra.mxu1 %v8715_v3  ;;  %13247 = vmatprep.mubr.msk.f32.mxu1 %vm13690_vm0, %v17046_v34  ;;  %v9283_v3 = vsub.f32 %v15301_v47, %v15325_v5 }
0x125d   :  { %v8754_v30 = vand.u32 4294901760, %v8753_v35  ;;  %13285 = vmatprep.subr.mxu1 %v9277_v48  ;;  %v15384_v35 = vand.u32 4294901760, %v9152_v20  ;;  %v15402_v29 = vand.u32 4294901760, %v15382_v62 }
0x125e   :  { %v9284_v28 = vand.u32 4294901760, %v9283_v3 }
0x125f   :  { %13223 = vmatmul.mubr.f32.vlgmr.msra.gmra.mxu0 %v8754_v30  ;;  %13248 = vmatmul.mubr.f32.vlgmr.msra.gmra.mxu1 %v8750_v49  ;;  %v9318_v30 = vsub.f32 %v15339_v43, %v15361_v52 }
0x1260   :  { %13231 = vmatpush3.msra.mxu0 %v8792_v32  ;;  %13317 = vmatprep.mubr.f32.mxu1 %v15264_v0  ;;  %v9290_v32 = vsub.f32 %v15304_v31, %v15328_v9 }
0x1261   :  { %13232 = vmatprep.mubr.msk.f32.mxu0 %vm13690_vm0, %v17046_v34  ;;  %13240 = vmatprep.subr.mxu0 %v17046_v34  ;;  %v9319_v3 = vand.u32 4294901760, %v9318_v30 }
0x1262   :  { %v9291_v41 = vand.u32 4294901760, %v9290_v32  ;;  %13286 = vmatpush3.msra.mxu1 %v9277_v48 }
0x1263   :  { %13233 = vmatmul.mubr.f32.vlgmr.msra.gmra.mxu0 %v8751_v45  ;;  %13287 = vmatprep.subr.mxu1 %v9284_v28  ;;  %v15378_v45 = vsub.f32 %v9155_v15, %v15365_v46  ;;  %v15414_v15 = vand.u32 4294901760, %v15394_v1 }
0x1264   :  { %13241 = vmatpush3.msra.mxu0 %v8793_v50  ;;  %13242 = vmatprep.mubr.msk.f32.mxu0 %vm13690_vm0, %v17046_v34  ;;  %v15353_v50 = vsub.f32 %v9156_v58, %v15319_v51  ;;  %v15406_v58 = vsub.f32 %v9152_v20, %v15384_v35 }
0x1265   :  { %13250 = vmatprep.subr.mxu0 %v15285_v10  ;;  %13288 = vmatpush3.msra.mxu1 %v9284_v28  ;;  %v15390_v2 = vand.u32 4294901760, %v15378_v45  ;;  %17109 = vst [vmem:[#allocation21_spill] sm:$0xff] %v15414_v15  ;;  %v9339_v28 = vsub.f32 %v15382_v62, %v15402_v29 }
0x1266   :  { %v15374_v63 = vand.u32 4294901760, %v15353_v50  ;;  %13289 = vmatprep.subr.mxu1 %v9291_v41  ;;  %v15426_v44 = vand.u32 4294901760, %v15406_v58 }
0x1267   :  { %13243 = vmatmul.mubr.f32.vlgmr.msra.gmra.mxu0 %v8750_v49  ;;  %v9151_v49 = vld [vmem:[#allocation7 + $0x18] sm:$0xff]  ;;  %13290 = vmatpush3.msra.mxu1 %v9291_v41  ;;  %v9332_v32 = vsub.f32 %v15378_v45, %v15390_v2  ;;  %v9346_v41 = vsub.f32 %v15394_v1, %v15414_v15 }
0x1268   :  { %13282 = vmatprep.mubr.f32.mxu0 %v9256_v53  ;;  %13251 = vmatpush3.msra.mxu0 %v15285_v10  ;;  %v9305_v53 = vand.u32 4294901760, %v9304_v22  ;;  %v15396_v61 = vand.u32 4294901760, %v9151_v49  ;;  %v9325_v14 = vsub.f32 %v15353_v50, %v15374_v63  ;;  %17110 = vst [vmem:[#allocation22_spill] sm:$0xff] %v15426_v44  ;;  %v15430_v22 = vsub.f32 %v9150_v60, %v15408_v59 }
0x1269   :  { %13252 = vmatprep.subr.mxu0 %v15287_v6  ;;  %13291 = vmatprep.subr.mxu1 %v9298_v7  ;;  %v9333_v20 = vand.u32 4294901760, %v9332_v32  ;;  %v9353_v30 = vsub.f32 %v15406_v58, %v15426_v44 }
0x126a   :  { %13253 = vmatpush3.msra.mxu0 %v15287_v6  ;;  %13292 = vmatpush3.msra.mxu1 %v9298_v7  ;;  %v15418_v36 = vsub.f32 %v9151_v49, %v15396_v61  ;;  %v9326_v48 = vand.u32 4294901760, %v9325_v14  ;;  %v15440_v49 = vsub.f32 %v9149_v55, %v15420_v8  ;;  %v9340_v7 = vand.u32 4294901760, %v9339_v28 }
0x126b   :  { %13254 = vmatprep.subr.mxu0 %v15289_v18  ;;  %13293 = vmatprep.subr.mxu1 %v9305_v53  ;;  %v15446_v60 = vand.u32 4294901760, %v15430_v22  ;;  %v9354_v14 = vand.u32 4294901760, %v9353_v30 }
0x126c   :  { %13255 = vmatpush3.msra.mxu0 %v15289_v18  ;;  %13294 = vmatpush3.msra.mxu1 %v9305_v53  ;;  %v15436_v42 = vand.u32 4294901760, %v15418_v36  ;;  %v9347_v53 = vand.u32 4294901760, %v9346_v41  ;;  %v15453_v55 = vand.u32 4294901760, %v15440_v49  ;;  %v9148_v41 = vld [vmem:[#allocation7] sm:$0xff] }
0x126d   :  { %13256 = vmatprep.subr.mxu0 %v15291_v26  ;;  %13295 = vmatprep.subr.mxu1 %v9312_v38  ;;  %17112 = vst [vmem:[#allocation26_spill] sm:$0xff] %v15446_v60 }
0x126e   :  { %13257 = vmatpush3.msra.mxu0 %v15291_v26  ;;  %13296 = vmatpush3.msra.mxu1 %v9312_v38  ;;  %17111 = vst [vmem:[#allocation24_spill] sm:$0xff] %v15436_v42  ;;  %v9360_v38 = vsub.f32 %v15418_v36, %v15436_v42  ;;  %17113 = vst [vmem:[#allocation27_spill] sm:$0xff] %v15453_v55 }
0x126f   :  { %13258 = vmatprep.subr.mxu0 %v15293_v11  ;;  %13297 = vmatprep.subr.mxu1 %v9319_v3 }
0x1270   :  { %13259 = vmatpush3.msra.mxu0 %v15293_v11  ;;  %13298 = vmatpush3.msra.mxu1 %v9319_v3  ;;  %v9367_v3 = vsub.f32 %v15430_v22, %v15446_v60  ;;  %v9361_v32 = vand.u32 4294901760, %v9360_v38 }
0x1271   :  { %13260 = vmatprep.subr.mxu0 %v15295_v25  ;;  %13299 = vmatprep.subr.mxu1 %v9326_v48 }
0x1272   :  { %13261 = vmatpush3.msra.mxu0 %v15295_v25  ;;  %13300 = vmatpush3.msra.mxu1 %v9326_v48  ;;  %v9374_v48 = vsub.f32 %v15440_v49, %v15453_v55  ;;  %v9368_v28 = vand.u32 4294901760, %v9367_v3 }
0x1273   :  { %13262 = vmatprep.subr.mxu0 %v15307_v21  ;;  %13301 = vmatprep.subr.mxu1 %v9333_v20 }
0x1274   :  { %13263 = vmatpush3.msra.mxu0 %v15307_v21  ;;  %13302 = vmatpush3.msra.mxu1 %v9333_v20  ;;  %v9375_v20 = vand.u32 4294901760, %v9374_v48 }
0x1275   :  { %13264 = vmatprep.subr.mxu0 %v15319_v51  ;;  %13303 = vmatprep.subr.mxu1 %v9340_v7 }
0x1276   :  { %13265 = vmatpush3.msra.mxu0 %v15319_v51  ;;  %13304 = vmatpush3.msra.mxu1 %v9340_v7  ;;  %v15465_v7 = vand.u32 4294901760, %v9148_v41 }
0x1277   :  { %13266 = vmatprep.subr.mxu0 %v15365_v46  ;;  %13305 = vmatprep.subr.mxu1 %v9347_v53 }
0x1278   :  { %13267 = vmatpush3.msra.mxu0 %v15365_v46  ;;  %13306 = vmatpush3.msra.mxu1 %v9347_v53  ;;  %v15468_v38 = vsub.f32 %v9148_v41, %v15465_v7 }
0x1279   :  { %13268 = vmatprep.subr.mxu0 %v15367_v4  ;;  %13307 = vmatprep.subr.mxu1 %v9354_v14 }
0x127a   :  { %13269 = vmatpush3.msra.mxu0 %v15367_v4  ;;  %13308 = vmatpush3.msra.mxu1 %v9354_v14  ;;  %v15473_v14 = vand.u32 4294901760, %v15468_v38 }
0x127b   :  { %13270 = vmatprep.subr.mxu0 %v15369_v12  ;;  %13309 = vmatprep.subr.mxu1 %v9361_v32 }
0x127c   :  { %13271 = vmatpush3.msra.mxu0 %v15369_v12  ;;  %13310 = vmatpush3.msra.mxu1 %v9361_v32  ;;  %v9381_v32 = vsub.f32 %v15468_v38, %v15473_v14 }
0x127d   :  { %13272 = vmatprep.subr.mxu0 %v15384_v35  ;;  %13311 = vmatprep.subr.mxu1 %v9368_v28 }
0x127e   :  { %13273 = vmatpush3.msra.mxu0 %v15384_v35  ;;  %13312 = vmatpush3.msra.mxu1 %v9368_v28  ;;  %v9382_v28 = vand.u32 4294901760, %v9381_v32  ;;  %v9139_v32 = vpop.permute.xlu1 %9138 }
0x127f   :  { %13274 = vmatprep.subr.mxu0 %v15396_v61  ;;  %13313 = vmatprep.subr.mxu1 %v9375_v20 }
0x1280   :  { %13275 = vmatpush3.msra.mxu0 %v15396_v61  ;;  %13314 = vmatpush3.msra.mxu1 %v9375_v20 }
0x1281   :  { %13276 = vmatprep.subr.mxu0 %v15408_v59  ;;  %13315 = vmatprep.subr.mxu1 %v9382_v28 }
0x1282   :  { %13277 = vmatpush3.msra.mxu0 %v15408_v59  ;;  %13316 = vmatpush3.msra.mxu1 %v9382_v28 }
0x1283   :  { %13278 = vmatprep.subr.mxu0 %v15420_v8  ;;  %13355 = vmatprep.subr.mxu1 %v15285_v10 }
0x1284   :  { %13279 = vmatpush3.msra.mxu0 %v15420_v8 }
0x1285   :  { %13280 = vmatprep.subr.mxu0 %v15465_v7 }
0x1286   :  { %13281 = vmatpush3.msra.mxu0 %v15465_v7 }
0x1287   :  { %13320 = vmatprep.subr.mxu0 %v15298_v27 }
0x1317   :  { %v8832_v30 = vpop.f32.mrf.mxu1 }
0x1319   :  { %v13229_v53 = vpop.f32.mrf.mxu1 }
0x131b   :  { %v8980_v3 = vpop.f32.mrf.mxu1 }
0x131d   :  { %v13239_v48 = vpop.f32.mrf.mxu1 }
0x131e   :  { %v9146_v48 = vsel %vm5457_vm3, %v15252_v17, %v9139_v32 }
0x131f   :  { %v8756_v20 = vpop.f32.mrf.mxu0  ;;  %v9126_v16 = vpop.f32.mrf.mxu1 }
0x1320   :  { %v8833_v53 = vadd.f32 %v8832_v30, %v8756_v20 }
0x1321   :  { %v13224_v41 = vpop.f32.mrf.mxu0  ;;  %v13249_v23 = vpop.f32.mrf.mxu1 }
0x1323   :  { %v8906_v56 = vpop.f32.mrf.mxu0 }
0x1324   :  { %v8907_v40 = vadd.f32 %v8906_v56, %v8833_v53  ;;  %v17117_v56 = vld [vmem:[#allocation24_spill] sm:$0xff] }
0x1325   :  { %v13234_v55 = vpop.f32.mrf.mxu0 }
0x1326   :  { %v8981_v34 = vadd.f32 %v8980_v3, %v8907_v40 }
0x1327   :  { %v9054_v60 = vpop.f32.mrf.mxu0 }
0x1328   :  { %v9055_v42 = vadd.f32 %v9054_v60, %v8981_v34  ;;  %v17114_v34 = vand.u32 4294901760, %v15271_v24 }
0x1329   :  { %v13244_v44 = vpop.f32.mrf.mxu0 }
0x132a   :  { %v9127_v15 = vadd.f32 %v9126_v16, %v9055_v42  ;;  %v9925_v44 = vld [vmem:[#allocation8 + $0xd8] sm:$0xff] }
0x132b   :  { %v15638_v42 = vand.u32 4294901760, %v9925_v44 }
0x132c   :  { %9142 = vrot.lane.b32.xlu0 %v9127_v15, %s13691_s2 }
0x139e   :  { %v9143_v41 = vpop.permute.xlu0 %9142 }
0x139f   :  { %v9147_v23 = vsel %vm5459_vm4, %v9146_v48, %v9143_v41 }
0x13a0   :  { %v15483_v30 = vand.u32 4294901760, %v9147_v23 }
0x13a2   :  { %v15486_v28 = vsub.f32 %v9147_v23, %v15483_v30  ;;  %13318 = vmatmul.mubr.f32.vlgmr.msra.gmra.mxu1 %v15483_v30 }
0x13a3   :  { %13356 = vmatpush3.msra.mxu1 %v15285_v10  ;;  %13387 = vmatprep.mubr.f32.mxu1 %v17114_v34 }
0x13a4   :  { %v9264_v40 = vand.u32 4294901760, %v15486_v28  ;;  %13357 = vmatprep.subr.mxu1 %v15287_v6 }
0x13a5   :  { %13358 = vmatpush3.msra.mxu1 %v15287_v6 }
0x13a6   :  { %v9265_v16 = vsub.f32 %v15486_v28, %v9264_v40  ;;  %13359 = vmatprep.subr.mxu1 %v15289_v18 }
0x13a7   :  { %13360 = vmatpush3.msra.mxu1 %v15289_v18 }
0x13a8   :  { %v9266_v17 = vand.u32 4294901760, %v9265_v16  ;;  %13361 = vmatprep.subr.mxu1 %v15291_v26 }
0x13a9   :  { %13362 = vmatpush3.msra.mxu1 %v15291_v26 }
0x13aa   :  { %13363 = vmatprep.subr.mxu1 %v15293_v11  ;;  %13283 = vmatmul.mubr.f32.vlgmr.msra.gmra.mxu0 %v9266_v17 }
0x13ab   :  { %13321 = vmatpush3.msra.mxu0 %v15298_v27  ;;  %13364 = vmatpush3.msra.mxu1 %v15293_v11 }
0x13ac   :  { %13322 = vmatprep.subr.mxu0 %v15301_v47  ;;  %13352 = vmatprep.mubr.f32.mxu0 %v15271_v24  ;;  %v17116_v24 = vld [vmem:[#allocation22_spill] sm:$0xff] }
0x13ad   :  { %13365 = vmatprep.subr.mxu1 %v15295_v25  ;;  %13323 = vmatpush3.msra.mxu0 %v15301_v47 }
0x13ae   :  { %13366 = vmatpush3.msra.mxu1 %v15295_v25  ;;  %13324 = vmatprep.subr.mxu0 %v15304_v31 }
0x13af   :  { %13367 = vmatprep.subr.mxu1 %v15307_v21  ;;  %13325 = vmatpush3.msra.mxu0 %v15304_v31 }
0x13b0   :  { %13368 = vmatpush3.msra.mxu1 %v15307_v21  ;;  %13326 = vmatprep.subr.mxu0 %v15310_v37 }
0x13b1   :  { %13369 = vmatprep.subr.mxu1 %v15319_v51  ;;  %13327 = vmatpush3.msra.mxu0 %v15310_v37 }
0x13b2   :  { %13370 = vmatpush3.msra.mxu1 %v15319_v51  ;;  %13328 = vmatprep.subr.mxu0 %v15313_v33 }
0x13b3   :  { %13371 = vmatprep.subr.mxu1 %v15365_v46  ;;  %13329 = vmatpush3.msra.mxu0 %v15313_v33 }
0x13b4   :  { %13372 = vmatpush3.msra.mxu1 %v15365_v46  ;;  %13330 = vmatprep.subr.mxu0 %v15317_v57 }
0x13b5   :  { %13373 = vmatprep.subr.mxu1 %v15367_v4  ;;  %13331 = vmatpush3.msra.mxu0 %v15317_v57 }
0x13b6   :  { %13374 = vmatpush3.msra.mxu1 %v15367_v4  ;;  %13332 = vmatprep.subr.mxu0 %v15339_v43 }
0x13b7   :  { %13375 = vmatprep.subr.mxu1 %v15369_v12  ;;  %13333 = vmatpush3.msra.mxu0 %v15339_v43 }
0x13b8   :  { %13376 = vmatpush3.msra.mxu1 %v15369_v12  ;;  %13334 = vmatprep.subr.mxu0 %v15353_v50 }
0x13b9   :  { %13377 = vmatprep.subr.mxu1 %v15384_v35  ;;  %13335 = vmatpush3.msra.mxu0 %v15353_v50 }
0x13ba   :  { %13378 = vmatpush3.msra.mxu1 %v15384_v35  ;;  %13336 = vmatprep.subr.mxu0 %v15378_v45 }
0x13bb   :  { %13379 = vmatprep.subr.mxu1 %v15396_v61  ;;  %13337 = vmatpush3.msra.mxu0 %v15378_v45 }
0x13bc   :  { %13380 = vmatpush3.msra.mxu1 %v15396_v61  ;;  %13338 = vmatprep.subr.mxu0 %v15382_v62 }
0x13bd   :  { %13381 = vmatprep.subr.mxu1 %v15408_v59  ;;  %13339 = vmatpush3.msra.mxu0 %v15382_v62  ;;  %v13526_v62 = vld [vmem:[#allocation2 + $0x8] sm:$0xff] }
0x13be   :  { %13382 = vmatpush3.msra.mxu1 %v15408_v59  ;;  %13340 = vmatprep.subr.mxu0 %v15394_v1 }
0x13bf   :  { %13383 = vmatprep.subr.mxu1 %v15420_v8  ;;  %13341 = vmatpush3.msra.mxu0 %v15394_v1 }
0x13c0   :  { %13384 = vmatpush3.msra.mxu1 %v15420_v8  ;;  %13342 = vmatprep.subr.mxu0 %v15406_v58 }
0x13c1   :  { %13385 = vmatprep.subr.mxu1 %v15465_v7  ;;  %13343 = vmatpush3.msra.mxu0 %v15406_v58  ;;  %v9927_v58 = vld [vmem:[#allocation8 + $0xe8] sm:$0xff] }
0x13c2   :  { %13386 = vmatpush3.msra.mxu1 %v15465_v7  ;;  %13344 = vmatprep.subr.mxu0 %v15418_v36 }
0x13c3   :  { %13388 = vmatmul.mubr.f32.vlgmr.msra.gmra.mxu1 %v9264_v40  ;;  %13425 = vmatprep.subr.mxu1 %v15285_v10 }
0x13c4   :  { %13345 = vmatpush3.msra.mxu0 %v15418_v36  ;;  %13426 = vmatpush3.msra.mxu1 %v15285_v10  ;;  %v17118_v10 = vld [vmem:[#allocation26_spill] sm:$0xff]  ;;  %v15634_v36 = vand.u32 4294901760, %v9927_v58 }
0x13c5   :  { %13457 = vmatprep.mubr.f32.mxu1 %v15264_v0  ;;  %13346 = vmatprep.subr.mxu0 %v15430_v22 }
0x13c6   :  { %13427 = vmatprep.subr.mxu1 %v15287_v6  ;;  %13347 = vmatpush3.msra.mxu0 %v15430_v22  ;;  %v15647_v55 = vsub.f32 %v9927_v58, %v15634_v36 }
0x13c7   :  { %13428 = vmatpush3.msra.mxu1 %v15287_v6  ;;  %13348 = vmatprep.subr.mxu0 %v15440_v49  ;;  %v17119_v6 = vmov 0.0  }
0x13c8   :  { %13429 = vmatprep.subr.mxu1 %v15289_v18  ;;  %13349 = vmatpush3.msra.mxu0 %v15440_v49  ;;  %v16849_v20 = vand.u32 4294901760, %v15647_v55 }
0x13c9   :  { %13430 = vmatpush3.msra.mxu1 %v15289_v18  ;;  %13350 = vmatprep.subr.mxu0 %v15468_v38  ;;  %v17120_v18 = vld [vmem:[#allocation27_spill] sm:$0xff] }
0x13ca   :  { %13431 = vmatprep.subr.mxu1 %v15291_v26  ;;  %13351 = vmatpush3.msra.mxu0 %v15468_v38  ;;  %v15654_v38 = vsub.f32 %v9925_v44, %v15638_v42  ;;  %v10076_v23 = vsub.f32 %v15647_v55, %v16849_v20 }
0x13cb   :  { %13432 = vmatpush3.msra.mxu1 %v15291_v26  ;;  %13353 = vmatmul.mubr.f32.vlgmr.msra.gmra.mxu0 %v15486_v28 }
0x13cc   :  { %13390 = vmatprep.subr.mxu0 %v15322_v54  ;;  %13433 = vmatprep.subr.mxu1 %v15293_v11  ;;  %v16846_v32 = vand.u32 4294901760, %v15654_v38  ;;  %v10077_v16 = vand.u32 4294901760, %v10076_v23 }
0x13cd   :  { %13391 = vmatpush3.msra.mxu0 %v15322_v54  ;;  %13422 = vmatprep.mubr.f32.mxu0 %v15264_v0  ;;  %v17115_v0 = vld [vmem:[#allocation21_spill] sm:$0xff] }
0x13ce   :  { %13434 = vmatpush3.msra.mxu1 %v15293_v11  ;;  %13392 = vmatprep.subr.mxu0 %v15325_v5  ;;  %v11918_v11 = vld [vmem:[%s16739_s4] ss:$0 sm:$0xff]  ;;  %v10088_v28 = vsub.f32 %v15654_v38, %v16846_v32 }
0x13cf   :  { %13435 = vmatprep.subr.mxu1 %v15295_v25  ;;  %13393 = vmatpush3.msra.mxu0 %v15325_v5 }
0x13d0   :  { %13436 = vmatpush3.msra.mxu1 %v15295_v25  ;;  %13394 = vmatprep.subr.mxu0 %v15328_v9 }
0x13d1   :  { %13437 = vmatprep.subr.mxu1 %v15307_v21  ;;  %13395 = vmatpush3.msra.mxu0 %v15328_v9 }
0x13d2   :  { %13438 = vmatpush3.msra.mxu1 %v15307_v21  ;;  %13396 = vmatprep.subr.mxu0 %v15332_v19 }
0x13d3   :  { %13439 = vmatprep.subr.mxu1 %v15319_v51  ;;  %13397 = vmatpush3.msra.mxu0 %v15332_v19 }
0x13d4   :  { %13440 = vmatpush3.msra.mxu1 %v15319_v51  ;;  %13398 = vmatprep.subr.mxu0 %v15335_v13 }
0x13d5   :  { %13441 = vmatprep.subr.mxu1 %v15365_v46  ;;  %13399 = vmatpush3.msra.mxu0 %v15335_v13 }
0x13d6   :  { %13442 = vmatpush3.msra.mxu1 %v15365_v46  ;;  %13400 = vmatprep.subr.mxu0 %v15349_v39 }
0x13d7   :  { %13443 = vmatprep.subr.mxu1 %v15367_v4  ;;  %13401 = vmatpush3.msra.mxu0 %v15349_v39 }
0x13d8   :  { %13444 = vmatpush3.msra.mxu1 %v15367_v4  ;;  %13402 = vmatprep.subr.mxu0 %v15361_v52 }
0x13d9   :  { %13445 = vmatprep.subr.mxu1 %v15369_v12  ;;  %13403 = vmatpush3.msra.mxu0 %v15361_v52 }
0x13da   :  { %13446 = vmatpush3.msra.mxu1 %v15369_v12  ;;  %13404 = vmatprep.subr.mxu0 %v15374_v63 }
0x13db   :  { %13447 = vmatprep.subr.mxu1 %v15384_v35  ;;  %13405 = vmatpush3.msra.mxu0 %v15374_v63 }
0x13dc   :  { %13448 = vmatpush3.msra.mxu1 %v15384_v35  ;;  %13406 = vmatprep.subr.mxu0 %v15390_v2 }
0x13dd   :  { %13449 = vmatprep.subr.mxu1 %v15396_v61  ;;  %13407 = vmatpush3.msra.mxu0 %v15390_v2  ;;  %v13527_v2 = vld [vmem:[#allocation2] sm:$0xff] }
0x13de   :  { %13450 = vmatpush3.msra.mxu1 %v15396_v61  ;;  %13408 = vmatprep.subr.mxu0 %v15402_v29  ;;  %v9929_v61 = vld [vmem:[#allocation8 + $0xf8] sm:$0xff] }
0x13df   :  { %13451 = vmatprep.subr.mxu1 %v15408_v59  ;;  %13409 = vmatpush3.msra.mxu0 %v15402_v29  ;;  %v9928_v29 = vld [vmem:[#allocation8 + $0xf0] sm:$0xff] }
0x13e0   :  { %13452 = vmatpush3.msra.mxu1 %v15408_v59  ;;  %13410 = vmatprep.subr.mxu0 %v17115_v0  ;;  %v15630_v59 = vand.u32 4294901760, %v9929_v61  ;;  %v15632_v15 = vand.u32 4294901760, %v9928_v29 }
0x13e1   :  { %13453 = vmatprep.subr.mxu1 %v15420_v8  ;;  %13411 = vmatpush3.msra.mxu0 %v17115_v0  ;;  %v10089_v0 = vand.u32 4294901760, %v10088_v28 }
0x13e2   :  { %13454 = vmatpush3.msra.mxu1 %v15420_v8  ;;  %13412 = vmatprep.subr.mxu0 %v17116_v24  ;;  %v9926_v8 = vld [vmem:[#allocation8 + $0xe0] sm:$0xff]  ;;  %v15641_v49 = vsub.f32 %v9929_v61, %v15630_v59  ;;  %v15644_v60 = vsub.f32 %v9928_v29, %v15632_v15 }
0x13e3   :  { %13455 = vmatprep.subr.mxu1 %v15465_v7  ;;  %13413 = vmatpush3.msra.mxu0 %v17116_v24  ;;  %v15636_v22 = vand.u32 4294901760, %v9926_v8 }
0x13e4   :  { %13456 = vmatpush3.msra.mxu1 %v15465_v7  ;;  %13414 = vmatprep.subr.mxu0 %v17117_v56  ;;  %17121 = vst [vmem:[#allocation28_spill] sm:$0xff] %v15641_v49  ;;  %v16850_v3 = vand.u32 4294901760, %v15644_v60 }
0x13e5   :  { %13458 = vmatmul.mubr.f32.vlgmr.msra.gmra.mxu1 %v15483_v30  ;;  %13415 = vmatpush3.msra.mxu0 %v17117_v56  ;;  %v15651_v7 = vsub.f32 %v9926_v8, %v15636_v22  ;;  %v9916_v8 = vld [vmem:[#allocation8 + $0x90] sm:$0xff] }
0x13e6   :  { %13416 = vmatprep.subr.mxu0 %v17118_v10  ;;  %10285 = vmatprep.mubr.f32.mxu1 %v17119_v6  ;;  %v10070_v41 = vsub.f32 %v15644_v60, %v16850_v3 }
0x13e7   :  { %13417 = vmatpush3.msra.mxu0 %v17118_v10  ;;  %v16847_v53 = vand.u32 4294901760, %v15651_v7 }
0x13e8   :  { %13418 = vmatprep.subr.mxu0 %v17120_v18  ;;  %v10071_v40 = vand.u32 4294901760, %v10070_v41 }
0x13e9   :  { %13419 = vmatpush3.msra.mxu0 %v17120_v18 }
0x13ea   :  { %13420 = vmatprep.subr.mxu0 %v15473_v14 }
0x13eb   :  { %13421 = vmatpush3.msra.mxu0 %v15473_v14  ;;  %v16852_v14 = vand.u32 4294901760, %v15641_v49 }
0x13ec   :  { %13423 = vmatmul.mubr.f32.vlgmr.msra.gmra.mxu0 %v15483_v30  ;;  %9943 = vmatprep.subr.mxu0 %v15630_v59  ;;  %v10082_v30 = vsub.f32 %v15651_v7, %v16847_v53  ;;  %v9905_v53 = vld [vmem:[#allocation8 + $0x38] sm:$0xff] }
0x13ed   :  { %10038 = vmatprep.mubr.f32.mxu0 %v17119_v6  ;;  %9945 = vmatpush1.msra.mxu0 %v15632_v15  ;;  %v10064_v48 = vsub.f32 %v15641_v49, %v16852_v14 }
0x13ee   :  { %9947 = vmatprep.subr.mxu0 %v15634_v36  ;;  %v10083_v17 = vand.u32 4294901760, %v10082_v30  ;;  %v9915_v30 = vld [vmem:[#allocation8 + $0x88] sm:$0xff] }
0x13ef   :  { %9949 = vmatpush1.msra.mxu0 %v15636_v22  ;;  %v10065_v34 = vand.u32 4294901760, %v10064_v48 }
0x13f0   :  { %9951 = vmatprep.subr.mxu0 %v15638_v42 }
0x13f1   :  { %10066 = vmatprep.subr.mxu1 %v10065_v34 }
0x13f2   :  { %10072 = vmatpush1.msra.mxu1 %v10071_v40 }
0x13f3   :  { %10078 = vmatprep.subr.mxu1 %v10077_v16 }
0x13f4   :  { %10084 = vmatpush1.msra.mxu1 %v10083_v17  ;;  %v9914_v17 = vld [vmem:[#allocation8 + $0x80] sm:$0xff] }
0x13f5   :  { %10090 = vmatprep.subr.mxu1 %v10089_v0 }
0x1462   :  { %v13319_v25 = vpop.f32.mrf.mxu1 }
0x1464   :  { %v9419_v37 = vpop.f32.mrf.mxu1 }
0x146a   :  { %v13284_v26 = vpop.f32.mrf.mxu0 }
0x146b   :  { %v9269_v47 = vadd.f32 %v13284_v26, %v11918_v11 }
0x146c   :  { %v9258_v27 = vpop.f32.mrf.mxu0 }
0x146d   :  { %v9259_v21 = vadd.f32 %v11918_v11, %v9258_v27  ;;  %v9426_v33 = vadd.f32 %v13319_v25, %v9269_v47  ;;  %v9924_v47 = vld [vmem:[#allocation8 + $0xd0] sm:$0xff] }
0x146f   :  { %v9420_v5 = vadd.f32 %v9419_v37, %v9259_v21  ;;  %v9923_v21 = vld [vmem:[#allocation8 + $0xc8] sm:$0xff] }
0x1470   :  { %v15690_v37 = vand.u32 4294901760, %v9923_v21 }
0x1483   :  { %v13389_v57 = vpop.f32.mrf.mxu1 }
0x1485   :  { %v9625_v19 = vpop.f32.mrf.mxu1 }
0x148b   :  { %v13354_v31 = vpop.f32.mrf.mxu0 }
0x148c   :  { %v9537_v54 = vadd.f32 %v13354_v31, %v9426_v33  ;;  %v15688_v31 = vand.u32 4294901760, %v9924_v47  ;;  %v9922_v33 = vld [vmem:[#allocation8 + $0xc0] sm:$0xff] }
0x148d   :  { %v9529_v51 = vpop.f32.mrf.mxu0 }
0x148e   :  { %v9530_v9 = vadd.f32 %v9529_v51, %v9420_v5  ;;  %v9634_v13 = vadd.f32 %v13389_v57, %v9537_v54  ;;  %v15693_v57 = vsub.f32 %v9924_v47, %v15688_v31  ;;  %v15695_v51 = vand.u32 4294901760, %v9922_v33  ;;  %v9921_v54 = vld [vmem:[#allocation8 + $0xb8] sm:$0xff]  ;;  %9953 = vmatpush1.msra.mxu0 %v15688_v31 }
0x148f   :  { %v15699_v5 = vsub.f32 %v9923_v21, %v15690_v37  ;;  %9955 = vmatprep.subr.mxu0 %v15690_v37  ;;  %v15764_v21 = vand.u32 4294901760, %v9915_v30 }
0x1490   :  { %v9626_v52 = vadd.f32 %v9625_v19, %v9530_v9  ;;  %v15701_v9 = vand.u32 4294901760, %v9921_v54  ;;  %v9920_v19 = vld [vmem:[#allocation8 + $0xb0] sm:$0xff]  ;;  %9957 = vmatpush1.msra.mxu0 %v15695_v51 }
0x1492   :  { %9959 = vmatprep.subr.mxu0 %v15701_v9 }
0x14a5   :  { %v13459_v43 = vpop.f32.mrf.mxu1 }
0x14a7   :  { %v9845_v63 = vpop.f32.mrf.mxu1 }
0x14ac   :  { %v13424_v39 = vpop.f32.mrf.mxu0 }
0x14ad   :  { %v9759_v50 = vadd.f32 %v13424_v39, %v9634_v13  ;;  %v16844_v13 = vand.u32 4294901760, %v15693_v57  ;;  %v15708_v39 = vand.u32 4294901760, %v9920_v19 }
0x14ae   :  { %v9752_v46 = vpop.f32.mrf.mxu0 }
0x14af   :  { %v9852_v4 = vadd.f32 %v13459_v43, %v9759_v50  ;;  %v9753_v12 = vadd.f32 %v9752_v46, %v9626_v52  ;;  %v15706_v43 = vsub.f32 %v9922_v33, %v15695_v51  ;;  %v9919_v50 = vld [vmem:[#allocation8 + $0xa8] sm:$0xff]  ;;  %v16843_v52 = vand.u32 4294901760, %v15699_v5  ;;  %9961 = vmatpush1.msra.mxu0 %v15708_v39  ;;  %v9912_v33 = vld [vmem:[#allocation8 + $0x70] sm:$0xff] }
0x14b0   :  { %v15713_v46 = vsub.f32 %v9921_v54, %v15701_v9 }
0x14b1   :  { %v9846_v45 = vadd.f32 %v9845_v63, %v9753_v12  ;;  %v9856_v35 = vadd.f32 %v13526_v62, %v9852_v4  ;;  %v15715_v4 = vand.u32 4294901760, %v9919_v50  ;;  %v9918_v12 = vld [vmem:[#allocation8 + $0xa0] sm:$0xff]  ;;  %v10094_v63 = vsub.f32 %v15693_v57, %v16844_v13 }
0x14b2   :  { %v15723_v62 = vsub.f32 %v9920_v19, %v15708_v39  ;;  %v16840_v61 = vand.u32 4294901760, %v15713_v46  ;;  %v9906_v13 = vld [vmem:[#allocation8 + $0x40] sm:$0xff] }
0x14b3   :  { %9861 = vadd.xlane.f32.xlu0 %v9856_v35  ;;  %v9855_v1 = vadd.f32 %v13527_v2, %v9846_v45  ;;  %v16842_v45 = vand.u32 4294901760, %v15706_v43  ;;  %v9917_v2 = vld [vmem:[#allocation8 + $0x98] sm:$0xff]  ;;  %v15733_v29 = vsub.f32 %v9919_v50, %v15715_v4  ;;  %9963 = vmatprep.subr.mxu0 %v15715_v4  ;;  %v10095_v44 = vand.u32 4294901760, %v10094_v63  ;;  %v9911_v63 = vld [vmem:[#allocation8 + $0x68] sm:$0xff] }
0x14b4   :  { %v15735_v58 = vand.u32 4294901760, %v9917_v2  ;;  %v16839_v41 = vand.u32 4294901760, %v15723_v62  ;;  %v10112_v34 = vsub.f32 %v15713_v46, %v16840_v61 }
0x14b5   :  { %9859 = vadd.xlane.f32.xlu1 %v9855_v1  ;;  %v10106_v48 = vsub.f32 %v15706_v43, %v16842_v45  ;;  %v16838_v40 = vand.u32 4294901760, %v15733_v29  ;;  %10096 = vmatpush1.msra.mxu1 %v10095_v44  ;;  %v15779_v44 = vsub.f32 %v9915_v30, %v15764_v21 }
0x14b6   :  { %v15751_v16 = vsub.f32 %v9917_v2, %v15735_v58 }
0x14b7   :  { %v10107_v0 = vand.u32 4294901760, %v10106_v48 }
0x14b8   :  { %v16835_v47 = vand.u32 4294901760, %v15751_v16 }
0x153c   :  { %v9862_v24 = vpop.xlane.xlu0 %9861 }
0x153d   :  { %v9865_v56 = vmul.f32 0.0078125, %v9862_v24  ;;  %v10118_v24 = vsub.f32 %v15723_v62, %v16839_v41 }
0x153e   :  { %v9860_v10 = vpop.xlane.xlu1 %9859 }
0x153f   :  { %v15680_v18 = vsub.f32 %v9856_v35, %v9865_v56  ;;  %v9864_v26 = vmul.f32 0.0078125, %v9860_v10  ;;  %v15725_v35 = vand.u32 4294901760, %v9918_v12  ;;  %v15758_v10 = vand.u32 4294901760, %v9916_v8 }
0x1540   :  { %v10119_v54 = vand.u32 4294901760, %v10118_v24  ;;  %v15788_v24 = vand.u32 4294901760, %v9912_v33 }
0x1541   :  { %v15682_v11 = vsub.f32 %v9855_v1, %v9864_v26  ;;  %v9869_v25 = vmul.f32 %v15680_v18, %v15680_v18  ;;  %v10100_v1 = vsub.f32 %v15699_v5, %v16843_v52  ;;  %v15743_v23 = vsub.f32 %v9918_v12, %v15725_v35  ;;  %9965 = vmatpush1.msra.mxu0 %v15725_v35  ;;  %v9913_v26 = vld [vmem:[#allocation8 + $0x78] sm:$0xff] }
0x1542   :  { %9967 = vmatprep.subr.mxu0 %v15735_v58  ;;  %v15770_v50 = vsub.f32 %v9916_v8, %v15758_v10  ;;  %v15772_v12 = vand.u32 4294901760, %v9914_v17  ;;  %v15781_v48 = vand.u32 4294901760, %v9913_v26 }
0x1543   :  { %9872 = vadd.xlane.f32.xlu1 %v9869_v25  ;;  %v9868_v27 = vmul.f32 %v15682_v11, %v15682_v11  ;;  %v10101_v28 = vand.u32 4294901760, %v10100_v1  ;;  %v16836_v56 = vand.u32 4294901760, %v15743_v23  ;;  %v10113_v25 = vand.u32 4294901760, %v10112_v34  ;;  %9969 = vmatpush1.msra.mxu0 %v15758_v10 }
0x1544   :  { %v10136_v1 = vsub.f32 %v15751_v16, %v16835_v47  ;;  %9971 = vmatprep.subr.mxu0 %v15764_v21  ;;  %v16837_v34 = vand.u32 4294901760, %v15770_v50  ;;  %v15793_v47 = vsub.f32 %v9913_v26, %v15781_v48 }
0x1545   :  { %9870 = vadd.xlane.f32.xlu0 %v9868_v27  ;;  %10102 = vmatprep.subr.mxu1 %v10101_v28  ;;  %v10124_v27 = vsub.f32 %v15733_v29, %v16838_v40  ;;  %v10130_v19 = vsub.f32 %v15743_v23, %v16836_v56  ;;  %v9910_v28 = vld [vmem:[#allocation8 + $0x60] sm:$0xff]  ;;  %v15795_v56 = vand.u32 4294901760, %v9911_v63  ;;  %v9908_v40 = vld [vmem:[#allocation8 + $0x50] sm:$0xff] }
0x1546   :  { %10108 = vmatpush1.msra.mxu1 %v10107_v0  ;;  %v15786_v0 = vsub.f32 %v9914_v17, %v15772_v12  ;;  %9973 = vmatpush1.msra.mxu0 %v15772_v12  ;;  %v10137_v30 = vand.u32 4294901760, %v10136_v1  ;;  %17122 = vst [vmem:[#allocation32_spill] sm:$0xff] %v15793_v47  ;;  %v10142_v17 = vsub.f32 %v15770_v50, %v16837_v34  ;;  %v16848_v1 = vand.u32 4294901760, %v15793_v47 }
0x1547   :  { %10114 = vmatprep.subr.mxu1 %v10113_v25  ;;  %v10125_v2 = vand.u32 4294901760, %v10124_v27  ;;  %v10131_v8 = vand.u32 4294901760, %v10130_v19  ;;  %v9909_v25 = vld [vmem:[#allocation8 + $0x58] sm:$0xff]  ;;  %v16841_v27 = vand.u32 4294901760, %v15779_v44  ;;  %9975 = vmatprep.subr.mxu0 %v15781_v48  ;;  %v15803_v19 = vsub.f32 %v9912_v33, %v15788_v24 }
0x1548   :  { %10120 = vmatpush1.msra.mxu1 %v10119_v54  ;;  %v16845_v54 = vand.u32 4294901760, %v15786_v0  ;;  %9977 = vmatpush1.msra.mxu0 %v15788_v24  ;;  %v15815_v34 = vand.u32 4294901760, %v9909_v25  ;;  %v10143_v33 = vand.u32 4294901760, %v10142_v17  ;;  %v10160_v45 = vsub.f32 %v15793_v47, %v16848_v1 }
0x1549   :  { %10126 = vmatprep.subr.mxu1 %v10125_v2  ;;  %17123 = vst [vmem:[#allocation33_spill] sm:$0xff] %v15803_v19  ;;  %v15805_v2 = vand.u32 4294901760, %v9910_v28  ;;  %v10148_v26 = vsub.f32 %v15779_v44, %v16841_v27  ;;  %9979 = vmatprep.subr.mxu0 %v15795_v56  ;;  %v9907_v27 = vld [vmem:[#allocation8 + $0x48] sm:$0xff]  ;;  %v15838_v32 = vand.u32 4294901760, %v9908_v40 }
0x154a   :  { %10132 = vmatpush1.msra.mxu1 %v10131_v8  ;;  %v15813_v8 = vsub.f32 %v9911_v63, %v15795_v56  ;;  %v10154_v41 = vsub.f32 %v15786_v0, %v16845_v54  ;;  %v15831_v17 = vsub.f32 %v9909_v25, %v15815_v34  ;;  %v10161_v1 = vand.u32 4294901760, %v10160_v45  ;;  %v9903_v45 = vld [vmem:[#allocation8 + $0x28] sm:$0xff] }
0x154b   :  { %10138 = vmatprep.subr.mxu1 %v10137_v30  ;;  %v16851_v30 = vand.u32 4294901760, %v15803_v19  ;;  %v15823_v61 = vsub.f32 %v9910_v28, %v15805_v2  ;;  %9981 = vmatpush1.msra.mxu0 %v15805_v2  ;;  %v10149_v63 = vand.u32 4294901760, %v10148_v26  ;;  %v15844_v3 = vand.u32 4294901760, %v9907_v27 }
0x154c   :  { %17124 = vst [vmem:[#allocation34_spill] sm:$0xff] %v15813_v8  ;;  %v16853_v52 = vand.u32 4294901760, %v15813_v8  ;;  %17126 = vst [vmem:[#allocation38_spill] sm:$0xff] %v15831_v17  ;;  %9983 = vmatprep.subr.mxu0 %v15815_v34  ;;  %10144 = vmatpush1.msra.mxu1 %v10143_v33  ;;  %v10155_v54 = vand.u32 4294901760, %v10154_v41  ;;  %v16861_v20 = vand.u32 4294901760, %v15831_v17  ;;  %v9904_v41 = vld [vmem:[#allocation8 + $0x30] sm:$0xff]  ;;  %v15850_v14 = vsub.f32 %v9908_v40, %v15838_v32 }
0x154d   :  { %17125 = vst [vmem:[#allocation35_spill] sm:$0xff] %v15823_v61  ;;  %v10166_v28 = vsub.f32 %v15803_v19, %v16851_v30  ;;  %v16856_v26 = vand.u32 4294901760, %v15823_v61  ;;  %10150 = vmatprep.subr.mxu1 %v10149_v63  ;;  %v15852_v63 = vand.u32 4294901760, %v9906_v13  ;;  %9985 = vmatpush1.msra.mxu0 %v15838_v32  ;;  %v15875_v47 = vand.u32 4294901760, %v9903_v45 }
0x154e   :  { %v10172_v25 = vsub.f32 %v15813_v8, %v16853_v52  ;;  %10156 = vmatpush1.msra.mxu1 %v10155_v54  ;;  %17127 = vst [vmem:[#allocation23_spill] sm:$0xff] %v15850_v14  ;;  %v10184_v8 = vsub.f32 %v15831_v17, %v16861_v20  ;;  %v15859_v54 = vsub.f32 %v9907_v27, %v15844_v3 }
0x154f   :  { %v10167_v33 = vand.u32 4294901760, %v10166_v28  ;;  %v10178_v30 = vsub.f32 %v15823_v61, %v16856_v26  ;;  %17128 = vst [vmem:[#allocation25_spill] sm:$0xff] %v15852_v63  ;;  %10162 = vmatprep.subr.mxu1 %v10161_v1  ;;  %v15861_v28 = vand.u32 4294901760, %v9905_v53  ;;  %v9902_v26 = vld [vmem:[#allocation8 + $0x20] sm:$0xff]  ;;  %9987 = vmatprep.subr.mxu0 %v15844_v3  ;;  %v16866_v61 = vand.u32 4294901760, %v15850_v14  ;;  %17134 = vst [vmem:[#allocation31_spill] sm:$0xff] %v15875_v47 }
0x1550   :  { %v10173_v52 = vand.u32 4294901760, %v10172_v25  ;;  %17129 = vst [vmem:[#allocation39_spill] sm:$0xff] %v15859_v54  ;;  %v15866_v19 = vsub.f32 %v9906_v13, %v15852_v63  ;;  %v15868_v1 = vand.u32 4294901760, %v9904_v41  ;;  %v9901_v25 = vld [vmem:[#allocation8 + $0x18] sm:$0xff]  ;;  %9989 = vmatpush1.msra.mxu0 %v15852_v63  ;;  %v10185_v27 = vand.u32 4294901760, %v10184_v8  ;;  %v9898_v63 = vld [vmem:[#allocation8] sm:$0xff] }
0x1551   :  { %17130 = vst [vmem:[#allocation29_spill] sm:$0xff] %v15861_v28  ;;  %10168 = vmatpush1.msra.mxu1 %v10167_v33  ;;  %v10179_v40 = vand.u32 4294901760, %v10178_v30  ;;  %v16873_v20 = vand.u32 4294901760, %v15859_v54  ;;  %v15873_v17 = vsub.f32 %v9905_v53, %v15861_v28  ;;  %9991 = vmatprep.subr.mxu0 %v15861_v28  ;;  %v10190_v13 = vsub.f32 %v15850_v14, %v16866_v61  ;;  %v9900_v30 = vld [vmem:[#allocation8 + $0x10] sm:$0xff] }
0x1552   :  { %17131 = vst [vmem:[#allocation30_spill] sm:$0xff] %v15866_v19  ;;  %17132 = vst [vmem:[#allocation40_spill] sm:$0xff] %v15868_v1  ;;  %10174 = vmatprep.subr.mxu1 %v10173_v52  ;;  %v15883_v33 = vsub.f32 %v9904_v41, %v15868_v1  ;;  %v15885_v52 = vand.u32 4294901760, %v9902_v26  ;;  %9993 = vmatpush1.msra.mxu0 %v15868_v1  ;;  %v15895_v61 = vand.u32 4294901760, %v9901_v25  ;;  %v17138_v14 = vand.u32 4294901760, %v15866_v19 }
0x1553   :  { %17133 = vst [vmem:[#allocation36_spill] sm:$0xff] %v15873_v17  ;;  %10180 = vmatpush1.msra.mxu1 %v10179_v40  ;;  %v10196_v53 = vsub.f32 %v15859_v54, %v16873_v20  ;;  %v16882_v8 = vand.u32 4294901760, %v15873_v17  ;;  %v15893_v40 = vsub.f32 %v9903_v45, %v15875_v47  ;;  %9995 = vmatprep.subr.mxu0 %v15875_v47  ;;  %v10191_v41 = vand.u32 4294901760, %v10190_v13  ;;  %v9899_v20 = vld [vmem:[#allocation8 + $0x8] sm:$0xff] }
0x1554   :  { %17135 = vst [vmem:[#allocation41_spill] sm:$0xff] %v15883_v33  ;;  %17136 = vst [vmem:[#allocation19_spill] sm:$0xff] %v15885_v52  ;;  %10186 = vmatprep.subr.mxu1 %v10185_v27  ;;  %v10202_v1 = vsub.f32 %v15866_v19, %v17138_v14  ;;  %v16887_v27 = vand.u32 4294901760, %v15883_v33  ;;  %v15903_v28 = vsub.f32 %v9902_v26, %v15885_v52  ;;  %9997 = vmatpush1.msra.mxu0 %v15885_v52 }
0x1555   :  { %17137 = vst [vmem:[#allocation37_spill] sm:$0xff] %v15895_v61  ;;  %v10197_v45 = vand.u32 4294901760, %v10196_v53  ;;  %v10208_v54 = vsub.f32 %v15873_v17, %v16882_v8  ;;  %v16893_v47 = vand.u32 4294901760, %v15893_v40  ;;  %v15911_v13 = vsub.f32 %v9901_v25, %v15895_v61  ;;  %9999 = vmatprep.subr.mxu0 %v15895_v61  ;;  %10192 = vmatpush1.msra.mxu1 %v10191_v41 }
0x1556   :  { %v10203_v14 = vand.u32 4294901760, %v10202_v1  ;;  %v10214_v26 = vsub.f32 %v15883_v33, %v16887_v27  ;;  %v16890_v53 = vand.u32 4294901760, %v15903_v28  ;;  %v15918_v19 = vand.u32 4294901760, %v9900_v30 }
0x1557   :  { %10198 = vmatprep.subr.mxu1 %v10197_v45  ;;  %v10209_v8 = vand.u32 4294901760, %v10208_v54  ;;  %v10220_v25 = vsub.f32 %v15893_v40, %v16893_v47  ;;  %v16891_v17 = vand.u32 4294901760, %v15911_v13  ;;  %v15924_v52 = vand.u32 4294901760, %v9899_v20 }
0x1558   :  { %10204 = vmatpush1.msra.mxu1 %v10203_v14  ;;  %v10215_v1 = vand.u32 4294901760, %v10214_v26  ;;  %v10226_v41 = vsub.f32 %v15903_v28, %v16890_v53  ;;  %v15930_v27 = vsub.f32 %v9900_v30, %v15918_v19  ;;  %v15932_v33 = vand.u32 4294901760, %v9898_v63  ;;  %10001 = vmatpush1.msra.mxu0 %v15918_v19 }
0x1559   :  { %10210 = vmatprep.subr.mxu1 %v10209_v8  ;;  %v10221_v54 = vand.u32 4294901760, %v10220_v25  ;;  %v10232_v45 = vsub.f32 %v15911_v13, %v16891_v17  ;;  %v15939_v14 = vsub.f32 %v9899_v20, %v15924_v52  ;;  %10003 = vmatprep.subr.mxu0 %v15924_v52 }
0x155a   :  { %17139 = vst [vmem:[#allocation21_spill] sm:$0xff] %v15930_v27  ;;  %10216 = vmatpush1.msra.mxu1 %v10215_v1  ;;  %v10227_v26 = vand.u32 4294901760, %v10226_v41  ;;  %v16892_v30 = vand.u32 4294901760, %v15930_v27  ;;  %v15944_v53 = vsub.f32 %v9898_v63, %v15932_v33  ;;  %10005 = vmatpush1.msra.mxu0 %v15932_v33 }
0x155b   :  { %10222 = vmatprep.subr.mxu1 %v10221_v54  ;;  %v10233_v8 = vand.u32 4294901760, %v10232_v45  ;;  %v16898_v25 = vand.u32 4294901760, %v15939_v14  ;;  %10302 = vmatprep.subr.mxu0 %v15641_v49 }
0x155c   :  { %10228 = vmatpush1.msra.mxu1 %v10227_v26  ;;  %v10238_v20 = vsub.f32 %v15930_v27, %v16892_v30  ;;  %v16897_v1 = vand.u32 4294901760, %v15944_v53 }
0x155d   :  { %10234 = vmatprep.subr.mxu1 %v10233_v8  ;;  %v10244_v63 = vsub.f32 %v15939_v14, %v16898_v25  ;;  %v17151_v25 = vld [vmem:[#allocation35_spill] sm:$0xff] }
0x155e   :  { %v10239_v41 = vand.u32 4294901760, %v10238_v20  ;;  %v10250_v54 = vsub.f32 %v15944_v53, %v16897_v1  ;;  %v11919_v1 = vld [vmem:[%s16740_s5] ss:$0 sm:$0xff] }
0x155f   :  { %v10245_v45 = vand.u32 4294901760, %v10244_v63 }
0x1560   :  { %10240 = vmatpush1.msra.mxu1 %v10239_v41  ;;  %v10251_v17 = vand.u32 4294901760, %v10250_v54 }
0x1561   :  { %10246 = vmatprep.subr.mxu1 %v10245_v45 }
0x1562   :  { %10252 = vmatpush1.msra.mxu1 %v10251_v17  ;;  %v11920_v17 = vld [vmem:[%s16741_s6] ss:$0 sm:$0xff] }
0x1563   :  { %10446 = vmatprep.subr.mxu1 %v15630_v59 }
0x15cc   :  { %v9873_v26 = vpop.xlane.xlu1 %9872 }
0x15cd   :  { %v9875_v30 = vmul.f32 0.0078125, %v9873_v26 }
0x15ce   :  { %v9871_v47 = vpop.xlane.xlu0 %9870 }
0x15cf   :  { %v9877_v8 = vadd.f32 1e-05, %v9875_v30  ;;  %v9874_v49 = vmul.f32 0.0078125, %v9871_v47 }
0x15d1   :  { %13510 = vrsqrt.f32 %v9877_v8  ;;  %v9876_v27 = vadd.f32 1e-05, %v9874_v49 }
0x15d3   :  { %13512 = vrsqrt.f32 %v9876_v27 }
0x15de   :  { %v13511_v20 = vpop.eup %13510 }
0x15df   :  { %v9881_v63 = vmul.f32 %v13511_v20, %v15680_v18 }
0x15e0   :  { %v13513_v41 = vpop.eup %13512 }
0x15e1   :  { %v9880_v54 = vmul.f32 %v13513_v41, %v15682_v11  ;;  %v9889_v45 = vmul.f32 %v11919_v1, %v9881_v63 }
0x15e3   :  { %v9888_v30 = vmul.f32 %v11919_v1, %v9880_v54  ;;  %v15968_v47 = vadd.f32 %v11920_v17, %v9889_v45  ;;  %v17144_v54 = vld [vmem:[#allocation25_spill] sm:$0xff]  ;;  %v17145_v45 = vld [vmem:[#allocation32_spill] sm:$0xff] }
0x15e5   :  { %17140 = vst [vmem:[#allocation22_spill] sm:$0xff] %v15968_v47  ;;  %v15970_v49 = vadd.f32 %v11920_v17, %v9888_v30  ;;  %v15973_v27 = vand.u32 4294901760, %v15968_v47  ;;  %v17146_v30 = vld [vmem:[#allocation29_spill] sm:$0xff] }
0x15e7   :  { %17141 = vst [vmem:[#allocation24_spill] sm:$0xff] %v15970_v49  ;;  %17142 = vst [vmem:[#allocation26_spill] sm:$0xff] %v15973_v27  ;;  %v15976_v26 = vand.u32 4294901760, %v15970_v49  ;;  %v15980_v18 = vsub.f32 %v15968_v47, %v15973_v27  ;;  %v17154_v47 = vld [vmem:[#allocation23_spill] sm:$0xff] }
0x15e9   :  { %17143 = vst [vmem:[#allocation27_spill] sm:$0xff] %v15976_v26  ;;  %10287 = vmatmul.mubr.f32.vlgmr.msra.gmra.mxu1 %v15976_v26  ;;  %v15985_v11 = vsub.f32 %v15970_v49, %v15976_v26  ;;  %v16899_v8 = vand.u32 4294901760, %v15980_v18  ;;  %v17155_v49 = vld [vmem:[#allocation39_spill] sm:$0xff]  ;;  %v17157_v26 = vld [vmem:[#allocation36_spill] sm:$0xff] }
0x15ea   :  { %10448 = vmatpush1.msra.mxu1 %v15632_v15  ;;  %10292 = vmatprep.mubr.f32.mxu1 %v17119_v6 }
0x15eb   :  { %10450 = vmatprep.subr.mxu1 %v15634_v36  ;;  %v16900_v1 = vand.u32 4294901760, %v15985_v11  ;;  %v10053_v41 = vsub.f32 %v15980_v18, %v16899_v8  ;;  %v17152_v8 = vld [vmem:[#allocation19_spill] sm:$0xff] }
0x15ec   :  { %10452 = vmatpush1.msra.mxu1 %v15636_v22 }
0x15ed   :  { %10454 = vmatprep.subr.mxu1 %v15638_v42  ;;  %10294 = vmatmul.mubr.f32.gmra.mxu1 %v15973_v27  ;;  %v10042_v20 = vsub.f32 %v15985_v11, %v16900_v1  ;;  %v10054_v17 = vand.u32 4294901760, %v10053_v41  ;;  %v17149_v41 = vld [vmem:[#allocation34_spill] sm:$0xff] }
0x15ee   :  { %10456 = vmatpush1.msra.mxu1 %v15688_v31  ;;  %10541 = vmatprep.mubr.f32.mxu1 %v17119_v6  ;;  %v17153_v1 = vld [vmem:[#allocation38_spill] sm:$0xff] }
0x15ef   :  { %10458 = vmatprep.subr.mxu1 %v15690_v37  ;;  %v10043_v63 = vand.u32 4294901760, %v10042_v20  ;;  %v17147_v20 = vld [vmem:[#allocation33_spill] sm:$0xff]  ;;  %v17156_v27 = vld [vmem:[#allocation30_spill] sm:$0xff] }
0x15f0   :  { %10460 = vmatpush1.msra.mxu1 %v15695_v51 }
0x15f1   :  { %10462 = vmatprep.subr.mxu1 %v15701_v9  ;;  %10044 = vmatmul.mubr.f32.vlgmr.msra.gmra.mxu0 %v10043_v63  ;;  %v17148_v63 = vld [vmem:[#allocation40_spill] sm:$0xff] }
0x15f2   :  { %10305 = vmatpush1.msra.mxu0 %v15644_v60  ;;  %10464 = vmatpush1.msra.mxu1 %v15708_v39 }
0x15f3   :  { %10308 = vmatprep.subr.mxu0 %v15647_v55  ;;  %10466 = vmatprep.subr.mxu1 %v15715_v4 }
0x15f4   :  { %10311 = vmatpush1.msra.mxu0 %v15651_v7  ;;  %10468 = vmatpush1.msra.mxu1 %v15725_v35 }
0x15f5   :  { %10049 = vmatprep.mubr.f32.mxu0 %v17119_v6  ;;  %10314 = vmatprep.subr.mxu0 %v15654_v38 }
0x15f6   :  { %10470 = vmatprep.subr.mxu1 %v15735_v58  ;;  %10055 = vmatmul.mubr.f32.gmra.mxu0 %v10054_v17  ;;  %v17150_v17 = vld [vmem:[#allocation31_spill] sm:$0xff] }
0x15f7   :  { %10317 = vmatpush1.msra.mxu0 %v15693_v57  ;;  %10472 = vmatpush1.msra.mxu1 %v15758_v10 }
0x15f8   :  { %10320 = vmatprep.subr.mxu0 %v15699_v5  ;;  %10474 = vmatprep.subr.mxu1 %v15764_v21 }
0x15f9   :  { %10323 = vmatpush1.msra.mxu0 %v15706_v43  ;;  %10476 = vmatpush1.msra.mxu1 %v15772_v12 }
0x15fa   :  { %10326 = vmatprep.subr.mxu0 %v15713_v46  ;;  %10478 = vmatprep.subr.mxu1 %v15781_v48 }
0x15fb   :  { %10329 = vmatpush1.msra.mxu0 %v15723_v62  ;;  %10480 = vmatpush1.msra.mxu1 %v15788_v24 }
0x15fc   :  { %10332 = vmatprep.subr.mxu0 %v15733_v29  ;;  %10482 = vmatprep.subr.mxu1 %v15795_v56 }
0x15fd   :  { %10335 = vmatpush1.msra.mxu0 %v15743_v23  ;;  %10484 = vmatpush1.msra.mxu1 %v15805_v2 }
0x15fe   :  { %10338 = vmatprep.subr.mxu0 %v15751_v16  ;;  %10486 = vmatprep.subr.mxu1 %v15815_v34 }
0x15ff   :  { %10341 = vmatpush1.msra.mxu0 %v15770_v50  ;;  %10488 = vmatpush1.msra.mxu1 %v15838_v32 }
0x1600   :  { %10344 = vmatprep.subr.mxu0 %v15779_v44  ;;  %10490 = vmatprep.subr.mxu1 %v15844_v3 }
0x1601   :  { %10347 = vmatpush1.msra.mxu0 %v15786_v0  ;;  %10492 = vmatpush1.msra.mxu1 %v17144_v54 }
0x1602   :  { %10350 = vmatprep.subr.mxu0 %v17145_v45  ;;  %10494 = vmatprep.subr.mxu1 %v17146_v30 }
0x1603   :  { %10353 = vmatpush1.msra.mxu0 %v17147_v20  ;;  %10496 = vmatpush1.msra.mxu1 %v17148_v63 }
0x1604   :  { %10356 = vmatprep.subr.mxu0 %v17149_v41  ;;  %10498 = vmatprep.subr.mxu1 %v17150_v17 }
0x1605   :  { %10359 = vmatpush1.msra.mxu0 %v17151_v25  ;;  %10500 = vmatpush1.msra.mxu1 %v17152_v8  ;;  %v17158_v8 = vand.u32 4294901760, %v15985_v11 }
0x1606   :  { %10362 = vmatprep.subr.mxu0 %v17153_v1  ;;  %10502 = vmatprep.subr.mxu1 %v15895_v61  ;;  %v17159_v61 = vld [vmem:[#allocation41_spill] sm:$0xff] }
0x1607   :  { %10365 = vmatpush1.msra.mxu0 %v17154_v47  ;;  %10504 = vmatpush1.msra.mxu1 %v15918_v19 }
0x1608   :  { %10368 = vmatprep.subr.mxu0 %v17155_v49  ;;  %10506 = vmatprep.subr.mxu1 %v15924_v52 }
0x1609   :  { %10371 = vmatpush1.msra.mxu0 %v17156_v27  ;;  %10508 = vmatpush1.msra.mxu1 %v15932_v33 }
0x160a   :  { %10374 = vmatprep.subr.mxu0 %v17157_v26  ;;  %10545 = vmatmul.mubr.f32.vlgmr.msra.gmra.mxu1 %v17158_v8  ;;  %v17160_v8 = vand.u32 4294901760, %v15980_v18 }
0x160b   :  { %10736 = vmatprep.subr.mxu1 %v15630_v59  ;;  %10377 = vmatpush1.msra.mxu0 %v17159_v61  ;;  %v17161_v59 = vld [vmem:[#allocation21_spill] sm:$0xff] }
0x160c   :  { %10738 = vmatpush1.msra.mxu1 %v15632_v15  ;;  %10380 = vmatprep.subr.mxu0 %v15893_v40  ;;  %v17162_v15 = vld [vmem:[#allocation28_spill] sm:$0xff] }
0x160d   :  { %10740 = vmatprep.subr.mxu1 %v15634_v36  ;;  %10383 = vmatpush1.msra.mxu0 %v15903_v28  ;;  %v17163_v36 = vand.u32 4294901760, %v17162_v15 }
0x160e   :  { %10550 = vmatprep.mubr.f32.mxu1 %v17119_v6  ;;  %10742 = vmatpush1.msra.mxu1 %v15636_v22  ;;  %v17164_v22 = vand.u32 4294901760, %v15644_v60  ;;  %v17168_v60 = vand.u32 4294901760, %v15693_v57  ;;  %v17172_v57 = vand.u32 4294901760, %v15723_v62  ;;  %v17180_v62 = vand.u32 4294901760, %v17147_v20 }
0x160f   :  { %10386 = vmatprep.subr.mxu0 %v15911_v13  ;;  %10554 = vmatmul.mubr.f32.gmra.mxu1 %v17160_v8 }
0x1610   :  { %10744 = vmatprep.subr.mxu1 %v15638_v42  ;;  %10389 = vmatpush1.msra.mxu0 %v17161_v59  ;;  %v17165_v42 = vand.u32 4294901760, %v15647_v55  ;;  %v17169_v55 = vand.u32 4294901760, %v15699_v5  ;;  %v17174_v5 = vand.u32 4294901760, %v15743_v23  ;;  %v17186_v23 = vand.u32 4294901760, %v17154_v47 }
0x1611   :  { %10746 = vmatpush1.msra.mxu1 %v15688_v31  ;;  %10392 = vmatprep.subr.mxu0 %v15939_v14  ;;  %v17166_v31 = vand.u32 4294901760, %v15651_v7  ;;  %v17170_v7 = vand.u32 4294901760, %v15706_v43  ;;  %v17176_v43 = vand.u32 4294901760, %v15770_v50  ;;  %v17191_v50 = vand.u32 4294901760, %v17159_v61 }
0x1612   :  { %10748 = vmatprep.subr.mxu1 %v15690_v37  ;;  %10395 = vmatpush1.msra.mxu0 %v15944_v53  ;;  %v17167_v37 = vand.u32 4294901760, %v15654_v38  ;;  %v17171_v38 = vand.u32 4294901760, %v15713_v46  ;;  %v17178_v46 = vand.u32 4294901760, %v15786_v0  ;;  %v17196_v0 = vand.u32 4294901760, %v17161_v59 }
0x1613   :  { %10428 = vmatprep.mubr.f32.mxu0 %v17119_v6  ;;  %10750 = vmatpush1.msra.mxu1 %v15695_v51  ;;  %v17173_v51 = vand.u32 4294901760, %v15733_v29  ;;  %v17184_v29 = vand.u32 4294901760, %v17153_v1  ;;  %v17197_v61 = vand.u32 4294901760, %v15939_v14 }
0x1614   :  { %10431 = vmatmul.mubr.f32.vlgmr.msra.gmra.mxu0 %v15985_v11  ;;  %10563 = vmatprep.subr.mxu0 %v17163_v36  ;;  %v10909_v36 = vld [vmem:[#allocation10 + $0xd8] sm:$0xff] }
0x1615   :  { %10752 = vmatprep.subr.mxu1 %v15701_v9  ;;  %10567 = vmatpush1.msra.mxu0 %v17164_v22  ;;  %v17175_v9 = vand.u32 4294901760, %v15751_v16  ;;  %v17187_v16 = vand.u32 4294901760, %v17155_v49 }
0x1616   :  { %10754 = vmatpush1.msra.mxu1 %v15708_v39  ;;  %10571 = vmatprep.subr.mxu0 %v17165_v42  ;;  %v17177_v39 = vand.u32 4294901760, %v15779_v44  ;;  %v17193_v44 = vand.u32 4294901760, %v15903_v28  ;;  %v10897_v28 = vld [vmem:[#allocation10 + $0x78] sm:$0xff] }
0x1617   :  { %10756 = vmatprep.subr.mxu1 %v15715_v4  ;;  %10436 = vmatprep.mubr.f32.mxu0 %v17119_v6  ;;  %v17179_v4 = vand.u32 4294901760, %v17145_v45 }
0x1618   :  { %10575 = vmatpush1.msra.mxu0 %v17166_v31  ;;  %10758 = vmatpush1.msra.mxu1 %v15725_v35  ;;  %v17183_v35 = vld [vmem:[#allocation19_spill] sm:$0xff] }
0x1619   :  { %10439 = vmatmul.mubr.f32.gmra.mxu0 %v15980_v18  ;;  %10579 = vmatprep.subr.mxu0 %v17167_v37 }
0x161a   :  { %10760 = vmatprep.subr.mxu1 %v15735_v58  ;;  %10583 = vmatpush1.msra.mxu0 %v17168_v60  ;;  %v17185_v58 = vld [vmem:[#allocation37_spill] sm:$0xff]  ;;  %v10893_v60 = vld [vmem:[#allocation10 + $0x58] sm:$0xff] }
0x161b   :  { %10762 = vmatpush1.msra.mxu1 %v15758_v10  ;;  %10587 = vmatprep.subr.mxu0 %v17169_v55  ;;  %v17189_v10 = vand.u32 4294901760, %v17157_v26  ;;  %v10895_v26 = vld [vmem:[#allocation10 + $0x68] sm:$0xff] }
0x161c   :  { %10764 = vmatprep.subr.mxu1 %v15764_v21  ;;  %10591 = vmatpush1.msra.mxu0 %v17170_v7  ;;  %v17190_v21 = vld [vmem:[#allocation27_spill] sm:$0xff]  ;;  %v16201_v1 = vand.u32 4294901760, %v10895_v26 }
0x161d   :  { %10766 = vmatpush1.msra.mxu1 %v15772_v12  ;;  %10595 = vmatprep.subr.mxu0 %v17171_v38  ;;  %v17192_v12 = vand.u32 4294901760, %v15893_v40 }
0x161e   :  { %10768 = vmatprep.subr.mxu1 %v15781_v48  ;;  %10599 = vmatpush1.msra.mxu0 %v17172_v57  ;;  %v17194_v48 = vand.u32 4294901760, %v15911_v13  ;;  %v16219_v59 = vsub.f32 %v10895_v26, %v16201_v1 }
0x161f   :  { %10770 = vmatpush1.msra.mxu1 %v15788_v24  ;;  %10603 = vmatprep.subr.mxu0 %v17173_v51  ;;  %v17198_v24 = vand.u32 4294901760, %v15944_v53  ;;  %v10896_v53 = vld [vmem:[#allocation10 + $0x70] sm:$0xff] }
0x1620   :  { %10772 = vmatprep.subr.mxu1 %v15795_v56  ;;  %10607 = vmatpush1.msra.mxu0 %v17174_v5  ;;  %v17188_v56 = vand.u32 4294901760, %v17156_v27  ;;  %v16919_v38 = vand.u32 4294901760, %v16219_v59  ;;  %v10908_v51 = vld [vmem:[#allocation10 + $0xd0] sm:$0xff] }
0x1621   :  { %10774 = vmatpush1.msra.mxu1 %v15805_v2  ;;  %10611 = vmatprep.subr.mxu0 %v17175_v9 }
0x1622   :  { %10776 = vmatprep.subr.mxu1 %v15815_v34  ;;  %10615 = vmatpush1.msra.mxu0 %v17176_v43  ;;  %v17195_v34 = vld [vmem:[#allocation26_spill] sm:$0xff] }
0x1623   :  { %10778 = vmatpush1.msra.mxu1 %v15838_v32  ;;  %10619 = vmatprep.subr.mxu0 %v17177_v39  ;;  %v17181_v32 = vand.u32 4294901760, %v17149_v41  ;;  %v10894_v41 = vld [vmem:[#allocation10 + $0x60] sm:$0xff]  ;;  %v16244_v39 = vand.u32 4294901760, %v10909_v36 }
0x1624   :  { %10780 = vmatprep.subr.mxu1 %v15844_v3  ;;  %10623 = vmatpush1.msra.mxu0 %v17178_v46  ;;  %v17182_v3 = vand.u32 4294901760, %v17151_v25  ;;  %v10911_v25 = vld [vmem:[#allocation10 + $0xe8] sm:$0xff]  ;;  %v16221_v15 = vand.u32 4294901760, %v10894_v41  ;;  %v10892_v46 = vld [vmem:[#allocation10 + $0x50] sm:$0xff] }
0x1625   :  { %10782 = vmatpush1.msra.mxu1 %v17144_v54  ;;  %10627 = vmatprep.subr.mxu0 %v17179_v4  ;;  %v16194_v27 = vand.u32 4294901760, %v10911_v25  ;;  %v10910_v54 = vld [vmem:[#allocation10 + $0xe0] sm:$0xff] }
0x1626   :  { %10784 = vmatprep.subr.mxu1 %v17146_v30  ;;  %10631 = vmatpush1.msra.mxu0 %v17180_v62  ;;  %v16237_v57 = vsub.f32 %v10894_v41, %v16221_v15  ;;  %v11066_v62 = vsub.f32 %v16219_v59, %v16919_v38 }
0x1627   :  { %10786 = vmatpush1.msra.mxu1 %v17148_v63  ;;  %10635 = vmatprep.subr.mxu0 %v17181_v32  ;;  %v16209_v20 = vsub.f32 %v10911_v25, %v16194_v27  ;;  %v16211_v63 = vand.u32 4294901760, %v10910_v54 }
0x1628   :  { %10788 = vmatprep.subr.mxu1 %v17150_v17  ;;  %10639 = vmatpush1.msra.mxu0 %v17182_v3  ;;  %v16917_v32 = vand.u32 4294901760, %v16237_v57  ;;  %v16250_v3 = vand.u32 4294901760, %v10893_v60 }
0x1629   :  { %10790 = vmatpush1.msra.mxu1 %v17183_v35  ;;  %10643 = vmatprep.subr.mxu0 %v17184_v29  ;;  %v16921_v31 = vand.u32 4294901760, %v16209_v20  ;;  %v16229_v37 = vsub.f32 %v10910_v54, %v16211_v63  ;;  %v10907_v35 = vld [vmem:[#allocation10 + $0xc8] sm:$0xff] }
0x162a   :  { %10792 = vmatprep.subr.mxu1 %v17185_v58  ;;  %10647 = vmatpush1.msra.mxu0 %v17186_v23  ;;  %v16256_v23 = vsub.f32 %v10909_v36, %v16244_v39 }
0x162b   :  { %10794 = vmatpush1.msra.mxu1 %v15918_v19  ;;  %10651 = vmatprep.subr.mxu0 %v17187_v16  ;;  %v10913_v19 = vld [vmem:[#allocation10 + $0xf8] sm:$0xff]  ;;  %v11178_v9 = vsub.f32 %v16209_v20, %v16921_v31  ;;  %v16918_v43 = vand.u32 4294901760, %v16229_v37  ;;  %v16258_v16 = vand.u32 4294901760, %v10908_v51 }
0x162c   :  { %10796 = vmatprep.subr.mxu1 %v15924_v52  ;;  %10655 = vmatpush1.msra.mxu0 %v17188_v56  ;;  %v16174_v2 = vand.u32 4294901760, %v10913_v19  ;;  %v10912_v52 = vld [vmem:[#allocation10 + $0xf0] sm:$0xff]  ;;  %v10891_v56 = vld [vmem:[#allocation10 + $0x48] sm:$0xff] }
0x162d   :  { %10798 = vmatpush1.msra.mxu1 %v15932_v33  ;;  %10831 = vmatprep.mubr.f32.mxu1 %v17119_v6  ;;  %v16176_v33 = vand.u32 4294901760, %v10897_v28  ;;  %v16181_v13 = vand.u32 4294901760, %v10912_v52  ;;  %v11179_v29 = vand.u32 4294901760, %v11178_v9  ;;  %v11185_v58 = vsub.f32 %v16229_v37, %v16918_v43 }
0x162e   :  { %10659 = vmatprep.subr.mxu0 %v17189_v10  ;;  %10833 = vmatmul.mubr.f32.vlgmr.msra.gmra.mxu1 %v17190_v21  ;;  %17199 = vst [vmem:[#allocation25_spill] sm:$0xff] %v16174_v2  ;;  %v16179_v40 = vsub.f32 %v10913_v19, %v16174_v2  ;;  %v11067_v10 = vand.u32 4294901760, %v11066_v62 }
0x162f   :  { %10663 = vmatpush1.msra.mxu0 %v17191_v50  ;;  %10838 = vmatprep.mubr.f32.mxu1 %v17119_v6  ;;  %v16185_v14 = vsub.f32 %v10897_v28, %v16176_v33  ;;  %v16192_v49 = vsub.f32 %v10912_v52, %v16181_v13  ;;  %v16265_v50 = vsub.f32 %v10893_v60, %v16250_v3 }
0x1630   :  { %10667 = vmatprep.subr.mxu0 %v17192_v12  ;;  %10720 = vmatprep.mubr.f32.mxu0 %v17119_v6  ;;  %17200 = vst [vmem:[#allocation32_spill] sm:$0xff] %v16179_v40  ;;  %v16926_v47 = vand.u32 4294901760, %v16179_v40  ;;  %v16267_v12 = vand.u32 4294901760, %v10892_v46 }
0x1631   :  { %10671 = vmatpush1.msra.mxu0 %v17193_v44  ;;  %v16925_v18 = vand.u32 4294901760, %v16185_v14  ;;  %v16923_v30 = vand.u32 4294901760, %v16192_v49  ;;  %v10906_v44 = vld [vmem:[#allocation10 + $0xc0] sm:$0xff]  ;;  %v16914_v28 = vand.u32 4294901760, %v16265_v50 }
0x1632   :  { %10675 = vmatprep.subr.mxu0 %v17194_v48  ;;  %10840 = vmatmul.mubr.f32.gmra.mxu1 %v17195_v34  ;;  %v11164_v45 = vsub.f32 %v16179_v40, %v16926_v47  ;;  %v11186_v48 = vand.u32 4294901760, %v11185_v58  ;;  %v16279_v52 = vsub.f32 %v10892_v46, %v16267_v12  ;;  %v10884_v47 = vld [vmem:[#allocation10 + $0x10] sm:$0xff] }
0x1633   :  { %10679 = vmatpush1.msra.mxu0 %v17196_v0  ;;  %v11052_v17 = vsub.f32 %v16185_v14, %v16925_v18  ;;  %v11171_v42 = vsub.f32 %v16192_v49, %v16923_v30  ;;  %v16272_v0 = vsub.f32 %v10908_v51, %v16258_v16  ;;  %v11080_v41 = vsub.f32 %v16265_v50, %v16914_v28  ;;  %v10900_v30 = vld [vmem:[#allocation10 + $0x90] sm:$0xff] }
0x1634   :  { %10683 = vmatprep.subr.mxu0 %v17197_v61  ;;  %v11165_v22 = vand.u32 4294901760, %v11164_v45  ;;  %v16274_v61 = vand.u32 4294901760, %v10907_v35  ;;  %v16291_v45 = vand.u32 4294901760, %v10906_v44 }
0x1635   :  { %10687 = vmatpush1.msra.mxu0 %v17198_v24  ;;  %v11053_v55 = vand.u32 4294901760, %v11052_v17  ;;  %v11172_v5 = vand.u32 4294901760, %v11171_v42  ;;  %v10890_v24 = vld [vmem:[#allocation10 + $0x40] sm:$0xff]  ;;  %v16912_v26 = vand.u32 4294901760, %v16272_v0  ;;  %v16911_v17 = vand.u32 4294901760, %v16279_v52  ;;  %v10905_v42 = vld [vmem:[#allocation10 + $0xb8] sm:$0xff] }
0x1636   :  { %10722 = vmatmul.mubr.f32.vlgmr.msra.gmra.mxu0 %v17190_v21  ;;  %12332 = vmatprep.subr.mxu0 %v16174_v2  ;;  %v11073_v21 = vsub.f32 %v16237_v57, %v16917_v32  ;;  %v16289_v54 = vsub.f32 %v10907_v35, %v16274_v61  ;;  %v16309_v51 = vsub.f32 %v10906_v44, %v16291_v45  ;;  %v11081_v9 = vand.u32 4294901760, %v11080_v41  ;;  %v10904_v35 = vld [vmem:[#allocation10 + $0xb0] sm:$0xff]  ;;  %v10901_v32 = vld [vmem:[#allocation10 + $0x98] sm:$0xff] }
0x1637   :  { %10727 = vmatprep.mubr.f32.mxu0 %v17119_v6  ;;  %v16187_v6 = vand.u32 4294901760, %v10896_v53  ;;  %12333 = vmatpush3.msra.mxu0 %v16176_v33  ;;  %v11087_v46 = vsub.f32 %v16279_v52, %v16911_v17  ;;  %v16404_v18 = vand.u32 4294901760, %v10901_v32 }
0x1638   :  { %12334 = vmatprep.subr.mxu0 %v16181_v13  ;;  %12370 = vmatprep.subr.mxu1 %v11165_v22  ;;  %v11074_v19 = vand.u32 4294901760, %v11073_v21  ;;  %17201 = vst [vmem:[#allocation29_spill] sm:$0xff] %v16289_v54  ;;  %v16301_v22 = vand.u32 4294901760, %v10890_v24  ;;  %17203 = vst [vmem:[#allocation40_spill] sm:$0xff] %v16309_v51  ;;  %v10888_v21 = vld [vmem:[#allocation10 + $0x30] sm:$0xff] }
0x1639   :  { %v16199_v11 = vsub.f32 %v10896_v53, %v16187_v6  ;;  %12335 = vmatpush3.msra.mxu0 %v16187_v6  ;;  %12371 = vmatpush3.msra.mxu1 %v11053_v55  ;;  %v16281_v53 = vand.u32 4294901760, %v10891_v56  ;;  %v11199_v55 = vsub.f32 %v16272_v0, %v16912_v26  ;;  %v11088_v44 = vand.u32 4294901760, %v11087_v46  ;;  %v10887_v46 = vld [vmem:[#allocation10 + $0x28] sm:$0xff]  ;;  %17218 = vst [vmem:[#allocation26_spill] sm:$0xff] %v16404_v18 }
0x163a   :  { %10729 = vmatmul.mubr.f32.gmra.mxu0 %v17195_v34  ;;  %12336 = vmatprep.subr.mxu0 %v16194_v27  ;;  %v16915_v34 = vand.u32 4294901760, %v16256_v23  ;;  %v16317_v62 = vsub.f32 %v10890_v24, %v16301_v22 }
0x163b   :  { %v16922_v8 = vand.u32 4294901760, %v16199_v11  ;;  %12337 = vmatpush3.msra.mxu0 %v16201_v1  ;;  %12372 = vmatprep.subr.mxu1 %v11172_v5  ;;  %v16299_v36 = vsub.f32 %v10891_v56, %v16281_v53  ;;  %v10889_v5 = vld [vmem:[#allocation10 + $0x38] sm:$0xff]  ;;  %v16910_v56 = vand.u32 4294901760, %v16309_v51 }
0x163c   :  { %12338 = vmatprep.subr.mxu0 %v16211_v63  ;;  %v11192_v25 = vsub.f32 %v16256_v23, %v16915_v34  ;;  %17204 = vst [vmem:[#allocation34_spill] sm:$0xff] %v16317_v62  ;;  %v16913_v24 = vand.u32 4294901760, %v16317_v62  ;;  %v16361_v34 = vand.u32 4294901760, %v10887_v46 }
0x163d   :  { %v11059_v7 = vsub.f32 %v16199_v11, %v16922_v8  ;;  %12339 = vmatpush3.msra.mxu0 %v16221_v15  ;;  %17202 = vst [vmem:[#allocation33_spill] sm:$0xff] %v16299_v36 }
0x163e   :  { %12340 = vmatprep.subr.mxu0 %v16244_v39  ;;  %v11193_v60 = vand.u32 4294901760, %v11192_v25  ;;  %v10903_v25 = vld [vmem:[#allocation10 + $0xa8] sm:$0xff]  ;;  %17211 = vst [vmem:[#allocation36_spill] sm:$0xff] %v16361_v34 }
0x163f   :  { %v11060_v4 = vand.u32 4294901760, %v11059_v7  ;;  %12341 = vmatpush3.msra.mxu0 %v16250_v3  ;;  %v16909_v7 = vand.u32 4294901760, %v16289_v54 }
0x1640   :  { %12342 = vmatprep.subr.mxu0 %v16258_v16 }
0x1641   :  { %12373 = vmatpush3.msra.mxu1 %v11060_v4  ;;  %12343 = vmatpush3.msra.mxu0 %v16267_v12  ;;  %v16908_v4 = vand.u32 4294901760, %v16299_v36  ;;  %v11206_v58 = vsub.f32 %v16289_v54, %v16909_v7  ;;  %v11101_v7 = vsub.f32 %v16317_v62, %v16913_v24 }
0x1642   :  { %12374 = vmatprep.subr.mxu1 %v11179_v29  ;;  %12344 = vmatprep.subr.mxu0 %v16274_v61  ;;  %v11200_v29 = vand.u32 4294901760, %v11199_v55 }
0x1643   :  { %12375 = vmatpush3.msra.mxu1 %v11067_v10  ;;  %12345 = vmatpush3.msra.mxu0 %v16281_v53  ;;  %v16324_v10 = vand.u32 4294901760, %v10905_v42  ;;  %v11207_v41 = vand.u32 4294901760, %v11206_v58  ;;  %v16347_v58 = vand.u32 4294901760, %v10888_v21 }
0x1644   :  { %12376 = vmatprep.subr.mxu1 %v11186_v48  ;;  %12346 = vmatprep.subr.mxu0 %v16291_v45  ;;  %v11094_v48 = vsub.f32 %v16299_v36, %v16908_v4 }
0x1645   :  { %12377 = vmatpush3.msra.mxu1 %v11074_v19  ;;  %12347 = vmatpush3.msra.mxu0 %v16301_v22  ;;  %v16330_v19 = vand.u32 4294901760, %v10889_v5  ;;  %v16336_v55 = vsub.f32 %v10905_v42, %v16324_v10  ;;  %17207 = vst [vmem:[#allocation38_spill] sm:$0xff] %v16347_v58  ;;  %v16359_v28 = vsub.f32 %v10888_v21, %v16347_v58 }
0x1646   :  { %12378 = vmatprep.subr.mxu1 %v11193_v60  ;;  %v11213_v60 = vsub.f32 %v16309_v51, %v16910_v56  ;;  %12348 = vmatprep.subr.mxu0 %v16324_v10  ;;  %v11095_v4 = vand.u32 4294901760, %v11094_v48  ;;  %v10902_v56 = vld [vmem:[#allocation10 + $0xa0] sm:$0xff] }
0x1647   :  { %12379 = vmatpush3.msra.mxu1 %v11081_v9  ;;  %17205 = vst [vmem:[#allocation31_spill] sm:$0xff] %v16336_v55  ;;  %v16338_v9 = vand.u32 4294901760, %v10904_v35  ;;  %12349 = vmatpush3.msra.mxu0 %v16330_v19  ;;  %v16916_v17 = vand.u32 4294901760, %v16336_v55  ;;  %v10886_v48 = vld [vmem:[#allocation10 + $0x20] sm:$0xff]  ;;  %17210 = vst [vmem:[#allocation30_spill] sm:$0xff] %v16359_v28  ;;  %v16927_v21 = vand.u32 4294901760, %v16359_v28 }
0x1648   :  { %12380 = vmatprep.subr.mxu1 %v11200_v29  ;;  %v16345_v29 = vsub.f32 %v10889_v5, %v16330_v19  ;;  %v11214_v42 = vand.u32 4294901760, %v11213_v60  ;;  %v11102_v5 = vand.u32 4294901760, %v11101_v7  ;;  %v16371_v7 = vand.u32 4294901760, %v10902_v56 }
0x1649   :  { %12381 = vmatpush3.msra.mxu1 %v11088_v44  ;;  %v16352_v26 = vsub.f32 %v10904_v35, %v16338_v9  ;;  %v16354_v44 = vand.u32 4294901760, %v10903_v25  ;;  %12350 = vmatprep.subr.mxu0 %v16338_v9  ;;  %v11220_v35 = vsub.f32 %v16336_v55, %v16916_v17  ;;  %v16381_v17 = vand.u32 4294901760, %v10886_v48 }
0x164a   :  { %17206 = vst [vmem:[#allocation35_spill] sm:$0xff] %v16345_v29  ;;  %12382 = vmatprep.subr.mxu1 %v11207_v41  ;;  %v16920_v24 = vand.u32 4294901760, %v16345_v29  ;;  %12351 = vmatpush3.msra.mxu0 %v16347_v58  ;;  %17213 = vst [vmem:[#allocation21_spill] sm:$0xff] %v16371_v7  ;;  %v16389_v38 = vsub.f32 %v10902_v56, %v16371_v7  ;;  %v11115_v31 = vsub.f32 %v16359_v28, %v16927_v21 }
0x164b   :  { %17208 = vst [vmem:[#allocation23_spill] sm:$0xff] %v16352_v26  ;;  %17209 = vst [vmem:[#allocation39_spill] sm:$0xff] %v16354_v44  ;;  %12383 = vmatpush3.msra.mxu1 %v11095_v4  ;;  %v16924_v41 = vand.u32 4294901760, %v16352_v26  ;;  %v16369_v60 = vsub.f32 %v10903_v25, %v16354_v44  ;;  %12352 = vmatprep.subr.mxu0 %v16354_v44  ;;  %v11221_v25 = vand.u32 4294901760, %v11220_v35 }
0x164c   :  { %12384 = vmatprep.subr.mxu1 %v11214_v42  ;;  %v11108_v4 = vsub.f32 %v16345_v29, %v16920_v24  ;;  %v16379_v42 = vsub.f32 %v10887_v46, %v16361_v34  ;;  %17215 = vst [vmem:[#allocation19_spill] sm:$0xff] %v16381_v17  ;;  %12353 = vmatpush3.msra.mxu0 %v16361_v34  ;;  %17216 = vst [vmem:[#allocation37_spill] sm:$0xff] %v16389_v38  ;;  %v10885_v24 = vld [vmem:[#allocation10 + $0x18] sm:$0xff]  ;;  %v11116_v21 = vand.u32 4294901760, %v11115_v31  ;;  %v10883_v31 = vld [vmem:[#allocation10 + $0x8] sm:$0xff] }
0x164d   :  { %17212 = vst [vmem:[#allocation41_spill] sm:$0xff] %v16369_v60  ;;  %12385 = vmatpush3.msra.mxu1 %v11102_v5  ;;  %v11227_v43 = vsub.f32 %v16352_v26, %v16924_v41  ;;  %v16932_v5 = vand.u32 4294901760, %v16369_v60  ;;  %12354 = vmatprep.subr.mxu0 %v16371_v7  ;;  %v16397_v35 = vsub.f32 %v10886_v48, %v16381_v17  ;;  %v16410_v26 = vand.u32 4294901760, %v10885_v24 }
0x164e   :  { %17214 = vst [vmem:[#allocation28_spill] sm:$0xff] %v16379_v42  ;;  %v11109_v46 = vand.u32 4294901760, %v11108_v4  ;;  %v16935_v8 = vand.u32 4294901760, %v16379_v42  ;;  %12355 = vmatpush3.msra.mxu0 %v16381_v17  ;;  %12386 = vmatprep.subr.mxu1 %v11221_v25  ;;  %v16938_v4 = vand.u32 4294901760, %v16389_v38 }
0x164f   :  { %17217 = vst [vmem:[#allocation27_spill] sm:$0xff] %v16397_v35  ;;  %v11228_v41 = vand.u32 4294901760, %v11227_v43  ;;  %v11234_v56 = vsub.f32 %v16369_v60, %v16932_v5  ;;  %v16943_v28 = vand.u32 4294901760, %v16397_v35  ;;  %17219 = vst [vmem:[#allocation42_spill] sm:$0xff] %v16410_v26  ;;  %v10899_v43 = vld [vmem:[#allocation10 + $0x88] sm:$0xff]  ;;  %v16416_v60 = vsub.f32 %v10901_v32, %v16404_v18  ;;  %12356 = vmatprep.subr.mxu0 %v16404_v18 }
0x1650   :  { %12387 = vmatpush3.msra.mxu1 %v11109_v46  ;;  %v11122_v48 = vsub.f32 %v16379_v42, %v16935_v8  ;;  %v11241_v5 = vsub.f32 %v16389_v38, %v16938_v4  ;;  %v16418_v46 = vand.u32 4294901760, %v10900_v30  ;;  %v10898_v4 = vld [vmem:[#allocation10 + $0x80] sm:$0xff]  ;;  %12357 = vmatpush3.msra.mxu0 %v16410_v26 }
0x1651   :  { %12388 = vmatprep.subr.mxu1 %v11228_v41  ;;  %v11235_v25 = vand.u32 4294901760, %v11234_v56  ;;  %17220 = vst [vmem:[#allocation43_spill] sm:$0xff] %v16416_v60  ;;  %v11129_v42 = vsub.f32 %v16397_v35, %v16943_v28  ;;  %v16425_v41 = vsub.f32 %v10885_v24, %v16410_v26  ;;  %v16427_v56 = vand.u32 4294901760, %v10884_v47 }
0x1652   :  { %17221 = vst [vmem:[#allocation44_spill] sm:$0xff] %v16418_v46  ;;  %12389 = vmatpush3.msra.mxu1 %v11116_v21  ;;  %v11123_v8 = vand.u32 4294901760, %v11122_v48  ;;  %v11242_v32 = vand.u32 4294901760, %v11241_v5  ;;  %v16948_v38 = vand.u32 4294901760, %v16416_v60  ;;  %v16432_v29 = vsub.f32 %v10900_v30, %v16418_v46  ;;  %v10882_v48 = vld [vmem:[#allocation10] sm:$0xff]  ;;  %12358 = vmatprep.subr.mxu0 %v16418_v46 }
0x1653   :  { %17222 = vst [vmem:[#allocation45_spill] sm:$0xff] %v16425_v41  ;;  %17223 = vst [vmem:[#allocation46_spill] sm:$0xff] %v16427_v56  ;;  %12390 = vmatprep.subr.mxu1 %v11235_v25  ;;  %v16434_v21 = vand.u32 4294901760, %v10899_v43  ;;  %v11130_v24 = vand.u32 4294901760, %v11129_v42  ;;  %v16953_v28 = vand.u32 4294901760, %v16425_v41  ;;  %v16439_v35 = vsub.f32 %v10884_v47, %v16427_v56  ;;  %12359 = vmatpush3.msra.mxu0 %v16427_v56 }
0x1654   :  { %17224 = vst [vmem:[#allocation47_spill] sm:$0xff] %v16432_v29  ;;  %12391 = vmatpush3.msra.mxu1 %v11123_v8  ;;  %v16441_v26 = vand.u32 4294901760, %v10883_v31  ;;  %v11248_v30 = vsub.f32 %v16416_v60, %v16948_v38  ;;  %v16956_v5 = vand.u32 4294901760, %v16432_v29  ;;  %v16451_v8 = vand.u32 4294901760, %v10898_v4 }
0x1655   :  { %17225 = vst [vmem:[#allocation48_spill] sm:$0xff] %v16434_v21  ;;  %17226 = vst [vmem:[#allocation49_spill] sm:$0xff] %v16439_v35  ;;  %12392 = vmatprep.subr.mxu1 %v11242_v32  ;;  %v16449_v25 = vsub.f32 %v10899_v43, %v16434_v21  ;;  %12360 = vmatprep.subr.mxu0 %v16434_v21  ;;  %v11136_v47 = vsub.f32 %v16425_v41, %v16953_v28  ;;  %v16959_v42 = vand.u32 4294901760, %v16439_v35 }
0x1656   :  { %17227 = vst [vmem:[#allocation50_spill] sm:$0xff] %v16441_v26  ;;  %17229 = vst [vmem:[#allocation52_spill] sm:$0xff] %v16451_v8  ;;  %12393 = vmatpush3.msra.mxu1 %v11130_v24  ;;  %v16459_v32 = vsub.f32 %v10883_v31, %v16441_v26  ;;  %v16461_v38 = vand.u32 4294901760, %v10882_v48  ;;  %12361 = vmatpush3.msra.mxu0 %v16441_v26  ;;  %v11249_v43 = vand.u32 4294901760, %v11248_v30 }
0x1657   :  { %17228 = vst [vmem:[#allocation51_spill] sm:$0xff] %v16449_v25  ;;  %v11255_v60 = vsub.f32 %v16432_v29, %v16956_v5  ;;  %v16962_v24 = vand.u32 4294901760, %v16449_v25  ;;  %v16469_v21 = vsub.f32 %v10898_v4, %v16451_v8  ;;  %12362 = vmatprep.subr.mxu0 %v16451_v8  ;;  %v11137_v28 = vand.u32 4294901760, %v11136_v47 }
0x1658   :  { %17230 = vst [vmem:[#allocation53_spill] sm:$0xff] %v16459_v32  ;;  %17231 = vst [vmem:[#allocation54_spill] sm:$0xff] %v16461_v38  ;;  %v11143_v31 = vsub.f32 %v16439_v35, %v16959_v42  ;;  %v16963_v41 = vand.u32 4294901760, %v16459_v32  ;;  %v16477_v30 = vsub.f32 %v10882_v48, %v16461_v38  ;;  %12363 = vmatpush3.msra.mxu0 %v16461_v38  ;;  %12394 = vmatprep.subr.mxu1 %v11249_v43 }
0x1659   :  { %17232 = vst [vmem:[#allocation55_spill] sm:$0xff] %v16469_v21  ;;  %v11256_v5 = vand.u32 4294901760, %v11255_v60  ;;  %v11262_v4 = vsub.f32 %v16449_v25, %v16962_v24  ;;  %v16967_v29 = vand.u32 4294901760, %v16469_v21  ;;  %12408 = vmatprep.subr.mxu0 %v16179_v40  ;;  %12395 = vmatpush3.msra.mxu1 %v11137_v28 }
0x165a   :  { %17233 = vst [vmem:[#allocation56_spill] sm:$0xff] %v16477_v30  ;;  %v11144_v47 = vand.u32 4294901760, %v11143_v31  ;;  %v11150_v42 = vsub.f32 %v16459_v32, %v16963_v41  ;;  %v16968_v48 = vand.u32 4294901760, %v16477_v30 }
0x165b   :  { %12396 = vmatprep.subr.mxu1 %v11256_v5  ;;  %v11263_v35 = vand.u32 4294901760, %v11262_v4  ;;  %v11269_v60 = vsub.f32 %v16469_v21, %v16967_v29 }
0x165c   :  { %12397 = vmatpush3.msra.mxu1 %v11144_v47  ;;  %v11151_v43 = vand.u32 4294901760, %v11150_v42  ;;  %v11157_v24 = vsub.f32 %v16477_v30, %v16968_v48  ;;  %v9930_v42 = vld [vmem:[%s16743_s8] sm:$0x3] }
0x165d   :  { %12398 = vmatprep.subr.mxu1 %v11263_v35  ;;  %v11270_v28 = vand.u32 4294901760, %v11269_v60  ;;  %v17234_v60 = vld [vmem:[#allocation20_spill] sm:$0xff] }
0x165e   :  { %12399 = vmatpush3.msra.mxu1 %v11151_v43  ;;  %v11158_v31 = vand.u32 4294901760, %v11157_v24  ;;  %v17235_v43 = vsub.s32 0, %v17234_v60  ;;  %v17236_v30 = vsub.s32 1, %v17234_v60 }
0x165f   :  { %12400 = vmatprep.subr.mxu1 %v11270_v28 }
0x1660   :  { %12401 = vmatpush3.msra.mxu1 %v11158_v31  ;;  %v9935_v24 = vrot.slane %v9930_v42, %v17235_v43  ;;  %v9939_v21 = vrot.slane %v9930_v42, %v17236_v30 }
0x1661   :  { %12446 = vmatprep.subr.mxu1 %v16174_v2 }
0x16a9   :  { %v10288_v5 = vpop.f32.mrf.mxu1 }
0x16ab   :  { %v10290_v4 = vpop.f32.mrf.mxu1 }
0x16ad   :  { %v10295_v40 = vpop.f32.mrf.mxu1 }
0x16af   :  { %v10297_v29 = vpop.f32.mrf.mxu1 }
0x16b1   :  { %v10045_v41 = vpop.f32.mrf.mxu0 }
0x16b2   :  { %v10046_v25 = vadd.f32 %v10045_v41, %v9935_v24 }
0x16b3   :  { %v10047_v32 = vpop.f32.mrf.mxu0 }
0x16b4   :  { %v10048_v8 = vadd.f32 %v10047_v32, %v9939_v21  ;;  %v10289_v56 = vadd.f32 %v10288_v5, %v10046_v25 }
0x16b6   :  { %v10056_v47 = vpop.f32.mrf.mxu0  ;;  %v10291_v62 = vadd.f32 %v10290_v4, %v10048_v8 }
0x16b7   :  { %v10057_v26 = vadd.f32 %v10056_v47, %v9935_v24 }
0x16b8   :  { %v10058_v35 = vpop.f32.mrf.mxu0 }
0x16b9   :  { %v10059_v55 = vadd.f32 %v10058_v35, %v9939_v21  ;;  %v10296_v34 = vadd.f32 %v10295_v40, %v10057_v26 }
0x16bb   :  { %v10298_v44 = vadd.f32 %v10297_v29, %v10059_v55 }
0x16ca   :  { %v10546_v48 = vpop.f32.mrf.mxu1 }
0x16cc   :  { %v10548_v28 = vpop.f32.mrf.mxu1 }
0x16cf   :  { %v10555_v2 = vpop.f32.mrf.mxu1 }
0x16d1   :  { %v10557_v46 = vpop.f32.mrf.mxu1 }
0x16d4   :  { %v10432_v31 = vpop.f32.mrf.mxu0 }
0x16d5   :  { %v10433_v17 = vadd.f32 %v10432_v31, %v10289_v56 }
0x16d6   :  { %v10434_v38 = vpop.f32.mrf.mxu0 }
0x16d7   :  { %v10435_v51 = vadd.f32 %v10434_v38, %v10291_v62  ;;  %v10547_v54 = vadd.f32 %v10546_v48, %v10433_v17 }
0x16d9   :  { %v10440_v18 = vpop.f32.mrf.mxu0  ;;  %v10549_v58 = vadd.f32 %v10548_v28, %v10435_v51 }
0x16da   :  { %v10441_v36 = vadd.f32 %v10440_v18, %v10296_v34 }
0x16db   :  { %v10442_v43 = vpop.f32.mrf.mxu0 }
0x16dc   :  { %v10443_v41 = vadd.f32 %v10442_v43, %v10298_v44  ;;  %v10556_v5 = vadd.f32 %v10555_v2, %v10441_v36 }
0x16de   :  { %v10558_v38 = vadd.f32 %v10557_v46, %v10443_v41 }
0x16ee   :  { %v10834_v7 = vpop.f32.mrf.mxu1 }
0x16f0   :  { %v10836_v60 = vpop.f32.mrf.mxu1 }
0x16f2   :  { %v10841_v24 = vpop.f32.mrf.mxu1 }
0x16f4   :  { %v10843_v62 = vpop.f32.mrf.mxu1 }
0x16f6   :  { %v10723_v30 = vpop.f32.mrf.mxu0 }
0x16f7   :  { %v10724_v42 = vadd.f32 %v10723_v30, %v10547_v54 }
0x16f8   :  { %v10725_v32 = vpop.f32.mrf.mxu0 }
0x16f9   :  { %v10835_v47 = vadd.f32 %v10834_v7, %v10724_v42  ;;  %v10726_v25 = vadd.f32 %v10725_v32, %v10549_v58 }
0x16fa   :  { %v10730_v21 = vpop.f32.mrf.mxu0 }
0x16fb   :  { %v10846_v56 = vmul.f32 %v10835_v47, %v10835_v47  ;;  %v10837_v8 = vadd.f32 %v10836_v60, %v10726_v25  ;;  %v10731_v4 = vadd.f32 %v10730_v21, %v10556_v5 }
0x16fc   :  { %v10732_v40 = vpop.f32.mrf.mxu0 }
0x16fd   :  { %v10850_v26 = vmul.f32 %v10846_v56, %v10835_v47  ;;  %v10847_v18 = vmul.f32 %v10837_v8, %v10837_v8  ;;  %v10842_v34 = vadd.f32 %v10841_v24, %v10731_v4  ;;  %v10733_v17 = vadd.f32 %v10732_v40, %v10558_v38 }
0x16ff   :  { %v10854_v55 = vmul.f32 0.044715, %v10850_v26  ;;  %v10851_v29 = vmul.f32 %v10847_v18, %v10837_v8  ;;  %v10848_v54 = vmul.f32 %v10842_v34, %v10842_v34  ;;  %v10844_v51 = vadd.f32 %v10843_v62, %v10733_v17 }
0x1701   :  { %v10858_v44 = vadd.f32 %v10854_v55, %v10835_v47  ;;  %v10855_v7 = vmul.f32 0.044715, %v10851_v29  ;;  %v10852_v58 = vmul.f32 %v10848_v54, %v10842_v34  ;;  %v10849_v2 = vmul.f32 %v10844_v51, %v10844_v51 }
0x1703   :  { %v10862_v36 = vmul.f32 0.7978846, %v10858_v44  ;;  %v10859_v48 = vadd.f32 %v10855_v7, %v10837_v8  ;;  %v10856_v35 = vmul.f32 0.044715, %v10852_v58  ;;  %v10853_v28 = vmul.f32 %v10849_v2, %v10844_v51 }
0x1705   :  { %13514 = vtanh.f32 %v10862_v36  ;;  %v10863_v46 = vmul.f32 0.7978846, %v10859_v48  ;;  %v10860_v31 = vadd.f32 %v10856_v35, %v10842_v34  ;;  %v10857_v43 = vmul.f32 0.044715, %v10853_v28 }
0x1707   :  { %13516 = vtanh.f32 %v10863_v46  ;;  %v10864_v60 = vmul.f32 0.7978846, %v10860_v31  ;;  %v10861_v30 = vadd.f32 %v10857_v43, %v10844_v51 }
0x1709   :  { %13518 = vtanh.f32 %v10864_v60  ;;  %v10865_v41 = vmul.f32 0.7978846, %v10861_v30 }
0x170b   :  { %13520 = vtanh.f32 %v10865_v41 }
0x1712   :  { %v13515_v42 = vpop.eup %13514 }
0x1713   :  { %v10870_v32 = vadd.f32 1.0, %v13515_v42 }
0x1714   :  { %v13517_v25 = vpop.eup %13516 }
0x1715   :  { %v10874_v5 = vmul.f32 0.5, %v10870_v32  ;;  %v10871_v24 = vadd.f32 1.0, %v13517_v25  ;;  %v17240_v32 = vld [vmem:[#allocation38_spill] sm:$0xff]  ;;  %v17241_v25 = vld [vmem:[#allocation29_spill] sm:$0xff] }
0x1716   :  { %v13519_v21 = vpop.eup %13518 }
0x1717   :  { %v10878_v56 = vmul.f32 %v10874_v5, %v10835_v47  ;;  %v10875_v4 = vmul.f32 0.5, %v10871_v24  ;;  %v10872_v38 = vadd.f32 1.0, %v13519_v21  ;;  %v17242_v5 = vld [vmem:[#allocation39_spill] sm:$0xff]  ;;  %v17243_v24 = vld [vmem:[#allocation33_spill] sm:$0xff]  ;;  %v17244_v21 = vld [vmem:[#allocation36_spill] sm:$0xff] }
0x1718   :  { %v13521_v40 = vpop.eup %13520 }
0x1719   :  { %v16503_v26 = vand.u32 4294901760, %v10878_v56  ;;  %v10879_v18 = vmul.f32 %v10875_v4, %v10837_v8  ;;  %v10873_v17 = vadd.f32 1.0, %v13521_v40  ;;  %v10876_v62 = vmul.f32 0.5, %v10872_v38  ;;  %v17246_v4 = vld [vmem:[#allocation21_spill] sm:$0xff]  ;;  %v17247_v38 = vld [vmem:[#allocation34_spill] sm:$0xff]  ;;  %v17248_v40 = vld [vmem:[#allocation19_spill] sm:$0xff] }
0x171b   :  { %17237 = vst [vmem:[#allocation20_spill] sm:$0xff] %v16503_v26  ;;  %v16506_v55 = vsub.f32 %v10878_v56, %v16503_v26  ;;  %v16508_v29 = vand.u32 4294901760, %v10879_v18  ;;  %v10877_v54 = vmul.f32 0.5, %v10873_v17  ;;  %v10880_v44 = vmul.f32 %v10876_v62, %v10842_v34  ;;  %v17245_v56 = vld [vmem:[#allocation40_spill] sm:$0xff]  ;;  %v17250_v17 = vld [vmem:[#allocation26_spill] sm:$0xff]  ;;  %v17251_v62 = vld [vmem:[#allocation35_spill] sm:$0xff] }
0x171d   :  { %v11025_v7 = vand.u32 4294901760, %v16506_v55  ;;  %11273 = vmatprep.mubr.f32.mxu1 %v16508_v29  ;;  %v10881_v47 = vmul.f32 %v10877_v54, %v10844_v51  ;;  %v16512_v58 = vand.u32 4294901760, %v10880_v44  ;;  %v11018_v2 = vsub.f32 %v10879_v18, %v16508_v29  ;;  %v17249_v18 = vld [vmem:[#allocation31_spill] sm:$0xff]  ;;  %v17252_v54 = vld [vmem:[#allocation42_spill] sm:$0xff] }
0x171e   :  { %11275 = vmatmul.mubr.f32.vlgmr.msra.gmra.mxu1 %v16503_v26  ;;  %v17269_v26 = vld [vmem:[#allocation47_spill] sm:$0xff] }
0x171f   :  { %17238 = vst [vmem:[#allocation57_spill] sm:$0xff] %v16512_v58  ;;  %12447 = vmatpush3.msra.mxu1 %v16176_v33  ;;  %v16517_v8 = vand.u32 4294901760, %v10881_v47  ;;  %v16520_v36 = vsub.f32 %v10880_v44, %v16512_v58  ;;  %v11019_v48 = vand.u32 4294901760, %v11018_v2  ;;  %v11026_v34 = vsub.f32 %v16506_v55, %v11025_v7  ;;  %v17253_v44 = vld [vmem:[#allocation23_spill] sm:$0xff] }
0x1720   :  { %12448 = vmatprep.subr.mxu1 %v16181_v13 }
0x1721   :  { %17239 = vst [vmem:[#allocation58_spill] sm:$0xff] %v16517_v8  ;;  %12449 = vmatpush3.msra.mxu1 %v16187_v6  ;;  %11280 = vmatprep.mubr.f32.mxu1 %v16517_v8  ;;  %v11020_v51 = vsub.f32 %v11018_v2, %v11019_v48  ;;  %v16529_v35 = vsub.f32 %v10881_v47, %v16517_v8  ;;  %v17008_v28 = vand.u32 4294901760, %v16520_v36  ;;  %v11027_v43 = vand.u32 4294901760, %v11026_v34  ;;  %v17254_v47 = vld [vmem:[#allocation44_spill] sm:$0xff]  ;;  %v17257_v34 = vld [vmem:[#allocation41_spill] sm:$0xff] }
0x1722   :  { %12450 = vmatprep.subr.mxu1 %v16194_v27  ;;  %11282 = vmatmul.mubr.f32.gmra.mxu1 %v16512_v58  ;;  %v17267_v58 = vld [vmem:[#allocation45_spill] sm:$0xff] }
0x1723   :  { %12451 = vmatpush3.msra.mxu1 %v16201_v1  ;;  %11533 = vmatprep.mubr.f32.mxu1 %v11019_v48  ;;  %v11021_v46 = vand.u32 4294901760, %v11020_v51  ;;  %v17009_v31 = vand.u32 4294901760, %v16529_v35  ;;  %v11041_v30 = vsub.f32 %v16520_v36, %v17008_v28  ;;  %v17256_v48 = vld [vmem:[#allocation46_spill] sm:$0xff]  ;;  %v17258_v51 = vld [vmem:[#allocation48_spill] sm:$0xff]  ;;  %v17265_v28 = vld [vmem:[#allocation43_spill] sm:$0xff]  ;;  %v17268_v8 = vand.u32 4294901760, %v16529_v35 }
0x1724   :  { %12452 = vmatprep.subr.mxu1 %v16211_v63 }
0x1725   :  { %12453 = vmatpush3.msra.mxu1 %v16221_v15  ;;  %11022 = vmatprep.mubr.f32.mxu0 %v11021_v46  ;;  %v11035_v60 = vsub.f32 %v16529_v35, %v17009_v31  ;;  %v11042_v42 = vand.u32 4294901760, %v11041_v30  ;;  %v17259_v46 = vld [vmem:[#allocation28_spill] sm:$0xff]  ;;  %v17266_v31 = vld [vmem:[#allocation25_spill] sm:$0xff] }
0x1726   :  { %12454 = vmatprep.subr.mxu1 %v16244_v39  ;;  %11028 = vmatmul.mubr.f32.vlgmr.msra.gmra.mxu0 %v11027_v43  ;;  %v17260_v43 = vld [vmem:[#allocation50_spill] sm:$0xff]  ;;  %v17262_v30 = vld [vmem:[#allocation52_spill] sm:$0xff] }
0x1727   :  { %12409 = vmatpush3.msra.mxu0 %v16185_v14  ;;  %12455 = vmatpush3.msra.mxu1 %v16250_v3  ;;  %v11036_v41 = vand.u32 4294901760, %v11035_v60  ;;  %v17261_v60 = vld [vmem:[#allocation37_spill] sm:$0xff] }
0x1728   :  { %12410 = vmatprep.subr.mxu0 %v16192_v49  ;;  %12456 = vmatprep.subr.mxu1 %v16258_v16 }
0x1729   :  { %12411 = vmatpush3.msra.mxu0 %v16199_v11  ;;  %12457 = vmatpush3.msra.mxu1 %v16267_v12 }
0x172a   :  { %11037 = vmatprep.mubr.f32.mxu0 %v11036_v41  ;;  %12412 = vmatprep.subr.mxu0 %v16209_v20  ;;  %v17263_v41 = vld [vmem:[#allocation27_spill] sm:$0xff] }
0x172b   :  { %12458 = vmatprep.subr.mxu1 %v16274_v61  ;;  %11043 = vmatmul.mubr.f32.gmra.mxu0 %v11042_v42  ;;  %v17264_v42 = vld [vmem:[#allocation54_spill] sm:$0xff] }
0x172c   :  { %12413 = vmatpush3.msra.mxu0 %v16219_v59  ;;  %12459 = vmatpush3.msra.mxu1 %v16281_v53 }
0x172d   :  { %12414 = vmatprep.subr.mxu0 %v16229_v37  ;;  %11417 = vmatprep.mubr.f32.mxu0 %v11018_v2  ;;  %v17255_v2 = vld [vmem:[#allocation30_spill] sm:$0xff] }
0x172e   :  { %12460 = vmatprep.subr.mxu1 %v16291_v45  ;;  %12415 = vmatpush3.msra.mxu0 %v16237_v57 }
0x172f   :  { %12461 = vmatpush3.msra.mxu1 %v16301_v22  ;;  %12416 = vmatprep.subr.mxu0 %v16256_v23 }
0x1730   :  { %12462 = vmatprep.subr.mxu1 %v16324_v10  ;;  %12417 = vmatpush3.msra.mxu0 %v16265_v50 }
0x1731   :  { %12463 = vmatpush3.msra.mxu1 %v16330_v19  ;;  %12418 = vmatprep.subr.mxu0 %v16272_v0 }
0x1732   :  { %12464 = vmatprep.subr.mxu1 %v16338_v9  ;;  %12419 = vmatpush3.msra.mxu0 %v16279_v52 }
0x1733   :  { %12465 = vmatpush3.msra.mxu1 %v17240_v32  ;;  %12420 = vmatprep.subr.mxu0 %v17241_v25 }
0x1734   :  { %12466 = vmatprep.subr.mxu1 %v17242_v5  ;;  %12421 = vmatpush3.msra.mxu0 %v17243_v24 }
0x1735   :  { %12467 = vmatpush3.msra.mxu1 %v17244_v21  ;;  %12422 = vmatprep.subr.mxu0 %v17245_v56 }
0x1736   :  { %12468 = vmatprep.subr.mxu1 %v17246_v4  ;;  %12423 = vmatpush3.msra.mxu0 %v17247_v38 }
0x1737   :  { %12469 = vmatpush3.msra.mxu1 %v17248_v40  ;;  %12424 = vmatprep.subr.mxu0 %v17249_v18 }
0x1738   :  { %12470 = vmatprep.subr.mxu1 %v17250_v17  ;;  %12425 = vmatpush3.msra.mxu0 %v17251_v62 }
0x1739   :  { %12471 = vmatpush3.msra.mxu1 %v17252_v54  ;;  %12426 = vmatprep.subr.mxu0 %v17253_v44 }
0x173a   :  { %12472 = vmatprep.subr.mxu1 %v17254_v47  ;;  %12427 = vmatpush3.msra.mxu0 %v17255_v2 }
0x173b   :  { %12473 = vmatpush3.msra.mxu1 %v17256_v48  ;;  %12428 = vmatprep.subr.mxu0 %v17257_v34 }
0x173c   :  { %12474 = vmatprep.subr.mxu1 %v17258_v51  ;;  %12429 = vmatpush3.msra.mxu0 %v17259_v46 }
0x173d   :  { %12475 = vmatpush3.msra.mxu1 %v17260_v43  ;;  %12430 = vmatprep.subr.mxu0 %v17261_v60 }
0x173e   :  { %12476 = vmatprep.subr.mxu1 %v17262_v30  ;;  %12431 = vmatpush3.msra.mxu0 %v17263_v41  ;;  %v17270_v41 = vld [vmem:[#allocation49_spill] sm:$0xff] }
0x173f   :  { %12477 = vmatpush3.msra.mxu1 %v17264_v42  ;;  %12432 = vmatprep.subr.mxu0 %v17265_v28  ;;  %v17271_v28 = vld [vmem:[#allocation51_spill] sm:$0xff] }
0x1740   :  { %11537 = vmatmul.mubr.f32.vlgmr.msra.gmra.mxu1 %v11025_v7  ;;  %12522 = vmatprep.subr.mxu1 %v17266_v31  ;;  %v17272_v7 = vand.u32 4294901760, %v16520_v36  ;;  %v17273_v31 = vld [vmem:[#allocation53_spill] sm:$0xff] }
0x1741   :  { %12433 = vmatpush3.msra.mxu0 %v17267_v58  ;;  %11544 = vmatprep.mubr.f32.mxu1 %v17268_v8 }
0x1742   :  { %12523 = vmatpush3.msra.mxu1 %v16176_v33  ;;  %12434 = vmatprep.subr.mxu0 %v17269_v26  ;;  %v17274_v33 = vld [vmem:[#allocation55_spill] sm:$0xff] }
0x1743   :  { %12524 = vmatprep.subr.mxu1 %v16181_v13  ;;  %12435 = vmatpush3.msra.mxu0 %v17270_v41  ;;  %v17275_v13 = vld [vmem:[#allocation56_spill] sm:$0xff] }
0x1744   :  { %12525 = vmatpush3.msra.mxu1 %v16187_v6  ;;  %12436 = vmatprep.subr.mxu0 %v17271_v28  ;;  %v17276_v6 = vld [vmem:[#allocation32_spill] sm:$0xff] }
0x1745   :  { %11548 = vmatmul.mubr.f32.gmra.mxu1 %v17272_v7  ;;  %12526 = vmatprep.subr.mxu1 %v16194_v27  ;;  %v17277_v8 = vand.u32 4294901760, %v17276_v6  ;;  %v17278_v27 = vand.u32 4294901760, %v16185_v14  ;;  %v17282_v14 = vand.u32 4294901760, %v16219_v59  ;;  %v17286_v59 = vand.u32 4294901760, %v16265_v50 }
0x1746   :  { %12437 = vmatpush3.msra.mxu0 %v17273_v31  ;;  %12527 = vmatpush3.msra.mxu1 %v16201_v1  ;;  %v17279_v1 = vand.u32 4294901760, %v16192_v49  ;;  %v17283_v49 = vand.u32 4294901760, %v16229_v37  ;;  %v17287_v37 = vand.u32 4294901760, %v16272_v0  ;;  %v17293_v50 = vand.u32 4294901760, %v17249_v18 }
0x1747   :  { %11825 = vmatprep.mubr.f32.mxu1 %v16508_v29  ;;  %12438 = vmatprep.subr.mxu0 %v17274_v33  ;;  %v17295_v0 = vand.u32 4294901760, %v17253_v44 }
0x1748   :  { %12528 = vmatprep.subr.mxu1 %v16211_v63  ;;  %12439 = vmatpush3.msra.mxu0 %v17275_v13  ;;  %v17280_v63 = vand.u32 4294901760, %v16199_v11  ;;  %v17284_v11 = vand.u32 4294901760, %v16237_v57  ;;  %v17288_v57 = vand.u32 4294901760, %v16279_v52  ;;  %v17297_v52 = vand.u32 4294901760, %v17257_v34  ;;  %v11921_v34 = vld [vmem:[%s16745_s10] ss:$0 sm:$0xff] }
0x1749   :  { %12529 = vmatpush3.msra.mxu1 %v16221_v15  ;;  %11420 = vmatmul.mubr.f32.vlgmr.msra.gmra.mxu0 %v16506_v55  ;;  %v17281_v15 = vand.u32 4294901760, %v16209_v20  ;;  %v17285_v20 = vand.u32 4294901760, %v16256_v23  ;;  %v17291_v23 = vand.u32 4294901760, %v17245_v56  ;;  %v17304_v55 = vld [vmem:[#allocation20_spill] sm:$0xff]  ;;  %s13694_s10 = smov [#allocation12]  }
0x174a   :  { %12484 = vmatprep.subr.mxu0 %v17277_v8  ;;  %12530 = vmatprep.subr.mxu1 %v16244_v39  ;;  %v17289_v39 = vand.u32 4294901760, %v17241_v25  ;;  %v17309_v25 = vand.u32 4294901760, %v17271_v28  ;;  %s11900_s17 = sshll.u32 %s13694_s10, 4  ;;  %s11901_s17 = int_to_ptr.vmem [resolvable:$true] %s11900_s17 }
0x174b   :  { %11426 = vmatprep.mubr.f32.mxu0 %v16529_v35  ;;  %12485 = vmatpush3.msra.mxu0 %v17278_v27  ;;  %v17307_v35 = vand.u32 4294901760, %v17269_v26  ;;  %s13628_s18 = scalar_lea.vmem %s11901_s17, 256  ;;  %p13633_p12 = scmp.lt.s32.totalorder %s11901_s17, %s11901_s17 }
0x174c   :  { %12531 = vmatpush3.msra.mxu1 %v16250_v3  ;;  %12486 = vmatprep.subr.mxu0 %v17279_v1  ;;  %v17290_v3 = vand.u32 4294901760, %v17243_v24  ;;  %v17311_v24 = vand.u32 4294901760, %v17273_v31  ;;  %p13629_p11 = scmp.ne.s32.totalorder %s11901_s17, %s13628_s18  ;;  %p13634_p13 = scmp.lt.s32.totalorder %s13628_s18, %s13628_s18 }
0x174d   :  { %12532 = vmatprep.subr.mxu1 %v16258_v16  ;;  %12487 = vmatpush3.msra.mxu0 %v17280_v63  ;;  %v17292_v16 = vand.u32 4294901760, %v17247_v38 }
0x174e   :  { %12533 = vmatpush3.msra.mxu1 %v16267_v12  ;;  %11429 = vmatmul.mubr.f32.gmra.mxu0 %v16520_v36  ;;  %v17294_v12 = vand.u32 4294901760, %v17251_v62  ;;  %v17306_v36 = vld [vmem:[#allocation58_spill] sm:$0xff]  ;;  %p13635_p0 = por %p13634_p13, %p13633_p12 }
0x174f   :  { %12488 = vmatprep.subr.mxu0 %v17281_v15  ;;  %12534 = vmatprep.subr.mxu1 %v16274_v61  ;;  %v17296_v61 = vand.u32 4294901760, %v17255_v2 }
0x1750   :  { %12489 = vmatpush3.msra.mxu0 %v17282_v14  ;;  %11714 = vmatprep.mubr.f32.mxu0 %v16508_v29  ;;  %v17305_v29 = vand.u32 4294901760, %v17267_v58  ;;  %v17313_v58 = vand.u32 4294901760, %v17275_v13  ;;  %p13636_p1 = pnand %p13635_p0, %p13629_p11 }
0x1751   :  { %12535 = vmatpush3.msra.mxu1 %v16281_v53  ;;  %12490 = vmatprep.subr.mxu0 %v17283_v49  ;;  %v17298_v53 = vand.u32 4294901760, %v17259_v46 }
0x1752   :  { %12536 = vmatprep.subr.mxu1 %v16291_v45  ;;  %12491 = vmatpush3.msra.mxu0 %v17284_v11  ;;  %v17299_v45 = vand.u32 4294901760, %v17261_v60 }
0x1753   :  { %12537 = vmatpush3.msra.mxu1 %v16301_v22  ;;  %12492 = vmatprep.subr.mxu0 %v17285_v20  ;;  %v17300_v22 = vld [vmem:[#allocation27_spill] sm:$0xff] }
0x1754   :  { %12538 = vmatprep.subr.mxu1 %v16324_v10  ;;  %12493 = vmatpush3.msra.mxu0 %v17286_v59  ;;  %v17301_v10 = vand.u32 4294901760, %v17300_v22 }
0x1755   :  { %12539 = vmatpush3.msra.mxu1 %v16330_v19  ;;  %12494 = vmatprep.subr.mxu0 %v17287_v37  ;;  %v17302_v19 = vld [vmem:[#allocation43_spill] sm:$0xff] }
0x1756   :  { %12540 = vmatprep.subr.mxu1 %v16338_v9  ;;  %12495 = vmatpush3.msra.mxu0 %v17288_v57  ;;  %v17303_v9 = vand.u32 4294901760, %v17302_v19 }
0x1757   :  { %12541 = vmatpush3.msra.mxu1 %v17240_v32  ;;  %12496 = vmatprep.subr.mxu0 %v17289_v39  ;;  %v17308_v32 = vand.u32 4294901760, %v17270_v41 }
0x1758   :  { %12542 = vmatprep.subr.mxu1 %v17242_v5  ;;  %12497 = vmatpush3.msra.mxu0 %v17290_v3  ;;  %v17310_v5 = vld [vmem:[#allocation57_spill] sm:$0xff] }
0x1759   :  { %12543 = vmatpush3.msra.mxu1 %v17244_v21  ;;  %12498 = vmatprep.subr.mxu0 %v17291_v23  ;;  %v17312_v21 = vand.u32 4294901760, %v17274_v33 }
0x175a   :  { %12544 = vmatprep.subr.mxu1 %v17246_v4  ;;  %12499 = vmatpush3.msra.mxu0 %v17292_v16 }
0x175b   :  { %12545 = vmatpush3.msra.mxu1 %v17248_v40  ;;  %12500 = vmatprep.subr.mxu0 %v17293_v50 }
0x175c   :  { %12546 = vmatprep.subr.mxu1 %v17250_v17  ;;  %12501 = vmatpush3.msra.mxu0 %v17294_v12 }
0x175d   :  { %12547 = vmatpush3.msra.mxu1 %v17252_v54  ;;  %12502 = vmatprep.subr.mxu0 %v17295_v0 }
0x175e   :  { %12548 = vmatprep.subr.mxu1 %v17254_v47  ;;  %12503 = vmatpush3.msra.mxu0 %v17296_v61 }
0x175f   :  { %12549 = vmatpush3.msra.mxu1 %v17256_v48  ;;  %12504 = vmatprep.subr.mxu0 %v17297_v52 }
0x1760   :  { %12550 = vmatprep.subr.mxu1 %v17258_v51  ;;  %12505 = vmatpush3.msra.mxu0 %v17298_v53  ;;  %v17314_v53 = vld [vmem:[#allocation24_spill] sm:$0xff] }
0x1761   :  { %12551 = vmatpush3.msra.mxu1 %v17260_v43  ;;  %12506 = vmatprep.subr.mxu0 %v17299_v45 }
0x1762   :  { %12552 = vmatprep.subr.mxu1 %v17262_v30  ;;  %12507 = vmatpush3.msra.mxu0 %v17301_v10  ;;  %v17315_v10 = vld [vmem:[#allocation22_spill] sm:$0xff] }
0x1763   :  { %12553 = vmatpush3.msra.mxu1 %v17264_v42  ;;  %12508 = vmatprep.subr.mxu0 %v17303_v9 }
0x1764   :  { %11827 = vmatmul.mubr.f32.vlgmr.msra.gmra.mxu1 %v17304_v55  ;;  %12509 = vmatpush3.msra.mxu0 %v17305_v29 }
0x1765   :  { %11832 = vmatprep.mubr.f32.mxu1 %v17306_v36  ;;  %12510 = vmatprep.subr.mxu0 %v17307_v35 }
0x1766   :  { %12511 = vmatpush3.msra.mxu0 %v17308_v32 }
0x1767   :  { %12512 = vmatprep.subr.mxu0 %v17309_v25 }
0x1768   :  { %11834 = vmatmul.mubr.f32.gmra.mxu1 %v17310_v5  ;;  %12513 = vmatpush3.msra.mxu0 %v17311_v24 }
0x1769   :  { %12514 = vmatprep.subr.mxu0 %v17312_v21 }
0x176a   :  { %12515 = vmatpush3.msra.mxu0 %v17313_v58 }
0x176b   :  { %11716 = vmatmul.mubr.f32.vlgmr.msra.gmra.mxu0 %v17304_v55 }
0x176c   :  { %11721 = vmatprep.mubr.f32.mxu0 %v17306_v36 }
0x176f   :  { %11723 = vmatmul.mubr.f32.gmra.mxu0 %v17310_v5 }
0x17de   :  { %v12402_v26 = vpop.f32.mrf.mxu1 }
0x17e0   :  { %v12403_v28 = vpop.f32.mrf.mxu1 }
0x17e1   :  { %v12404_v41 = vadd.f32 %v12403_v28, %v12402_v26 }
0x17e2   :  { %v12405_v4 = vpop.f32.mrf.mxu1 }
0x17e4   :  { %v12406_v40 = vpop.f32.mrf.mxu1 }
0x17e5   :  { %v12407_v6 = vadd.f32 %v12406_v40, %v12405_v4 }
0x17e6   :  { %v12364_v56 = vpop.f32.mrf.mxu0 }
0x17e8   :  { %v12365_v38 = vpop.f32.mrf.mxu0 }
0x17e9   :  { %v12366_v48 = vadd.f32 %v12365_v38, %v12364_v56 }
0x17eb   :  { %v12367_v18 = vpop.f32.mrf.mxu0  ;;  %v11030_v43 = vadd.f32 %v12366_v48, %v11921_v34 }
0x17ed   :  { %v12368_v62 = vpop.f32.mrf.mxu0  ;;  %v11277_v33 = vadd.f32 %v12404_v41, %v11030_v43 }
0x17ee   :  { %v12369_v60 = vadd.f32 %v12368_v62, %v12367_v18 }
0x17f0   :  { %v11045_v31 = vadd.f32 %v12369_v60, %v11921_v34 }
0x17f2   :  { %v11284_v15 = vadd.f32 %v12407_v6, %v11045_v31 }
0x1800   :  { %v12478_v17 = vpop.f32.mrf.mxu1 }
0x1802   :  { %v12479_v54 = vpop.f32.mrf.mxu1 }
0x1803   :  { %v12480_v63 = vadd.f32 %v12479_v54, %v12478_v17 }
0x1805   :  { %v12481_v47 = vpop.f32.mrf.mxu1 }
0x1807   :  { %v12482_v51 = vpop.f32.mrf.mxu1 }
0x1808   :  { %v12483_v57 = vadd.f32 %v12482_v51, %v12481_v47 }
0x1809   :  { %v12440_v44 = vpop.f32.mrf.mxu0 }
0x180b   :  { %v12441_v2 = vpop.f32.mrf.mxu0 }
0x180c   :  { %v12442_v42 = vadd.f32 %v12441_v2, %v12440_v44 }
0x180e   :  { %v12443_v46 = vpop.f32.mrf.mxu0  ;;  %v11422_v8 = vadd.f32 %v12442_v42, %v11277_v33 }
0x1810   :  { %v12444_v7 = vpop.f32.mrf.mxu0  ;;  %v11539_v20 = vadd.f32 %v12480_v63, %v11422_v8 }
0x1811   :  { %v12445_v27 = vadd.f32 %v12444_v7, %v12443_v46 }
0x1813   :  { %v11431_v11 = vadd.f32 %v12445_v27, %v11284_v15 }
0x1815   :  { %v11550_v50 = vadd.f32 %v12483_v57, %v11431_v11 }
0x1824   :  { %v12554_v30 = vpop.f32.mrf.mxu1 }
0x1826   :  { %v12555_v13 = vpop.f32.mrf.mxu1 }
0x1827   :  { %v12556_v39 = vadd.f32 %v12555_v13, %v12554_v30 }
0x1828   :  { %v12557_v14 = vpop.f32.mrf.mxu1 }
0x182a   :  { %v12558_v23 = vpop.f32.mrf.mxu1 }
0x182b   :  { %v12516_v1 = vpop.f32.mrf.mxu0  ;;  %v12559_v61 = vadd.f32 %v12558_v23, %v12557_v14 }
0x182d   :  { %v12517_v49 = vpop.f32.mrf.mxu0 }
0x182e   :  { %v12518_v59 = vadd.f32 %v12517_v49, %v12516_v1 }
0x182f   :  { %v12519_v37 = vpop.f32.mrf.mxu0 }
0x1830   :  { %v11718_v3 = vadd.f32 %v12518_v59, %v11539_v20 }
0x1831   :  { %v12520_v16 = vpop.f32.mrf.mxu0 }
0x1832   :  { %v12521_v12 = vadd.f32 %v12520_v16, %v12519_v37  ;;  %v11829_v0 = vadd.f32 %v12556_v39, %v11718_v3 }
0x1834   :  { %v11725_v52 = vadd.f32 %v12521_v12, %v11550_v50  ;;  %v11839_v45 = vadd.f32 %v11829_v0, %v17314_v53 }
0x1836   :  { %11843 = vadd.xlane.f32.xlu0 %v11839_v45  ;;  %v11836_v22 = vadd.f32 %v12559_v61, %v11725_v52 }
0x1838   :  { %v11840_v19 = vadd.f32 %v11836_v22, %v17315_v10 }
0x183a   :  { %11845 = vadd.xlane.f32.xlu1 %v11840_v19 }
0x18bf   :  { %v11844_v9 = vpop.xlane.xlu0 %11843 }
0x18c0   :  { %v11847_v55 = vmul.f32 0.0078125, %v11844_v9 }
0x18c2   :  { %v11849_v29 = vsub.f32 %v11839_v45, %v11847_v55 }
0x18c3   :  { %v11846_v36 = vpop.xlane.xlu1 %11845 }
0x18c4   :  { %v11848_v35 = vmul.f32 0.0078125, %v11846_v36  ;;  %v11851_v32 = vmul.f32 %v11849_v29, %v11849_v29 }
0x18c6   :  { %v11850_v25 = vsub.f32 %v11840_v19, %v11848_v35  ;;  %11853 = vadd.xlane.f32.xlu0 %v11851_v32 }
0x18c8   :  { %v11852_v5 = vmul.f32 %v11850_v25, %v11850_v25 }
0x18ca   :  { %11855 = vadd.xlane.f32.xlu1 %v11852_v5 }
0x18cb   :  { %13639 = shalt.err (!%p13636_p1)
}
0x18cc   :  { %11906 = dma.vmem_to_hbm [thread:$0]  %s11901_s17, 256, %s16749_s14, [#allocation13], %s13685_s29, %s13685_s29, %s13686_s30  }
0x18cd   :  { %v11922_v38 = vld [vmem:[%s16746_s11] ss:$0 sm:$0xff]  ;;  %s13695_s14 = smov [#allocation11]  }
0x18ce   :  { %v11923_v18 = vld [vmem:[%s16747_s12] ss:$0 sm:$0xff]  ;;  %s11888_s24 = sshll.u32 %s13695_s14, 4  ;;  %s11889_s24 = int_to_ptr.vmem [resolvable:$true] %s11888_s24 }
0x18cf   :  { %s13648_s3 = scalar_lea.vmem %s11889_s24, 256  ;;  %p13653_p3 = scmp.lt.s32.totalorder %s11889_s24, %s11889_s24 }
0x18d0   :  { %p13649_p2 = scmp.ne.s32.totalorder %s11889_s24, %s13648_s3  ;;  %p13654_p4 = scmp.lt.s32.totalorder %s13648_s3, %s13648_s3 }
0x18d2   :  { %p13655_p5 = por %p13654_p4, %p13653_p3 }
0x18d4   :  { %p13656_p6 = pnand %p13655_p5, %p13649_p2 }
0x194f   :  { %v11854_v24 = vpop.xlane.xlu0 %11853 }
0x1950   :  { %v11857_v21 = vmul.f32 0.0078125, %v11854_v24 }
0x1952   :  { %v11859_v58 = vadd.f32 1e-05, %v11857_v21 }
0x1953   :  { %v11856_v26 = vpop.xlane.xlu1 %11855 }
0x1954   :  { %13522 = vrsqrt.f32 %v11859_v58  ;;  %v11858_v28 = vmul.f32 0.0078125, %v11856_v26 }
0x1956   :  { %v11860_v56 = vadd.f32 1e-05, %v11858_v28 }
0x1958   :  { %13524 = vrsqrt.f32 %v11860_v56 }
0x1961   :  { %v13523_v4 = vpop.eup %13522 }
0x1962   :  { %v11863_v40 = vmul.f32 %v13523_v4, %v11849_v29 }
0x1964   :  { %v11871_v17 = vmul.f32 %v11922_v38, %v11863_v40 }
0x1965   :  { %v13525_v62 = vpop.eup %13524 }
0x1966   :  { %v11864_v54 = vmul.f32 %v13525_v62, %v11850_v25  ;;  %v11879_v44 = vadd.f32 %v11923_v18, %v11871_v17 }
0x1968   :  { %v11872_v47 = vmul.f32 %v11922_v38, %v11864_v54  ;;  %11881 = vst [vmem:[#allocation11] sm:$0xff] %v11879_v44 }
0x196a   :  { %v11880_v2 = vadd.f32 %v11923_v18, %v11872_v47 }
0x196c   :  { %11882 = vst [vmem:[#allocation11 + $0x8] sm:$0xff] %v11880_v2 }
0x196d   :  { %13659 = shalt.err (!%p13656_p6)
}
0x196e   :  { %11894 = dma.vmem_to_hbm [thread:$0]  %s11889_s24, 256, %s16748_s13, [#allocation4], %s13685_s29, %s13685_s29, %s13686_s30  }
0x196f   :  { %13674 = dma.done.wait [#allocation4], 256  }
0x1970   :  { %13675 = vsyncadd [#allocation4], 4294967040 }
0x1971   :  { %13676 = dma.done.wait [#allocation13], 256  }
0x1972   :  { %13677 = vsyncadd [#allocation13], 4294967040 }
0x1973   :  { %11913 = vsyncpa [#allocation3], 1 }
0x1974   :  { %11914 = vsyncpa [#allocation6], 1 }
0x1975   :  { %11915 = vsyncpa [#allocation9], 1 }
0x1976   :  { %11916 = vsyncpa [#allocation4], 1 }
0x1977   :  { %11917 = vsyncpa [#allocation13], 1 }

</bundles_post_ra>
